<compile_context>
chip_gen: v5e
topology: v5e:2x2
jax: 0.10.0
libtpu: 0.0.40
codegen_flags: <defaults>
</compile_context>

<pallas_src>
import functools

import jax
import jax.numpy as jnp
from jax.experimental import pallas as pl
from jax.experimental.pallas import tpu as pltpu

# ----------------------------- sizes ---------------------------------------
B = 2             # batch
T = 8             # sequence length
D = 32            # block_size
L = 64            # linear_size
H = 4             # attention heads
DK = D // H       # per-head dim
K_CSGU = 3        # conv_mod kernel size
K_DW = 3          # depthwise_conv_mod kernel size
R = 2 * T - 1     # relative pos-enc length (module input)
RP = 2 * T        # padded pos-enc length used inside the kernel
BT = B * T
HB = H * B        # folded (head, batch) leading dim used inside the kernel
LN_EPS = 1e-5
FF_SCALE = 0.5


# ------------------------- packed parameter layouts --------------------------
def _align8(n):
    return ((n + 7) // 8) * 8


# width-32 slab: row-stacked matrices (8-row aligned) + one packed vector group.
_MAT32_ENTRIES = [
    ("ffm_w2", L), ("ff_w2", L),
    ("cp1_w_r", D), ("cp1_w_g", D),
    ("cp2_w", L // 2),
    ("mp_w_1", D), ("mp_w_2", D),
    ("att_wp", D), ("att_wo", D),
    ("csgu_conv_w", K_CSGU), ("dw_w_1", K_DW), ("dw_w_2", K_DW),
]
MAT32_OFF = {}
_row = 0
for _name, _n in _MAT32_ENTRIES:
    MAT32_OFF[_name] = (_row, _n)
    _row += _align8(_n)

_VEC32_NAMES = [
    "ln_ffm_w", "ln_ffm_b", "ln_att_w", "ln_att_b", "ln_mlp_w", "ln_mlp_b",
    "ln_ff_w", "ln_ff_b", "ln_fin_w", "ln_fin_b",
    "ffm_b2", "ff_b2", "att_bo",
    "cp1_b_r", "cp1_b_g",
    "csgu_ln_w", "csgu_ln_b", "csgu_conv_b",
    "cp2_b", "dw_b_1", "dw_b_2", "mp_b",
]
VEC32_ROW0 = _row
VEC32_IDX = {n: i for i, n in enumerate(_VEC32_NAMES)}
VEC32_ROWS = _align8(len(_VEC32_NAMES))
SLAB32_ROWS = VEC32_ROW0 + VEC32_ROWS

# width-128 slab: fused attention projection + both first FF layers side by side.
S128_ATT_W = 0                               # D rows : [Wq | Wk | Wv | Wq]
S128_ATT_B = _align8(D)                      # 1 row  : [bq+u | bk | bv | bq+v]
S128_FF1_W = S128_ATT_B + 8                  # D rows : [ffm_w1 | ff_w1]
S128_FF1_B = S128_FF1_W + _align8(D)         # 1 row  : [ffm_b1 | ff_b1]
SLAB128_ROWS = S128_FF1_B + 8


# ------------------------------- kernel -------------------------------------
def ebranchformer_kernel(x_ref, pos_ref, mask_ref, slab32_ref, slab128_ref,
                         o_ref, *, fast):
    f32 = jnp.float32

    # ---- packed parameter access ----
    vecs = slab32_ref[VEC32_ROW0:VEC32_ROW0 + VEC32_ROWS, :]   # one load, 22 rows

    def vec(name):
        i = VEC32_IDX[name]
        return vecs[i:i + 1, :]

    def mat(name):
        r0, n = MAT32_OFF[name]
        return slab32_ref[r0:r0 + n, :]

    # ---- math helpers ----
    def layer_norm(a, w, b):
        mu = jnp.mean(a, axis=-1, keepdims=True)
        var = jnp.mean(jnp.square(a - mu), axis=-1, keepdims=True)
        return (a - mu) * jax.lax.rsqrt(var + LN_EPS) * w + b

    def matmul(a, w):
        return jnp.dot(a, w, preferred_element_type=f32)

    def silu(a):
        return a * jax.nn.sigmoid(a)

    def gelu(a):
        # TODO(synk): torch.nn.GELU() defaults to the exact erf form; the tanh
        # approximation is used here for guaranteed Mosaic lowering (tiny diff).
        c = 0.7978845608028654  # sqrt(2/pi)
        return 0.5 * a * (1.0 + jnp.tanh(c * (a + 0.044715 * a * a * a)))

    # precomputed per-row masks: [keep(=not padded), has-prev-frame, has-next-frame]
    rowm = mask_ref[0:BT, :]                     # (BT, 32), first 3 lanes used
    keep = rowm[:, 0:1]
    prev_ok = rowm[:, 1:2]
    next_ok = rowm[:, 2:3]
    kb_rows = mask_ref[BT:BT + HB, :]            # (HB, 32), first T lanes used
    key_bias = kb_rows[:, 0:T]                   # (HB, T): 0.0 valid / -1e30 padded

    if fast:
        # XLU sublane rotation; the boundary masks zero the wrapped rows.
        def shift_prev(a):                       # a[t-1] within each sequence
            return pltpu.roll(a, 1, 0) * prev_ok

        def shift_next(a):                       # a[t+1] within each sequence
            return pltpu.roll(a, BT - 1, 0) * next_ok
    else:
        def shift_prev(a):
            z = jnp.zeros((1, a.shape[1]), f32)
            return jnp.concatenate([z, a[:-1, :]], axis=0) * prev_ok

        def shift_next(a):
            z = jnp.zeros((1, a.shape[1]), f32)
            return jnp.concatenate([a[1:, :], z], axis=0) * next_ok

    def dwconv(a, w_name, b_name):
        # depthwise 'same' conv along time (K=3) on the (B*T, C) slab
        w = mat(w_name)                          # (3, C): taps for t-1, t, t+1
        b = vec(b_name)                          # (1, C)
        return (shift_prev(a) * w[0:1, :] + a * w[1:2, :]
                + shift_next(a) * w[2:3, :] + b)

    def head_stack(m2d, col0):
        # lanes [col0 : col0 + H*DK] of a (B*rows, W) slab  ->  (H*B, rows, DK)
        # leading index = h*B + b  (matches the key-bias / pos layout).
        return jnp.concatenate(
            [m2d[:, col0 + h * DK: col0 + (h + 1) * DK].reshape(B, -1, DK)
             for h in range(H)], axis=0)

    x = x_ref[...]                               # (B*T, D)

    # fused first-FF weights (macaron FF uses lanes [:L], final FF lanes [L:])
    ff1w = slab128_ref[S128_FF1_W:S128_FF1_W + D, :]       # (D, 2L)
    ff1b = slab128_ref[S128_FF1_B:S128_FF1_B + 1, :]       # (1, 2L)

    # --- macaron feed-forward (0.5-scaled residual) ---
    xn = layer_norm(x, vec("ln_ffm_w"), vec("ln_ffm_b"))
    hdn = silu(matmul(xn, ff1w[:, :L]) + ff1b[:, :L])
    x = x + FF_SCALE * (matmul(hdn, mat("ffm_w2")) + vec("ffm_b2"))

    # --- branch 1: relative-position multi-head self-attention ---
    xa = layer_norm(x, vec("ln_att_w"), vec("ln_att_b"))
    w_att = slab128_ref[S128_ATT_W:S128_ATT_W + D, :]      # (32, 128) [Wq|Wk|Wv|Wq]
    b_att = slab128_ref[S128_ATT_B:S128_ATT_B + 1, :]      # [bq+u | bk | bv | bq+v]
    qkvq = matmul(xa, w_att) + b_att                       # (BT, 128), one MXU pass
    pe2d = matmul(pos_ref[...], mat("att_wp"))             # (B*RP, 32), no bias

    qU = head_stack(qkvq, 0)                               # (HB, T, DK)  q + pos_u
    k_ = head_stack(qkvq, D)                               # (HB, T, DK)
    v_ = head_stack(qkvq, 2 * D)                           # (HB, T, DK)
    qV = head_stack(qkvq, 3 * D)                           # (HB, T, DK)  q + pos_v
    pe = head_stack(pe2d, 0)                               # (HB, RP, DK)

    ac = jnp.einsum("xtd,xsd->xts", qU, k_, preferred_element_type=f32)
    bdf = jnp.einsum("xtd,xrd->xtr", qV, pe, preferred_element_type=f32)
    # rel_shift: bd[:, i, j] = bdf[:, i, j - i + T - 1]  (left_context = 0; the
    # padded pos column RP-1 is never addressed).
    bd = jnp.concatenate(
        [bdf[:, i:i + 1, T - 1 - i:2 * T - 1 - i] for i in range(T)], axis=1)

    # additive key-padding bias; exp underflows to exactly 0.0 for padded keys,
    # matching masked_fill(min) before + masked_fill(0.0) after the softmax.
    scores = (ac + bd) * (1.0 / (DK ** 0.5)) + key_bias[:, None, :]
    mx = jnp.max(scores, axis=-1, keepdims=True)
    ex = jnp.exp(scores - mx)
    attn = ex * pl.reciprocal(jnp.sum(ex, axis=-1, keepdims=True), approx=True)

    ov = jnp.einsum("xts,xsd->xtd", attn, v_, preferred_element_type=f32)  # (HB,T,DK)
    wo = mat("att_wo")                                     # (H*DK, D), head-major rows
    if fast:
        # lane-concatenate the heads and apply one (BT,32)@(32,32) output matmul
        ov_bt = jnp.concatenate(
            [ov[h * B:(h + 1) * B].reshape(BT, DK) for h in range(H)], axis=1)
        x1 = matmul(ov_bt, wo) + vec("att_bo")
    else:
        # mathematically identical: sum of per-head row-blocks of W_out
        x1 = vec("att_bo")
        for h in range(H):
            x1 = x1 + matmul(ov[h * B:(h + 1) * B].reshape(BT, DK),
                             wo[h * DK:(h + 1) * DK, :])

    # --- branch 2: MLP with convolutional spatial gating ---
    xm = layer_norm(x, vec("ln_mlp_w"), vec("ln_mlp_b"))
    x_r = gelu(matmul(xm, mat("cp1_w_r")) + vec("cp1_b_r"))  # channel_proj1, half 1
    x_g = gelu(matmul(xm, mat("cp1_w_g")) + vec("cp1_b_g"))  # channel_proj1, half 2
    x_g = layer_norm(x_g, vec("csgu_ln_w"), vec("csgu_ln_b"))
    x_g = x_g * keep                                         # masked_fill(pad, 0)
    x_g = dwconv(x_g, "csgu_conv_w", "csgu_conv_b")
    x2 = matmul(x_r * x_g, mat("cp2_w")) + vec("cp2_b")      # channel_proj2

    # --- merge branches ---
    # DepthwiseConvolution zeroes padded frames of x_concat in-place in the caller,
    # so both the conv and merge_proj see the masked values.  The concat is never
    # materialized: conv + merge_proj are applied to the two halves separately
    # (channels are independent; row-split of the merge_proj weight).
    x1m = x1 * keep
    x2m = x2 * keep
    xd1 = dwconv(x1m, "dw_w_1", "dw_b_1")
    xd2 = dwconv(x2m, "dw_w_2", "dw_b_2")
    x = x + (matmul(x1m + xd1, mat("mp_w_1"))
             + matmul(x2m + xd2, mat("mp_w_2")) + vec("mp_b"))

    # --- feed-forward (0.5-scaled residual) ---
    xn = layer_norm(x, vec("ln_ff_w"), vec("ln_ff_b"))
    hdn = silu(matmul(xn, ff1w[:, L:]) + ff1b[:, L:])
    x = x + FF_SCALE * (matmul(hdn, mat("ff_w2")) + vec("ff_b2"))

    # --- final norm ---
    o_ref[...] = layer_norm(x, vec("ln_fin_w"), vec("ln_fin_b"))


# ------------------------------- wrapper -------------------------------------
_USE_FAST = None   # resolved on the first (eager) call


def _pallas_forward(operands, fast):
    kern = functools.partial(ebranchformer_kernel, fast=fast)
    return pl.pallas_call(
        kern,
        out_shape=jax.ShapeDtypeStruct((BT, D), jnp.float32),
        in_specs=[pl.BlockSpec(memory_space=pltpu.MemorySpace.VMEM)] * 5,
        out_specs=pl.BlockSpec(memory_space=pltpu.MemorySpace.VMEM),
    )(*operands)


def ebranchformer_forward(x, pos_enc, mask, packed):
    global _USE_FAST
    assert x.shape == (B, T, D) and pos_enc.shape == (B, R, D) and mask.shape == (B, T)
    x2d = x.reshape(BT, D).astype(jnp.float32)
    mask_f = mask.astype(jnp.float32)                        # 1.0 = padded frame

    # pad pos-enc length R=2T-1 -> RP=2T so all kernel reshapes are tile-aligned
    pos_pad = jnp.concatenate(
        [pos_enc.astype(jnp.float32), jnp.zeros((B, RP - R, D), jnp.float32)],
        axis=1).reshape(B * RP, D)

    keep = (1.0 - mask_f).reshape(BT, 1)
    tpos = jnp.tile(jnp.arange(T, dtype=jnp.int32), B).reshape(BT, 1)
    rowmask = jnp.concatenate(
        [keep,
         (tpos != 0).astype(jnp.float32),                    # frame has a predecessor
         (tpos != T - 1).astype(jnp.float32),                # frame has a successor
         jnp.zeros((BT, D - 3), jnp.float32)], axis=1)       # (BT, 32)
    kbias = jnp.where(mask_f > 0.5, -1e30, 0.0).astype(jnp.float32)   # (B, T)
    kbias = jnp.concatenate([kbias] * H, axis=0)                      # (HB, T): h*B+b
    kbias = jnp.concatenate([kbias, jnp.zeros((HB, D - T), jnp.float32)], axis=1)
    maskpack = jnp.concatenate([rowmask, kbias], axis=0)              # (BT+HB, 32)

    operands = (x2d, pos_pad, maskpack, packed["slab32"], packed["slab128"])

    # NOTE: the fast-path probe only works when called eagerly (as in this script);
    # under jit the lowering happens outside this try block.
    if _USE_FAST is None:
        try:
            out2d = _pallas_forward(operands, True)
            _USE_FAST = True
        except Exception:
            _USE_FAST = False
            out2d = _pallas_forward(operands, False)
    else:
        out2d = _pallas_forward(operands, _USE_FAST)

    # Module returns (x, mask, pos_enc)
    return out2d.reshape(B, T, D), mask, pos_enc


# ----------------------------- parameter init --------------------------------
def init_params(key):
    keys = jax.random.split(key, 32)
    it = iter(keys)

    def rnd(shape, scale=0.05):
        return scale * jax.random.normal(next(it), shape, dtype=jnp.float32)

    p = {}
    for nm in ["ln_ffm", "ln_att", "ln_mlp", "ln_ff", "ln_fin"]:
        p[nm + "_w"] = jnp.ones((1, D), jnp.float32)
        p[nm + "_b"] = jnp.zeros((1, D), jnp.float32)
    p["csgu_ln_w"] = jnp.ones((1, L // 2), jnp.float32)
    p["csgu_ln_b"] = jnp.zeros((1, L // 2), jnp.float32)
    # Linear weights stored as (in, out): the kernel computes x @ W + b.
    p["ffm_w1"] = rnd((D, L)); p["ffm_b1"] = rnd((1, L))
    p["ffm_w2"] = rnd((L, D)); p["ffm_b2"] = rnd((1, D))
    p["ff_w1"] = rnd((D, L)); p["ff_b1"] = rnd((1, L))
    p["ff_w2"] = rnd((L, D)); p["ff_b2"] = rnd((1, D))
    p["att_wq"] = rnd((D, D)); p["att_bq"] = rnd((1, D))
    p["att_wk"] = rnd((D, D)); p["att_bk"] = rnd((1, D))
    p["att_wv"] = rnd((D, D)); p["att_bv"] = rnd((1, D))
    p["att_wp"] = rnd((D, D))                                # linear_pos (no bias)
    p["att_wo"] = rnd((D, D)); p["att_bo"] = rnd((1, D))
    p["att_pos_u"] = rnd((H, DK))
    p["att_pos_v"] = rnd((H, DK))
    p["cp1_w"] = rnd((D, L)); p["cp1_b"] = rnd((1, L))
    # Depthwise conv weights stored as (K, C) (torch Conv1d weight (C,1,K) transposed)
    p["csgu_conv_w"] = rnd((K_CSGU, L // 2)); p["csgu_conv_b"] = rnd((1, L // 2))
    p["cp2_w"] = rnd((L // 2, D)); p["cp2_b"] = rnd((1, D))
    p["dw_conv_w"] = rnd((K_DW, 2 * D)); p["dw_conv_b"] = rnd((1, 2 * D))
    p["mp_w"] = rnd((2 * D, D)); p["mp_b"] = rnd((1, D))
    return p


# ----------------------------- parameter packing ------------------------------
def pack_params(p):
    half = L // 2

    mats = {
        "ffm_w2": p["ffm_w2"], "ff_w2": p["ff_w2"],
        "cp1_w_r": p["cp1_w"][:, :half], "cp1_w_g": p["cp1_w"][:, half:],
        "cp2_w": p["cp2_w"],
        "mp_w_1": p["mp_w"][:D, :], "mp_w_2": p["mp_w"][D:, :],
        "att_wp": p["att_wp"], "att_wo": p["att_wo"],
        "csgu_conv_w": p["csgu_conv_w"],
        "dw_w_1": p["dw_conv_w"][:, :D], "dw_w_2": p["dw_conv_w"][:, D:],
    }
    vec_vals = {
        "ln_ffm_w": p["ln_ffm_w"], "ln_ffm_b": p["ln_ffm_b"],
        "ln_att_w": p["ln_att_w"], "ln_att_b": p["ln_att_b"],
        "ln_mlp_w": p["ln_mlp_w"], "ln_mlp_b": p["ln_mlp_b"],
        "ln_ff_w": p["ln_ff_w"], "ln_ff_b": p["ln_ff_b"],
        "ln_fin_w": p["ln_fin_w"], "ln_fin_b": p["ln_fin_b"],
        "ffm_b2": p["ffm_b2"], "ff_b2": p["ff_b2"], "att_bo": p["att_bo"],
        "cp1_b_r": p["cp1_b"][:, :half], "cp1_b_g": p["cp1_b"][:, half:],
        "csgu_ln_w": p["csgu_ln_w"], "csgu_ln_b": p["csgu_ln_b"],
        "csgu_conv_b": p["csgu_conv_b"],
        "cp2_b": p["cp2_b"],
        "dw_b_1": p["dw_conv_b"][:, :D], "dw_b_2": p["dw_conv_b"][:, D:],
        "mp_b": p["mp_b"],
    }

    slab32 = jnp.zeros((SLAB32_ROWS, D), jnp.float32)
    for name, n in _MAT32_ENTRIES:
        r0, _ = MAT32_OFF[name]
        slab32 = slab32.at[r0:r0 + n, :].set(mats[name].reshape(n, D))
    vec_block = jnp.concatenate(
        [vec_vals[n].reshape(1, D) for n in _VEC32_NAMES], axis=0)
    slab32 = slab32.at[VEC32_ROW0:VEC32_ROW0 + len(_VEC32_NAMES), :].set(vec_block)

    # fused attention projection: [Wq|Wk|Wv|Wq] with the pos biases folded into
    # the q copies (head-major flatten of pos_u / pos_v matches the q column order).
    u_flat = p["att_pos_u"].reshape(1, D)
    v_flat = p["att_pos_v"].reshape(1, D)
    att_w = jnp.concatenate([p["att_wq"], p["att_wk"], p["att_wv"], p["att_wq"]],
                            axis=1)                          # (D, 4D)
    att_b = jnp.concatenate([p["att_bq"] + u_flat, p["att_bk"], p["att_bv"],
                             p["att_bq"] + v_flat], axis=1)  # (1, 4D)
    ff1_w = jnp.concatenate([p["ffm_w1"], p["ff_w1"]], axis=1)   # (D, 2L)
    ff1_b = jnp.concatenate([p["ffm_b1"], p["ff_b1"]], axis=1)   # (1, 2L)

    slab128 = jnp.zeros((SLAB128_ROWS, 4 * D), jnp.float32)
    slab128 = slab128.at[S128_ATT_W:S128_ATT_W + D, :].set(att_w)
    slab128 = slab128.at[S128_ATT_B:S128_ATT_B + 1, :].set(att_b)
    slab128 = slab128.at[S128_FF1_W:S128_FF1_W + D, :].set(ff1_w)
    slab128 = slab128.at[S128_FF1_B:S128_FF1_B + 1, :].set(ff1_b)

    return {"slab32": slab32, "slab128": slab128}


# --------------------------------- main ---------------------------------------
if __name__ == "__main__":
    key = jax.random.PRNGKey(0)
    kx, kp, kpar = jax.random.split(key, 3)
    x = jax.random.normal(kx, (B, T, D), dtype=jnp.float32)
    pos_enc = jax.random.normal(kp, (B, R, D), dtype=jnp.float32)
    lengths = jnp.array([T, T - 2], dtype=jnp.int32)
    mask = jnp.arange(T)[None, :] >= lengths[:, None]        # True = padded frame

    params = init_params(kpar)
    packed = pack_params(params)
    y, mask_out, pos_out = ebranchformer_forward(x, pos_enc, mask, packed)
    jax.block_until_ready(y)
    assert y.shape == (B, T, D) and y.dtype == jnp.float32
    assert bool(jnp.all(jnp.isfinite(y)))
    print("KERNEL_OK")
</pallas_src>

<mosaic_0001>
module attributes {stable_mosaic.version = 11 : i64} {
  func.func @ebranchformer_kernel(%arg0: memref<16x32xf32, #tpu.memory_space<vmem>>, %arg1: memref<32x32xf32, #tpu.memory_space<vmem>>, %arg2: memref<24x32xf32, #tpu.memory_space<vmem>>, %arg3: memref<400x32xf32, #tpu.memory_space<vmem>>, %arg4: memref<80x128xf32, #tpu.memory_space<vmem>>, %arg5: memref<16x32xf32, #tpu.memory_space<vmem>>) attributes {dimension_semantics = [], scalar_prefetch = 0 : i64, scratch_operands = 0 : i64, tpu.core_type = #tpu.core_type<tc>} {
    %c376 = arith.constant 376 : index
    %c0 = arith.constant 0 : index
    %0 = vector.load %arg3[%c376, %c0] : memref<400x32xf32, #tpu.memory_space<vmem>>, vector<24x32xf32>
    %c0_0 = arith.constant 0 : index
    %c0_1 = arith.constant 0 : index
    %1 = vector.load %arg2[%c0_0, %c0_1] : memref<24x32xf32, #tpu.memory_space<vmem>>, vector<16x32xf32>
    %2 = vector.extract_strided_slice %1 {offsets = [0, 0], sizes = [16, 1], strides = [1, 1]} : vector<16x32xf32> to vector<16x1xf32>
    %3 = vector.extract_strided_slice %1 {offsets = [0, 1], sizes = [16, 1], strides = [1, 1]} : vector<16x32xf32> to vector<16x1xf32>
    %4 = vector.extract_strided_slice %1 {offsets = [0, 2], sizes = [16, 1], strides = [1, 1]} : vector<16x32xf32> to vector<16x1xf32>
    %c16 = arith.constant 16 : index
    %c0_2 = arith.constant 0 : index
    %5 = vector.load %arg2[%c16, %c0_2] : memref<24x32xf32, #tpu.memory_space<vmem>>, vector<8x32xf32>
    %6 = vector.extract_strided_slice %5 {offsets = [0, 0], sizes = [8, 8], strides = [1, 1]} : vector<8x32xf32> to vector<8x8xf32>
    %c0_3 = arith.constant 0 : index
    %c0_4 = arith.constant 0 : index
    %7 = vector.load %arg0[%c0_3, %c0_4] : memref<16x32xf32, #tpu.memory_space<vmem>>, vector<16x32xf32>
    %c40 = arith.constant 40 : index
    %c0_5 = arith.constant 0 : index
    %8 = vector.load %arg4[%c40, %c0_5] : memref<80x128xf32, #tpu.memory_space<vmem>>, vector<32x128xf32>
    %c72 = arith.constant 72 : index
    %c0_6 = arith.constant 0 : index
    %9 = vector.load %arg4[%c72, %c0_6] : memref<80x128xf32, #tpu.memory_space<vmem>>, vector<1x128xf32>
    %10 = vector.extract_strided_slice %0 {offsets = [0, 0], sizes = [1, 32], strides = [1, 1]} : vector<24x32xf32> to vector<1x32xf32>
    %11 = vector.extract_strided_slice %0 {offsets = [1, 0], sizes = [1, 32], strides = [1, 1]} : vector<24x32xf32> to vector<1x32xf32>
    %cst = arith.constant dense<0.000000e+00> : vector<16xf32>
    %12 = vector.multi_reduction <add>, %7, %cst [1] : vector<16x32xf32> to vector<16xf32>
    %13 = vector.shape_cast %12 : vector<16xf32> to vector<16x1xf32>
    %cst_7 = arith.constant 3.200000e+01 : f32
    %14 = vector.broadcast %cst_7 : f32 to vector<16x1xf32>
    %15 = arith.divf %13, %14 : vector<16x1xf32>
    %16 = vector.broadcast %15 : vector<16x1xf32> to vector<16x32xf32>
    %17 = arith.subf %7, %16 : vector<16x32xf32>
    %18 = arith.mulf %17, %17 : vector<16x32xf32>
    %cst_8 = arith.constant dense<0.000000e+00> : vector<16xf32>
    %19 = vector.multi_reduction <add>, %18, %cst_8 [1] : vector<16x32xf32> to vector<16xf32>
    %20 = vector.shape_cast %19 : vector<16xf32> to vector<16x1xf32>
    %cst_9 = arith.constant 3.200000e+01 : f32
    %21 = vector.broadcast %cst_9 : f32 to vector<16x1xf32>
    %22 = arith.divf %20, %21 : vector<16x1xf32>
    %23 = vector.broadcast %15 : vector<16x1xf32> to vector<16x32xf32>
    %24 = arith.subf %7, %23 : vector<16x32xf32>
    %cst_10 = arith.constant 9.99999974E-6 : f32
    %25 = vector.broadcast %cst_10 : f32 to vector<16x1xf32>
    %26 = arith.addf %22, %25 : vector<16x1xf32>
    %27 = math.rsqrt %26 : vector<16x1xf32>
    %28 = vector.broadcast %27 : vector<16x1xf32> to vector<16x32xf32>
    %29 = arith.mulf %24, %28 : vector<16x32xf32>
    %30 = vector.broadcast %10 : vector<1x32xf32> to vector<16x32xf32>
    %31 = arith.mulf %29, %30 : vector<16x32xf32>
    %32 = vector.broadcast %11 : vector<1x32xf32> to vector<16x32xf32>
    %33 = arith.addf %31, %32 : vector<16x32xf32>
    %34 = vector.extract_strided_slice %8 {offsets = [0, 0], sizes = [32, 64], strides = [1, 1]} : vector<32x128xf32> to vector<32x64xf32>
    %cst_11 = arith.constant dense<0.000000e+00> : vector<16x64xf32>
    %35 = tpu.matmul %33, %34, %cst_11 {dimension_numbers = #tpu.dot_dimension_numbers<[1], [0], [0], [1], [0, 0, 1, 1], [], []>} : vector<16x32xf32>, vector<32x64xf32>, vector<16x64xf32> -> vector<16x64xf32>
    %36 = vector.extract_strided_slice %9 {offsets = [0, 0], sizes = [1, 64], strides = [1, 1]} : vector<1x128xf32> to vector<1x64xf32>
    %37 = vector.broadcast %36 : vector<1x64xf32> to vector<16x64xf32>
    %38 = arith.addf %35, %37 : vector<16x64xf32>
    %39 = arith.negf %38 : vector<16x64xf32>
    %40 = math.exp %39 : vector<16x64xf32>
    %cst_12 = arith.constant 1.000000e+00 : f32
    %41 = vector.broadcast %cst_12 : f32 to vector<16x64xf32>
    %42 = arith.addf %41, %40 : vector<16x64xf32>
    %43 = arith.divf %41, %42 : vector<16x64xf32>
    %44 = arith.mulf %38, %43 : vector<16x64xf32>
    %c0_13 = arith.constant 0 : index
    %c0_14 = arith.constant 0 : index
    %45 = vector.load %arg3[%c0_13, %c0_14] : memref<400x32xf32, #tpu.memory_space<vmem>>, vector<64x32xf32>
    %cst_15 = arith.constant dense<0.000000e+00> : vector<16x32xf32>
    %46 = tpu.matmul %44, %45, %cst_15 {dimension_numbers = #tpu.dot_dimension_numbers<[1], [0], [0], [1], [0, 0, 1, 1], [], []>} : vector<16x64xf32>, vector<64x32xf32>, vector<16x32xf32> -> vector<16x32xf32>
    %47 = vector.extract_strided_slice %0 {offsets = [10, 0], sizes = [1, 32], strides = [1, 1]} : vector<24x32xf32> to vector<1x32xf32>
    %48 = vector.broadcast %47 : vector<1x32xf32> to vector<16x32xf32>
    %49 = arith.addf %46, %48 : vector<16x32xf32>
    %cst_16 = arith.constant 5.000000e-01 : f32
    %50 = vector.broadcast %cst_16 : f32 to vector<16x32xf32>
    %51 = arith.mulf %50, %49 : vector<16x32xf32>
    %52 = arith.addf %7, %51 : vector<16x32xf32>
    %53 = vector.extract_strided_slice %0 {offsets = [2, 0], sizes = [1, 32], strides = [1, 1]} : vector<24x32xf32> to vector<1x32xf32>
    %54 = vector.extract_strided_slice %0 {offsets = [3, 0], sizes = [1, 32], strides = [1, 1]} : vector<24x32xf32> to vector<1x32xf32>
    %cst_17 = arith.constant dense<0.000000e+00> : vector<16xf32>
    %55 = vector.multi_reduction <add>, %52, %cst_17 [1] : vector<16x32xf32> to vector<16xf32>
    %56 = vector.shape_cast %55 : vector<16xf32> to vector<16x1xf32>
    %cst_18 = arith.constant 3.200000e+01 : f32
    %57 = vector.broadcast %cst_18 : f32 to vector<16x1xf32>
    %58 = arith.divf %56, %57 : vector<16x1xf32>
    %59 = vector.broadcast %58 : vector<16x1xf32> to vector<16x32xf32>
    %60 = arith.subf %52, %59 : vector<16x32xf32>
    %61 = arith.mulf %60, %60 : vector<16x32xf32>
    %cst_19 = arith.constant dense<0.000000e+00> : vector<16xf32>
    %62 = vector.multi_reduction <add>, %61, %cst_19 [1] : vector<16x32xf32> to vector<16xf32>
    %63 = vector.shape_cast %62 : vector<16xf32> to vector<16x1xf32>
    %cst_20 = arith.constant 3.200000e+01 : f32
    %64 = vector.broadcast %cst_20 : f32 to vector<16x1xf32>
    %65 = arith.divf %63, %64 : vector<16x1xf32>
    %66 = vector.broadcast %58 : vector<16x1xf32> to vector<16x32xf32>
    %67 = arith.subf %52, %66 : vector<16x32xf32>
    %cst_21 = arith.constant 9.99999974E-6 : f32
    %68 = vector.broadcast %cst_21 : f32 to vector<16x1xf32>
    %69 = arith.addf %65, %68 : vector<16x1xf32>
    %70 = math.rsqrt %69 : vector<16x1xf32>
    %71 = vector.broadcast %70 : vector<16x1xf32> to vector<16x32xf32>
    %72 = arith.mulf %67, %71 : vector<16x32xf32>
    %73 = vector.broadcast %53 : vector<1x32xf32> to vector<16x32xf32>
    %74 = arith.mulf %72, %73 : vector<16x32xf32>
    %75 = vector.broadcast %54 : vector<1x32xf32> to vector<16x32xf32>
    %76 = arith.addf %74, %75 : vector<16x32xf32>
    %c0_22 = arith.constant 0 : index
    %c0_23 = arith.constant 0 : index
    %77 = vector.load %arg4[%c0_22, %c0_23] : memref<80x128xf32, #tpu.memory_space<vmem>>, vector<32x128xf32>
    %c32 = arith.constant 32 : index
    %c0_24 = arith.constant 0 : index
    %78 = vector.load %arg4[%c32, %c0_24] : memref<80x128xf32, #tpu.memory_space<vmem>>, vector<1x128xf32>
    %cst_25 = arith.constant dense<0.000000e+00> : vector<16x128xf32>
    %79 = tpu.matmul %76, %77, %cst_25 {dimension_numbers = #tpu.dot_dimension_numbers<[1], [0], [0], [1], [0, 0, 1, 1], [], []>} : vector<16x32xf32>, vector<32x128xf32>, vector<16x128xf32> -> vector<16x128xf32>
    %80 = vector.broadcast %78 : vector<1x128xf32> to vector<16x128xf32>
    %81 = arith.addf %79, %80 : vector<16x128xf32>
    %c0_26 = arith.constant 0 : index
    %c0_27 = arith.constant 0 : index
    %82 = vector.load %arg1[%c0_26, %c0_27] : memref<32x32xf32, #tpu.memory_space<vmem>>, vector<32x32xf32>
    %c288 = arith.constant 288 : index
    %c0_28 = arith.constant 0 : index
    %83 = vector.load %arg3[%c288, %c0_28] : memref<400x32xf32, #tpu.memory_space<vmem>>, vector<32x32xf32>
    %cst_29 = arith.constant dense<0.000000e+00> : vector<32x32xf32>
    %84 = tpu.matmul %82, %83, %cst_29 {dimension_numbers = #tpu.dot_dimension_numbers<[1], [0], [0], [1], [0, 0, 1, 1], [], []>} : vector<32x32xf32>, vector<32x32xf32>, vector<32x32xf32> -> vector<32x32xf32>
    %85 = vector.extract_strided_slice %81 {offsets = [0, 0], sizes = [16, 8], strides = [1, 1]} : vector<16x128xf32> to vector<16x8xf32>
    %86 = vector.shape_cast %85 : vector<16x8xf32> to vector<2x8x8xf32>
    %87 = vector.extract_strided_slice %81 {offsets = [0, 8], sizes = [16, 8], strides = [1, 1]} : vector<16x128xf32> to vector<16x8xf32>
    %88 = vector.shape_cast %87 : vector<16x8xf32> to vector<2x8x8xf32>
    %89 = vector.extract_strided_slice %81 {offsets = [0, 16], sizes = [16, 8], strides = [1, 1]} : vector<16x128xf32> to vector<16x8xf32>
    %90 = vector.shape_cast %89 : vector<16x8xf32> to vector<2x8x8xf32>
    %91 = vector.extract_strided_slice %81 {offsets = [0, 24], sizes = [16, 8], strides = [1, 1]} : vector<16x128xf32> to vector<16x8xf32>
    %92 = vector.shape_cast %91 : vector<16x8xf32> to vector<2x8x8xf32>
    %93 = tpu.concatenate %86, %88, %90, %92 in 0 : vector<2x8x8xf32>, vector<2x8x8xf32>, vector<2x8x8xf32>, vector<2x8x8xf32> -> vector<8x8x8xf32>
    %94 = vector.extract_strided_slice %81 {offsets = [0, 32], sizes = [16, 8], strides = [1, 1]} : vector<16x128xf32> to vector<16x8xf32>
    %95 = vector.shape_cast %94 : vector<16x8xf32> to vector<2x8x8xf32>
    %96 = vector.extract_strided_slice %81 {offsets = [0, 40], sizes = [16, 8], strides = [1, 1]} : vector<16x128xf32> to vector<16x8xf32>
    %97 = vector.shape_cast %96 : vector<16x8xf32> to vector<2x8x8xf32>
    %98 = vector.extract_strided_slice %81 {offsets = [0, 48], sizes = [16, 8], strides = [1, 1]} : vector<16x128xf32> to vector<16x8xf32>
    %99 = vector.shape_cast %98 : vector<16x8xf32> to vector<2x8x8xf32>
    %100 = vector.extract_strided_slice %81 {offsets = [0, 56], sizes = [16, 8], strides = [1, 1]} : vector<16x128xf32> to vector<16x8xf32>
    %101 = vector.shape_cast %100 : vector<16x8xf32> to vector<2x8x8xf32>
    %102 = tpu.concatenate %95, %97, %99, %101 in 0 : vector<2x8x8xf32>, vector<2x8x8xf32>, vector<2x8x8xf32>, vector<2x8x8xf32> -> vector<8x8x8xf32>
    %103 = vector.extract_strided_slice %81 {offsets = [0, 64], sizes = [16, 8], strides = [1, 1]} : vector<16x128xf32> to vector<16x8xf32>
    %104 = vector.shape_cast %103 : vector<16x8xf32> to vector<2x8x8xf32>
    %105 = vector.extract_strided_slice %81 {offsets = [0, 72], sizes = [16, 8], strides = [1, 1]} : vector<16x128xf32> to vector<16x8xf32>
    %106 = vector.shape_cast %105 : vector<16x8xf32> to vector<2x8x8xf32>
    %107 = vector.extract_strided_slice %81 {offsets = [0, 80], sizes = [16, 8], strides = [1, 1]} : vector<16x128xf32> to vector<16x8xf32>
    %108 = vector.shape_cast %107 : vector<16x8xf32> to vector<2x8x8xf32>
    %109 = vector.extract_strided_slice %81 {offsets = [0, 88], sizes = [16, 8], strides = [1, 1]} : vector<16x128xf32> to vector<16x8xf32>
    %110 = vector.shape_cast %109 : vector<16x8xf32> to vector<2x8x8xf32>
    %111 = tpu.concatenate %104, %106, %108, %110 in 0 : vector<2x8x8xf32>, vector<2x8x8xf32>, vector<2x8x8xf32>, vector<2x8x8xf32> -> vector<8x8x8xf32>
    %112 = vector.extract_strided_slice %81 {offsets = [0, 96], sizes = [16, 8], strides = [1, 1]} : vector<16x128xf32> to vector<16x8xf32>
    %113 = vector.shape_cast %112 : vector<16x8xf32> to vector<2x8x8xf32>
    %114 = vector.extract_strided_slice %81 {offsets = [0, 104], sizes = [16, 8], strides = [1, 1]} : vector<16x128xf32> to vector<16x8xf32>
    %115 = vector.shape_cast %114 : vector<16x8xf32> to vector<2x8x8xf32>
    %116 = vector.extract_strided_slice %81 {offsets = [0, 112], sizes = [16, 8], strides = [1, 1]} : vector<16x128xf32> to vector<16x8xf32>
    %117 = vector.shape_cast %116 : vector<16x8xf32> to vector<2x8x8xf32>
    %118 = vector.extract_strided_slice %81 {offsets = [0, 120], sizes = [16, 8], strides = [1, 1]} : vector<16x128xf32> to vector<16x8xf32>
    %119 = vector.shape_cast %118 : vector<16x8xf32> to vector<2x8x8xf32>
    %120 = tpu.concatenate %113, %115, %117, %119 in 0 : vector<2x8x8xf32>, vector<2x8x8xf32>, vector<2x8x8xf32>, vector<2x8x8xf32> -> vector<8x8x8xf32>
    %121 = vector.extract_strided_slice %84 {offsets = [0, 0], sizes = [32, 8], strides = [1, 1]} : vector<32x32xf32> to vector<32x8xf32>
    %122 = vector.shape_cast %121 : vector<32x8xf32> to vector<2x16x8xf32>
    %123 = vector.extract_strided_slice %84 {offsets = [0, 8], sizes = [32, 8], strides = [1, 1]} : vector<32x32xf32> to vector<32x8xf32>
    %124 = vector.shape_cast %123 : vector<32x8xf32> to vector<2x16x8xf32>
    %125 = vector.extract_strided_slice %84 {offsets = [0, 16], sizes = [32, 8], strides = [1, 1]} : vector<32x32xf32> to vector<32x8xf32>
    %126 = vector.shape_cast %125 : vector<32x8xf32> to vector<2x16x8xf32>
    %127 = vector.extract_strided_slice %84 {offsets = [0, 24], sizes = [32, 8], strides = [1, 1]} : vector<32x32xf32> to vector<32x8xf32>
    %128 = vector.shape_cast %127 : vector<32x8xf32> to vector<2x16x8xf32>
    %129 = tpu.concatenate %122, %124, %126, %128 in 0 : vector<2x16x8xf32>, vector<2x16x8xf32>, vector<2x16x8xf32>, vector<2x16x8xf32> -> vector<8x16x8xf32>
    "tpu.trace_start"() <{level = 10 : i32, message = "xtd,xsd->xts"}> : () -> ()
    %cst_30 = arith.constant dense<0.000000e+00> : vector<8x8x8xf32>
    %130 = tpu.matmul %93, %102, %cst_30 {dimension_numbers = #tpu.dot_dimension_numbers<[2], [2], [1], [1], [0, 0, 0, 1, 1, 1], [0], [0]>} : vector<8x8x8xf32>, vector<8x8x8xf32>, vector<8x8x8xf32> -> vector<8x8x8xf32>
    "tpu.trace_stop"() : () -> ()
    "tpu.trace_start"() <{level = 10 : i32, message = "xtd,xrd->xtr"}> : () -> ()
    %cst_31 = arith.constant dense<0.000000e+00> : vector<8x8x16xf32>
    %131 = tpu.matmul %120, %129, %cst_31 {dimension_numbers = #tpu.dot_dimension_numbers<[2], [2], [1], [1], [0, 0, 0, 1, 1, 1], [0], [0]>} : vector<8x8x8xf32>, vector<8x16x8xf32>, vector<8x8x16xf32> -> vector<8x8x16xf32>
    "tpu.trace_stop"() : () -> ()
    %132 = vector.extract_strided_slice %131 {offsets = [0, 0, 7], sizes = [8, 1, 8], strides = [1, 1, 1]} : vector<8x8x16xf32> to vector<8x1x8xf32>
    %133 = vector.extract_strided_slice %131 {offsets = [0, 1, 6], sizes = [8, 1, 8], strides = [1, 1, 1]} : vector<8x8x16xf32> to vector<8x1x8xf32>
    %134 = vector.extract_strided_slice %131 {offsets = [0, 2, 5], sizes = [8, 1, 8], strides = [1, 1, 1]} : vector<8x8x16xf32> to vector<8x1x8xf32>
    %135 = vector.extract_strided_slice %131 {offsets = [0, 3, 4], sizes = [8, 1, 8], strides = [1, 1, 1]} : vector<8x8x16xf32> to vector<8x1x8xf32>
    %136 = vector.extract_strided_slice %131 {offsets = [0, 4, 3], sizes = [8, 1, 8], strides = [1, 1, 1]} : vector<8x8x16xf32> to vector<8x1x8xf32>
    %137 = vector.extract_strided_slice %131 {offsets = [0, 5, 2], sizes = [8, 1, 8], strides = [1, 1, 1]} : vector<8x8x16xf32> to vector<8x1x8xf32>
    %138 = vector.extract_strided_slice %131 {offsets = [0, 6, 1], sizes = [8, 1, 8], strides = [1, 1, 1]} : vector<8x8x16xf32> to vector<8x1x8xf32>
    %139 = vector.extract_strided_slice %131 {offsets = [0, 7, 0], sizes = [8, 1, 8], strides = [1, 1, 1]} : vector<8x8x16xf32> to vector<8x1x8xf32>
    %140 = tpu.concatenate %132, %133, %134, %135, %136, %137, %138, %139 in 1 : vector<8x1x8xf32>, vector<8x1x8xf32>, vector<8x1x8xf32>, vector<8x1x8xf32>, vector<8x1x8xf32>, vector<8x1x8xf32>, vector<8x1x8xf32>, vector<8x1x8xf32> -> vector<8x8x8xf32>
    %141 = arith.addf %130, %140 : vector<8x8x8xf32>
    %cst_32 = arith.constant 0.353553385 : f32
    %142 = vector.broadcast %cst_32 : f32 to vector<8x8x8xf32>
    %143 = arith.mulf %141, %142 : vector<8x8x8xf32>
    %144 = vector.shape_cast %6 : vector<8x8xf32> to vector<8x1x8xf32>
    %145 = vector.broadcast %144 : vector<8x1x8xf32> to vector<8x8x8xf32>
    %146 = arith.addf %143, %145 : vector<8x8x8xf32>
    %cst_33 = arith.constant dense<0xFF800000> : vector<8x8xf32>
    %147 = vector.multi_reduction <maximumf>, %146, %cst_33 [2] : vector<8x8x8xf32> to vector<8x8xf32>
    %148 = vector.shape_cast %147 : vector<8x8xf32> to vector<8x8x1xf32>
    %149 = vector.broadcast %148 : vector<8x8x1xf32> to vector<8x8x8xf32>
    %150 = arith.subf %146, %149 : vector<8x8x8xf32>
    %151 = math.exp %150 : vector<8x8x8xf32>
    %cst_34 = arith.constant dense<0.000000e+00> : vector<8x8xf32>
    %152 = vector.multi_reduction <add>, %151, %cst_34 [2] : vector<8x8x8xf32> to vector<8x8xf32>
    %153 = vector.shape_cast %152 : vector<8x8xf32> to vector<8x8x1xf32>
    %154 = tpu.reciprocal %153 {approx = true} : vector<8x8x1xf32> -> vector<8x8x1xf32>
    %155 = vector.broadcast %154 : vector<8x8x1xf32> to vector<8x8x8xf32>
    %156 = arith.mulf %151, %155 : vector<8x8x8xf32>
    "tpu.trace_start"() <{level = 10 : i32, message = "xts,xsd->xtd"}> : () -> ()
    %cst_35 = arith.constant dense<0.000000e+00> : vector<8x8x8xf32>
    %157 = tpu.matmul %156, %111, %cst_35 {dimension_numbers = #tpu.dot_dimension_numbers<[2], [1], [1], [2], [0, 0, 0, 1, 1, 2], [0], [0]>} : vector<8x8x8xf32>, vector<8x8x8xf32>, vector<8x8x8xf32> -> vector<8x8x8xf32>
    "tpu.trace_stop"() : () -> ()
    %c320 = arith.constant 320 : index
    %c0_36 = arith.constant 0 : index
    %158 = vector.load %arg3[%c320, %c0_36] : memref<400x32xf32, #tpu.memory_space<vmem>>, vector<32x32xf32>
    %159 = vector.extract_strided_slice %157 {offsets = [0, 0, 0], sizes = [2, 8, 8], strides = [1, 1, 1]} : vector<8x8x8xf32> to vector<2x8x8xf32>
    %160 = vector.shape_cast %159 : vector<2x8x8xf32> to vector<16x8xf32>
    %161 = vector.extract_strided_slice %157 {offsets = [2, 0, 0], sizes = [2, 8, 8], strides = [1, 1, 1]} : vector<8x8x8xf32> to vector<2x8x8xf32>
    %162 = vector.shape_cast %161 : vector<2x8x8xf32> to vector<16x8xf32>
    %163 = vector.extract_strided_slice %157 {offsets = [4, 0, 0], sizes = [2, 8, 8], strides = [1, 1, 1]} : vector<8x8x8xf32> to vector<2x8x8xf32>
    %164 = vector.shape_cast %163 : vector<2x8x8xf32> to vector<16x8xf32>
    %165 = vector.extract_strided_slice %157 {offsets = [6, 0, 0], sizes = [2, 8, 8], strides = [1, 1, 1]} : vector<8x8x8xf32> to vector<2x8x8xf32>
    %166 = vector.shape_cast %165 : vector<2x8x8xf32> to vector<16x8xf32>
    %167 = tpu.concatenate %160, %162, %164, %166 in 1 : vector<16x8xf32>, vector<16x8xf32>, vector<16x8xf32>, vector<16x8xf32> -> vector<16x32xf32>
    %cst_37 = arith.constant dense<0.000000e+00> : vector<16x32xf32>
    %168 = tpu.matmul %167, %158, %cst_37 {dimension_numbers = #tpu.dot_dimension_numbers<[1], [0], [0], [1], [0, 0, 1, 1], [], []>} : vector<16x32xf32>, vector<32x32xf32>, vector<16x32xf32> -> vector<16x32xf32>
    %169 = vector.extract_strided_slice %0 {offsets = [12, 0], sizes = [1, 32], strides = [1, 1]} : vector<24x32xf32> to vector<1x32xf32>
    %170 = vector.broadcast %169 : vector<1x32xf32> to vector<16x32xf32>
    %171 = arith.addf %168, %170 : vector<16x32xf32>
    %172 = vector.extract_strided_slice %0 {offsets = [4, 0], sizes = [1, 32], strides = [1, 1]} : vector<24x32xf32> to vector<1x32xf32>
    %173 = vector.extract_strided_slice %0 {offsets = [5, 0], sizes = [1, 32], strides = [1, 1]} : vector<24x32xf32> to vector<1x32xf32>
    %cst_38 = arith.constant dense<0.000000e+00> : vector<16xf32>
    %174 = vector.multi_reduction <add>, %52, %cst_38 [1] : vector<16x32xf32> to vector<16xf32>
    %175 = vector.shape_cast %174 : vector<16xf32> to vector<16x1xf32>
    %cst_39 = arith.constant 3.200000e+01 : f32
    %176 = vector.broadcast %cst_39 : f32 to vector<16x1xf32>
    %177 = arith.divf %175, %176 : vector<16x1xf32>
    %178 = vector.broadcast %177 : vector<16x1xf32> to vector<16x32xf32>
    %179 = arith.subf %52, %178 : vector<16x32xf32>
    %180 = arith.mulf %179, %179 : vector<16x32xf32>
    %cst_40 = arith.constant dense<0.000000e+00> : vector<16xf32>
    %181 = vector.multi_reduction <add>, %180, %cst_40 [1] : vector<16x32xf32> to vector<16xf32>
    %182 = vector.shape_cast %181 : vector<16xf32> to vector<16x1xf32>
    %cst_41 = arith.constant 3.200000e+01 : f32
    %183 = vector.broadcast %cst_41 : f32 to vector<16x1xf32>
    %184 = arith.divf %182, %183 : vector<16x1xf32>
    %185 = vector.broadcast %177 : vector<16x1xf32> to vector<16x32xf32>
    %186 = arith.subf %52, %185 : vector<16x32xf32>
    %cst_42 = arith.constant 9.99999974E-6 : f32
    %187 = vector.broadcast %cst_42 : f32 to vector<16x1xf32>
    %188 = arith.addf %184, %187 : vector<16x1xf32>
    %189 = math.rsqrt %188 : vector<16x1xf32>
    %190 = vector.broadcast %189 : vector<16x1xf32> to vector<16x32xf32>
    %191 = arith.mulf %186, %190 : vector<16x32xf32>
    %192 = vector.broadcast %172 : vector<1x32xf32> to vector<16x32xf32>
    %193 = arith.mulf %191, %192 : vector<16x32xf32>
    %194 = vector.broadcast %173 : vector<1x32xf32> to vector<16x32xf32>
    %195 = arith.addf %193, %194 : vector<16x32xf32>
    %c128 = arith.constant 128 : index
    %c0_43 = arith.constant 0 : index
    %196 = vector.load %arg3[%c128, %c0_43] : memref<400x32xf32, #tpu.memory_space<vmem>>, vector<32x32xf32>
    %cst_44 = arith.constant dense<0.000000e+00> : vector<16x32xf32>
    %197 = tpu.matmul %195, %196, %cst_44 {dimension_numbers = #tpu.dot_dimension_numbers<[1], [0], [0], [1], [0, 0, 1, 1], [], []>} : vector<16x32xf32>, vector<32x32xf32>, vector<16x32xf32> -> vector<16x32xf32>
    %198 = vector.extract_strided_slice %0 {offsets = [13, 0], sizes = [1, 32], strides = [1, 1]} : vector<24x32xf32> to vector<1x32xf32>
    %199 = vector.broadcast %198 : vector<1x32xf32> to vector<16x32xf32>
    %200 = arith.addf %197, %199 : vector<16x32xf32>
    %cst_45 = arith.constant 5.000000e-01 : f32
    %201 = vector.broadcast %cst_45 : f32 to vector<16x32xf32>
    %202 = arith.mulf %201, %200 : vector<16x32xf32>
    %cst_46 = arith.constant 4.471500e-02 : f32
    %203 = vector.broadcast %cst_46 : f32 to vector<16x32xf32>
    %204 = arith.mulf %203, %200 : vector<16x32xf32>
    %205 = arith.mulf %204, %200 : vector<16x32xf32>
    %206 = arith.mulf %205, %200 : vector<16x32xf32>
    %207 = arith.addf %200, %206 : vector<16x32xf32>
    %cst_47 = arith.constant 0.797884583 : f32
    %208 = vector.broadcast %cst_47 : f32 to vector<16x32xf32>
    %209 = arith.mulf %208, %207 : vector<16x32xf32>
    %210 = math.tanh %209 : vector<16x32xf32>
    %cst_48 = arith.constant 1.000000e+00 : f32
    %211 = vector.broadcast %cst_48 : f32 to vector<16x32xf32>
    %212 = arith.addf %211, %210 : vector<16x32xf32>
    %213 = arith.mulf %202, %212 : vector<16x32xf32>
    %c160 = arith.constant 160 : index
    %c0_49 = arith.constant 0 : index
    %214 = vector.load %arg3[%c160, %c0_49] : memref<400x32xf32, #tpu.memory_space<vmem>>, vector<32x32xf32>
    %cst_50 = arith.constant dense<0.000000e+00> : vector<16x32xf32>
    %215 = tpu.matmul %195, %214, %cst_50 {dimension_numbers = #tpu.dot_dimension_numbers<[1], [0], [0], [1], [0, 0, 1, 1], [], []>} : vector<16x32xf32>, vector<32x32xf32>, vector<16x32xf32> -> vector<16x32xf32>
    %216 = vector.extract_strided_slice %0 {offsets = [14, 0], sizes = [1, 32], strides = [1, 1]} : vector<24x32xf32> to vector<1x32xf32>
    %217 = vector.broadcast %216 : vector<1x32xf32> to vector<16x32xf32>
    %218 = arith.addf %215, %217 : vector<16x32xf32>
    %cst_51 = arith.constant 5.000000e-01 : f32
    %219 = vector.broadcast %cst_51 : f32 to vector<16x32xf32>
    %220 = arith.mulf %219, %218 : vector<16x32xf32>
    %cst_52 = arith.constant 4.471500e-02 : f32
    %221 = vector.broadcast %cst_52 : f32 to vector<16x32xf32>
    %222 = arith.mulf %221, %218 : vector<16x32xf32>
    %223 = arith.mulf %222, %218 : vector<16x32xf32>
    %224 = arith.mulf %223, %218 : vector<16x32xf32>
    %225 = arith.addf %218, %224 : vector<16x32xf32>
    %cst_53 = arith.constant 0.797884583 : f32
    %226 = vector.broadcast %cst_53 : f32 to vector<16x32xf32>
    %227 = arith.mulf %226, %225 : vector<16x32xf32>
    %228 = math.tanh %227 : vector<16x32xf32>
    %cst_54 = arith.constant 1.000000e+00 : f32
    %229 = vector.broadcast %cst_54 : f32 to vector<16x32xf32>
    %230 = arith.addf %229, %228 : vector<16x32xf32>
    %231 = arith.mulf %220, %230 : vector<16x32xf32>
    %232 = vector.extract_strided_slice %0 {offsets = [15, 0], sizes = [1, 32], strides = [1, 1]} : vector<24x32xf32> to vector<1x32xf32>
    %233 = vector.extract_strided_slice %0 {offsets = [16, 0], sizes = [1, 32], strides = [1, 1]} : vector<24x32xf32> to vector<1x32xf32>
    %cst_55 = arith.constant dense<0.000000e+00> : vector<16xf32>
    %234 = vector.multi_reduction <add>, %231, %cst_55 [1] : vector<16x32xf32> to vector<16xf32>
    %235 = vector.shape_cast %234 : vector<16xf32> to vector<16x1xf32>
    %cst_56 = arith.constant 3.200000e+01 : f32
    %236 = vector.broadcast %cst_56 : f32 to vector<16x1xf32>
    %237 = arith.divf %235, %236 : vector<16x1xf32>
    %238 = vector.broadcast %237 : vector<16x1xf32> to vector<16x32xf32>
    %239 = arith.subf %231, %238 : vector<16x32xf32>
    %240 = arith.mulf %239, %239 : vector<16x32xf32>
    %cst_57 = arith.constant dense<0.000000e+00> : vector<16xf32>
    %241 = vector.multi_reduction <add>, %240, %cst_57 [1] : vector<16x32xf32> to vector<16xf32>
    %242 = vector.shape_cast %241 : vector<16xf32> to vector<16x1xf32>
    %cst_58 = arith.constant 3.200000e+01 : f32
    %243 = vector.broadcast %cst_58 : f32 to vector<16x1xf32>
    %244 = arith.divf %242, %243 : vector<16x1xf32>
    %245 = vector.broadcast %237 : vector<16x1xf32> to vector<16x32xf32>
    %246 = arith.subf %231, %245 : vector<16x32xf32>
    %cst_59 = arith.constant 9.99999974E-6 : f32
    %247 = vector.broadcast %cst_59 : f32 to vector<16x1xf32>
    %248 = arith.addf %244, %247 : vector<16x1xf32>
    %249 = math.rsqrt %248 : vector<16x1xf32>
    %250 = vector.broadcast %249 : vector<16x1xf32> to vector<16x32xf32>
    %251 = arith.mulf %246, %250 : vector<16x32xf32>
    %252 = vector.broadcast %232 : vector<1x32xf32> to vector<16x32xf32>
    %253 = arith.mulf %251, %252 : vector<16x32xf32>
    %254 = vector.broadcast %233 : vector<1x32xf32> to vector<16x32xf32>
    %255 = arith.addf %253, %254 : vector<16x32xf32>
    %256 = vector.broadcast %2 : vector<16x1xf32> to vector<16x32xf32>
    %257 = arith.mulf %255, %256 : vector<16x32xf32>
    %c352 = arith.constant 352 : index
    %c0_60 = arith.constant 0 : index
    %258 = vector.load %arg3[%c352, %c0_60] : memref<400x32xf32, #tpu.memory_space<vmem>>, vector<3x32xf32>
    %259 = vector.extract_strided_slice %0 {offsets = [17, 0], sizes = [1, 32], strides = [1, 1]} : vector<24x32xf32> to vector<1x32xf32>
    %c1_i32 = arith.constant 1 : i32
    %260 = tpu.dynamic_rotate %257 by %c1_i32 dim 0 : vector<16x32xf32>, i32 -> vector<16x32xf32>
    %261 = vector.broadcast %3 : vector<16x1xf32> to vector<16x32xf32>
    %262 = arith.mulf %260, %261 : vector<16x32xf32>
    %263 = vector.extract_strided_slice %258 {offsets = [0, 0], sizes = [1, 32], strides = [1, 1]} : vector<3x32xf32> to vector<1x32xf32>
    %264 = vector.broadcast %263 : vector<1x32xf32> to vector<16x32xf32>
    %265 = arith.mulf %262, %264 : vector<16x32xf32>
    %266 = vector.extract_strided_slice %258 {offsets = [1, 0], sizes = [1, 32], strides = [1, 1]} : vector<3x32xf32> to vector<1x32xf32>
    %267 = vector.broadcast %266 : vector<1x32xf32> to vector<16x32xf32>
    %268 = arith.mulf %257, %267 : vector<16x32xf32>
    %269 = arith.addf %265, %268 : vector<16x32xf32>
    %c15_i32 = arith.constant 15 : i32
    %270 = tpu.dynamic_rotate %257 by %c15_i32 dim 0 : vector<16x32xf32>, i32 -> vector<16x32xf32>
    %271 = vector.broadcast %4 : vector<16x1xf32> to vector<16x32xf32>
    %272 = arith.mulf %270, %271 : vector<16x32xf32>
    %273 = vector.extract_strided_slice %258 {offsets = [2, 0], sizes = [1, 32], strides = [1, 1]} : vector<3x32xf32> to vector<1x32xf32>
    %274 = vector.broadcast %273 : vector<1x32xf32> to vector<16x32xf32>
    %275 = arith.mulf %272, %274 : vector<16x32xf32>
    %276 = arith.addf %269, %275 : vector<16x32xf32>
    %277 = vector.broadcast %259 : vector<1x32xf32> to vector<16x32xf32>
    %278 = arith.addf %276, %277 : vector<16x32xf32>
    %279 = arith.mulf %213, %278 : vector<16x32xf32>
    %c192 = arith.constant 192 : index
    %c0_61 = arith.constant 0 : index
    %280 = vector.load %arg3[%c192, %c0_61] : memref<400x32xf32, #tpu.memory_space<vmem>>, vector<32x32xf32>
    %cst_62 = arith.constant dense<0.000000e+00> : vector<16x32xf32>
    %281 = tpu.matmul %279, %280, %cst_62 {dimension_numbers = #tpu.dot_dimension_numbers<[1], [0], [0], [1], [0, 0, 1, 1], [], []>} : vector<16x32xf32>, vector<32x32xf32>, vector<16x32xf32> -> vector<16x32xf32>
    %282 = vector.extract_strided_slice %0 {offsets = [18, 0], sizes = [1, 32], strides = [1, 1]} : vector<24x32xf32> to vector<1x32xf32>
    %283 = vector.broadcast %282 : vector<1x32xf32> to vector<16x32xf32>
    %284 = arith.addf %281, %283 : vector<16x32xf32>
    %285 = vector.broadcast %2 : vector<16x1xf32> to vector<16x32xf32>
    %286 = arith.mulf %171, %285 : vector<16x32xf32>
    %287 = vector.broadcast %2 : vector<16x1xf32> to vector<16x32xf32>
    %288 = arith.mulf %284, %287 : vector<16x32xf32>
    %c360 = arith.constant 360 : index
    %c0_63 = arith.constant 0 : index
    %289 = vector.load %arg3[%c360, %c0_63] : memref<400x32xf32, #tpu.memory_space<vmem>>, vector<3x32xf32>
    %290 = vector.extract_strided_slice %0 {offsets = [19, 0], sizes = [1, 32], strides = [1, 1]} : vector<24x32xf32> to vector<1x32xf32>
    %c1_i32_64 = arith.constant 1 : i32
    %291 = tpu.dynamic_rotate %286 by %c1_i32_64 dim 0 : vector<16x32xf32>, i32 -> vector<16x32xf32>
    %292 = vector.broadcast %3 : vector<16x1xf32> to vector<16x32xf32>
    %293 = arith.mulf %291, %292 : vector<16x32xf32>
    %294 = vector.extract_strided_slice %289 {offsets = [0, 0], sizes = [1, 32], strides = [1, 1]} : vector<3x32xf32> to vector<1x32xf32>
    %295 = vector.broadcast %294 : vector<1x32xf32> to vector<16x32xf32>
    %296 = arith.mulf %293, %295 : vector<16x32xf32>
    %297 = vector.extract_strided_slice %289 {offsets = [1, 0], sizes = [1, 32], strides = [1, 1]} : vector<3x32xf32> to vector<1x32xf32>
    %298 = vector.broadcast %297 : vector<1x32xf32> to vector<16x32xf32>
    %299 = arith.mulf %286, %298 : vector<16x32xf32>
    %300 = arith.addf %296, %299 : vector<16x32xf32>
    %c15_i32_65 = arith.constant 15 : i32
    %301 = tpu.dynamic_rotate %286 by %c15_i32_65 dim 0 : vector<16x32xf32>, i32 -> vector<16x32xf32>
    %302 = vector.broadcast %4 : vector<16x1xf32> to vector<16x32xf32>
    %303 = arith.mulf %301, %302 : vector<16x32xf32>
    %304 = vector.extract_strided_slice %289 {offsets = [2, 0], sizes = [1, 32], strides = [1, 1]} : vector<3x32xf32> to vector<1x32xf32>
    %305 = vector.broadcast %304 : vector<1x32xf32> to vector<16x32xf32>
    %306 = arith.mulf %303, %305 : vector<16x32xf32>
    %307 = arith.addf %300, %306 : vector<16x32xf32>
    %308 = vector.broadcast %290 : vector<1x32xf32> to vector<16x32xf32>
    %309 = arith.addf %307, %308 : vector<16x32xf32>
    %c368 = arith.constant 368 : index
    %c0_66 = arith.constant 0 : index
    %310 = vector.load %arg3[%c368, %c0_66] : memref<400x32xf32, #tpu.memory_space<vmem>>, vector<3x32xf32>
    %311 = vector.extract_strided_slice %0 {offsets = [20, 0], sizes = [1, 32], strides = [1, 1]} : vector<24x32xf32> to vector<1x32xf32>
    %c1_i32_67 = arith.constant 1 : i32
    %312 = tpu.dynamic_rotate %288 by %c1_i32_67 dim 0 : vector<16x32xf32>, i32 -> vector<16x32xf32>
    %313 = vector.broadcast %3 : vector<16x1xf32> to vector<16x32xf32>
    %314 = arith.mulf %312, %313 : vector<16x32xf32>
    %315 = vector.extract_strided_slice %310 {offsets = [0, 0], sizes = [1, 32], strides = [1, 1]} : vector<3x32xf32> to vector<1x32xf32>
    %316 = vector.broadcast %315 : vector<1x32xf32> to vector<16x32xf32>
    %317 = arith.mulf %314, %316 : vector<16x32xf32>
    %318 = vector.extract_strided_slice %310 {offsets = [1, 0], sizes = [1, 32], strides = [1, 1]} : vector<3x32xf32> to vector<1x32xf32>
    %319 = vector.broadcast %318 : vector<1x32xf32> to vector<16x32xf32>
    %320 = arith.mulf %288, %319 : vector<16x32xf32>
    %321 = arith.addf %317, %320 : vector<16x32xf32>
    %c15_i32_68 = arith.constant 15 : i32
    %322 = tpu.dynamic_rotate %288 by %c15_i32_68 dim 0 : vector<16x32xf32>, i32 -> vector<16x32xf32>
    %323 = vector.broadcast %4 : vector<16x1xf32> to vector<16x32xf32>
    %324 = arith.mulf %322, %323 : vector<16x32xf32>
    %325 = vector.extract_strided_slice %310 {offsets = [2, 0], sizes = [1, 32], strides = [1, 1]} : vector<3x32xf32> to vector<1x32xf32>
    %326 = vector.broadcast %325 : vector<1x32xf32> to vector<16x32xf32>
    %327 = arith.mulf %324, %326 : vector<16x32xf32>
    %328 = arith.addf %321, %327 : vector<16x32xf32>
    %329 = vector.broadcast %311 : vector<1x32xf32> to vector<16x32xf32>
    %330 = arith.addf %328, %329 : vector<16x32xf32>
    %331 = arith.addf %286, %309 : vector<16x32xf32>
    %c224 = arith.constant 224 : index
    %c0_69 = arith.constant 0 : index
    %332 = vector.load %arg3[%c224, %c0_69] : memref<400x32xf32, #tpu.memory_space<vmem>>, vector<32x32xf32>
    %cst_70 = arith.constant dense<0.000000e+00> : vector<16x32xf32>
    %333 = tpu.matmul %331, %332, %cst_70 {dimension_numbers = #tpu.dot_dimension_numbers<[1], [0], [0], [1], [0, 0, 1, 1], [], []>} : vector<16x32xf32>, vector<32x32xf32>, vector<16x32xf32> -> vector<16x32xf32>
    %334 = arith.addf %288, %330 : vector<16x32xf32>
    %c256 = arith.constant 256 : index
    %c0_71 = arith.constant 0 : index
    %335 = vector.load %arg3[%c256, %c0_71] : memref<400x32xf32, #tpu.memory_space<vmem>>, vector<32x32xf32>
    %cst_72 = arith.constant dense<0.000000e+00> : vector<16x32xf32>
    %336 = tpu.matmul %334, %335, %cst_72 {dimension_numbers = #tpu.dot_dimension_numbers<[1], [0], [0], [1], [0, 0, 1, 1], [], []>} : vector<16x32xf32>, vector<32x32xf32>, vector<16x32xf32> -> vector<16x32xf32>
    %337 = arith.addf %333, %336 : vector<16x32xf32>
    %338 = vector.extract_strided_slice %0 {offsets = [21, 0], sizes = [1, 32], strides = [1, 1]} : vector<24x32xf32> to vector<1x32xf32>
    %339 = vector.broadcast %338 : vector<1x32xf32> to vector<16x32xf32>
    %340 = arith.addf %337, %339 : vector<16x32xf32>
    %341 = arith.addf %52, %340 : vector<16x32xf32>
    %342 = vector.extract_strided_slice %0 {offsets = [6, 0], sizes = [1, 32], strides = [1, 1]} : vector<24x32xf32> to vector<1x32xf32>
    %343 = vector.extract_strided_slice %0 {offsets = [7, 0], sizes = [1, 32], strides = [1, 1]} : vector<24x32xf32> to vector<1x32xf32>
    %cst_73 = arith.constant dense<0.000000e+00> : vector<16xf32>
    %344 = vector.multi_reduction <add>, %341, %cst_73 [1] : vector<16x32xf32> to vector<16xf32>
    %345 = vector.shape_cast %344 : vector<16xf32> to vector<16x1xf32>
    %cst_74 = arith.constant 3.200000e+01 : f32
    %346 = vector.broadcast %cst_74 : f32 to vector<16x1xf32>
    %347 = arith.divf %345, %346 : vector<16x1xf32>
    %348 = vector.broadcast %347 : vector<16x1xf32> to vector<16x32xf32>
    %349 = arith.subf %341, %348 : vector<16x32xf32>
    %350 = arith.mulf %349, %349 : vector<16x32xf32>
    %cst_75 = arith.constant dense<0.000000e+00> : vector<16xf32>
    %351 = vector.multi_reduction <add>, %350, %cst_75 [1] : vector<16x32xf32> to vector<16xf32>
    %352 = vector.shape_cast %351 : vector<16xf32> to vector<16x1xf32>
    %cst_76 = arith.constant 3.200000e+01 : f32
    %353 = vector.broadcast %cst_76 : f32 to vector<16x1xf32>
    %354 = arith.divf %352, %353 : vector<16x1xf32>
    %355 = vector.broadcast %347 : vector<16x1xf32> to vector<16x32xf32>
    %356 = arith.subf %341, %355 : vector<16x32xf32>
    %cst_77 = arith.constant 9.99999974E-6 : f32
    %357 = vector.broadcast %cst_77 : f32 to vector<16x1xf32>
    %358 = arith.addf %354, %357 : vector<16x1xf32>
    %359 = math.rsqrt %358 : vector<16x1xf32>
    %360 = vector.broadcast %359 : vector<16x1xf32> to vector<16x32xf32>
    %361 = arith.mulf %356, %360 : vector<16x32xf32>
    %362 = vector.broadcast %342 : vector<1x32xf32> to vector<16x32xf32>
    %363 = arith.mulf %361, %362 : vector<16x32xf32>
    %364 = vector.broadcast %343 : vector<1x32xf32> to vector<16x32xf32>
    %365 = arith.addf %363, %364 : vector<16x32xf32>
    %366 = vector.extract_strided_slice %8 {offsets = [0, 64], sizes = [32, 64], strides = [1, 1]} : vector<32x128xf32> to vector<32x64xf32>
    %cst_78 = arith.constant dense<0.000000e+00> : vector<16x64xf32>
    %367 = tpu.matmul %365, %366, %cst_78 {dimension_numbers = #tpu.dot_dimension_numbers<[1], [0], [0], [1], [0, 0, 1, 1], [], []>} : vector<16x32xf32>, vector<32x64xf32>, vector<16x64xf32> -> vector<16x64xf32>
    %368 = vector.extract_strided_slice %9 {offsets = [0, 64], sizes = [1, 64], strides = [1, 1]} : vector<1x128xf32> to vector<1x64xf32>
    %369 = vector.broadcast %368 : vector<1x64xf32> to vector<16x64xf32>
    %370 = arith.addf %367, %369 : vector<16x64xf32>
    %371 = arith.negf %370 : vector<16x64xf32>
    %372 = math.exp %371 : vector<16x64xf32>
    %cst_79 = arith.constant 1.000000e+00 : f32
    %373 = vector.broadcast %cst_79 : f32 to vector<16x64xf32>
    %374 = arith.addf %373, %372 : vector<16x64xf32>
    %375 = arith.divf %373, %374 : vector<16x64xf32>
    %376 = arith.mulf %370, %375 : vector<16x64xf32>
    %c64 = arith.constant 64 : index
    %c0_80 = arith.constant 0 : index
    %377 = vector.load %arg3[%c64, %c0_80] : memref<400x32xf32, #tpu.memory_space<vmem>>, vector<64x32xf32>
    %cst_81 = arith.constant dense<0.000000e+00> : vector<16x32xf32>
    %378 = tpu.matmul %376, %377, %cst_81 {dimension_numbers = #tpu.dot_dimension_numbers<[1], [0], [0], [1], [0, 0, 1, 1], [], []>} : vector<16x64xf32>, vector<64x32xf32>, vector<16x32xf32> -> vector<16x32xf32>
    %379 = vector.extract_strided_slice %0 {offsets = [11, 0], sizes = [1, 32], strides = [1, 1]} : vector<24x32xf32> to vector<1x32xf32>
    %380 = vector.broadcast %379 : vector<1x32xf32> to vector<16x32xf32>
    %381 = arith.addf %378, %380 : vector<16x32xf32>
    %cst_82 = arith.constant 5.000000e-01 : f32
    %382 = vector.broadcast %cst_82 : f32 to vector<16x32xf32>
    %383 = arith.mulf %382, %381 : vector<16x32xf32>
    %384 = arith.addf %341, %383 : vector<16x32xf32>
    %385 = vector.extract_strided_slice %0 {offsets = [8, 0], sizes = [1, 32], strides = [1, 1]} : vector<24x32xf32> to vector<1x32xf32>
    %386 = vector.extract_strided_slice %0 {offsets = [9, 0], sizes = [1, 32], strides = [1, 1]} : vector<24x32xf32> to vector<1x32xf32>
    %cst_83 = arith.constant dense<0.000000e+00> : vector<16xf32>
    %387 = vector.multi_reduction <add>, %384, %cst_83 [1] : vector<16x32xf32> to vector<16xf32>
    %388 = vector.shape_cast %387 : vector<16xf32> to vector<16x1xf32>
    %cst_84 = arith.constant 3.200000e+01 : f32
    %389 = vector.broadcast %cst_84 : f32 to vector<16x1xf32>
    %390 = arith.divf %388, %389 : vector<16x1xf32>
    %391 = vector.broadcast %390 : vector<16x1xf32> to vector<16x32xf32>
    %392 = arith.subf %384, %391 : vector<16x32xf32>
    %393 = arith.mulf %392, %392 : vector<16x32xf32>
    %cst_85 = arith.constant dense<0.000000e+00> : vector<16xf32>
    %394 = vector.multi_reduction <add>, %393, %cst_85 [1] : vector<16x32xf32> to vector<16xf32>
    %395 = vector.shape_cast %394 : vector<16xf32> to vector<16x1xf32>
    %cst_86 = arith.constant 3.200000e+01 : f32
    %396 = vector.broadcast %cst_86 : f32 to vector<16x1xf32>
    %397 = arith.divf %395, %396 : vector<16x1xf32>
    %398 = vector.broadcast %390 : vector<16x1xf32> to vector<16x32xf32>
    %399 = arith.subf %384, %398 : vector<16x32xf32>
    %cst_87 = arith.constant 9.99999974E-6 : f32
    %400 = vector.broadcast %cst_87 : f32 to vector<16x1xf32>
    %401 = arith.addf %397, %400 : vector<16x1xf32>
    %402 = math.rsqrt %401 : vector<16x1xf32>
    %403 = vector.broadcast %402 : vector<16x1xf32> to vector<16x32xf32>
    %404 = arith.mulf %399, %403 : vector<16x32xf32>
    %405 = vector.broadcast %385 : vector<1x32xf32> to vector<16x32xf32>
    %406 = arith.mulf %404, %405 : vector<16x32xf32>
    %407 = vector.broadcast %386 : vector<1x32xf32> to vector<16x32xf32>
    %408 = arith.addf %406, %407 : vector<16x32xf32>
    %c0_88 = arith.constant 0 : index
    %c0_89 = arith.constant 0 : index
    %409 = vector.load %arg5[%c0_88, %c0_89] : memref<16x32xf32, #tpu.memory_space<vmem>>, vector<16x32xf32>
    tpu.vector_store %arg5[%c0_88, %c0_89], %408 {strides = array<i32>} : memref<16x32xf32, #tpu.memory_space<vmem>>, vector<16x32xf32>,
    return
  }
}

module attributes {stable_mosaic.version = 11 : i64} {
  func.func @ebranchformer_kernel(%arg0: memref<16x32xf32, #tpu.memory_space<vmem>>, %arg1: memref<32x32xf32, #tpu.memory_space<vmem>>, %arg2: memref<24x32xf32, #tpu.memory_space<vmem>>, %arg3: memref<400x32xf32, #tpu.memory_space<vmem>>, %arg4: memref<80x128xf32, #tpu.memory_space<vmem>>, %arg5: memref<16x32xf32, #tpu.memory_space<vmem>>) attributes {dimension_semantics = [], scalar_prefetch = 0 : i64, scratch_operands = 0 : i64, tpu.core_type = #tpu.core_type<tc>} {
    %c376 = arith.constant 376 : index
    %c0 = arith.constant 0 : index
    %0 = vector.load %arg3[%c376, %c0] : memref<400x32xf32, #tpu.memory_space<vmem>>, vector<24x32xf32>
    %c0_0 = arith.constant 0 : index
    %c0_1 = arith.constant 0 : index
    %1 = vector.load %arg2[%c0_0, %c0_1] : memref<24x32xf32, #tpu.memory_space<vmem>>, vector<16x32xf32>
    %2 = vector.extract_strided_slice %1 {offsets = [0, 0], sizes = [16, 1], strides = [1, 1]} : vector<16x32xf32> to vector<16x1xf32>
    %3 = vector.extract_strided_slice %1 {offsets = [0, 1], sizes = [16, 1], strides = [1, 1]} : vector<16x32xf32> to vector<16x1xf32>
    %4 = vector.extract_strided_slice %1 {offsets = [0, 2], sizes = [16, 1], strides = [1, 1]} : vector<16x32xf32> to vector<16x1xf32>
    %c16 = arith.constant 16 : index
    %c0_2 = arith.constant 0 : index
    %5 = vector.load %arg2[%c16, %c0_2] : memref<24x32xf32, #tpu.memory_space<vmem>>, vector<8x32xf32>
    %6 = vector.extract_strided_slice %5 {offsets = [0, 0], sizes = [8, 8], strides = [1, 1]} : vector<8x32xf32> to vector<8x8xf32>
    %c0_3 = arith.constant 0 : index
    %c0_4 = arith.constant 0 : index
    %7 = vector.load %arg0[%c0_3, %c0_4] : memref<16x32xf32, #tpu.memory_space<vmem>>, vector<16x32xf32>
    %c40 = arith.constant 40 : index
    %c0_5 = arith.constant 0 : index
    %8 = vector.load %arg4[%c40, %c0_5] : memref<80x128xf32, #tpu.memory_space<vmem>>, vector<32x128xf32>
    %c72 = arith.constant 72 : index
    %c0_6 = arith.constant 0 : index
    %9 = vector.load %arg4[%c72, %c0_6] : memref<80x128xf32, #tpu.memory_space<vmem>>, vector<1x128xf32>
    %10 = vector.extract_strided_slice %0 {offsets = [0, 0], sizes = [1, 32], strides = [1, 1]} : vector<24x32xf32> to vector<1x32xf32>
    %11 = vector.extract_strided_slice %0 {offsets = [1, 0], sizes = [1, 32], strides = [1, 1]} : vector<24x32xf32> to vector<1x32xf32>
    %cst = arith.constant dense<0.000000e+00> : vector<16xf32>
    %12 = vector.multi_reduction <add>, %7, %cst [1] : vector<16x32xf32> to vector<16xf32>
    %13 = vector.shape_cast %12 : vector<16xf32> to vector<16x1xf32>
    %cst_7 = arith.constant 3.200000e+01 : f32
    %14 = vector.broadcast %cst_7 : f32 to vector<16x1xf32>
    %15 = arith.divf %13, %14 : vector<16x1xf32>
    %16 = vector.broadcast %15 : vector<16x1xf32> to vector<16x32xf32>
    %17 = arith.subf %7, %16 : vector<16x32xf32>
    %18 = arith.mulf %17, %17 : vector<16x32xf32>
    %cst_8 = arith.constant dense<0.000000e+00> : vector<16xf32>
    %19 = vector.multi_reduction <add>, %18, %cst_8 [1] : vector<16x32xf32> to vector<16xf32>
    %20 = vector.shape_cast %19 : vector<16xf32> to vector<16x1xf32>
    %cst_9 = arith.constant 3.200000e+01 : f32
    %21 = vector.broadcast %cst_9 : f32 to vector<16x1xf32>
    %22 = arith.divf %20, %21 : vector<16x1xf32>
    %23 = vector.broadcast %15 : vector<16x1xf32> to vector<16x32xf32>
    %24 = arith.subf %7, %23 : vector<16x32xf32>
    %cst_10 = arith.constant 9.99999974E-6 : f32
    %25 = vector.broadcast %cst_10 : f32 to vector<16x1xf32>
    %26 = arith.addf %22, %25 : vector<16x1xf32>
    %27 = math.rsqrt %26 : vector<16x1xf32>
    %28 = vector.broadcast %27 : vector<16x1xf32> to vector<16x32xf32>
    %29 = arith.mulf %24, %28 : vector<16x32xf32>
    %30 = vector.broadcast %10 : vector<1x32xf32> to vector<16x32xf32>
    %31 = arith.mulf %29, %30 : vector<16x32xf32>
    %32 = vector.broadcast %11 : vector<1x32xf32> to vector<16x32xf32>
    %33 = arith.addf %31, %32 : vector<16x32xf32>
    %34 = vector.extract_strided_slice %8 {offsets = [0, 0], sizes = [32, 64], strides = [1, 1]} : vector<32x128xf32> to vector<32x64xf32>
    %cst_11 = arith.constant dense<0.000000e+00> : vector<16x64xf32>
    %35 = tpu.matmul %33, %34, %cst_11 {dimension_numbers = #tpu.dot_dimension_numbers<[1], [0], [0], [1], [0, 0, 1, 1], [], []>} : vector<16x32xf32>, vector<32x64xf32>, vector<16x64xf32> -> vector<16x64xf32>
    %36 = vector.extract_strided_slice %9 {offsets = [0, 0], sizes = [1, 64], strides = [1, 1]} : vector<1x128xf32> to vector<1x64xf32>
    %37 = vector.broadcast %36 : vector<1x64xf32> to vector<16x64xf32>
    %38 = arith.addf %35, %37 : vector<16x64xf32>
    %39 = arith.negf %38 : vector<16x64xf32>
    %40 = math.exp %39 : vector<16x64xf32>
    %cst_12 = arith.constant 1.000000e+00 : f32
    %41 = vector.broadcast %cst_12 : f32 to vector<16x64xf32>
    %42 = arith.addf %41, %40 : vector<16x64xf32>
    %43 = arith.divf %41, %42 : vector<16x64xf32>
    %44 = arith.mulf %38, %43 : vector<16x64xf32>
    %c0_13 = arith.constant 0 : index
    %c0_14 = arith.constant 0 : index
    %45 = vector.load %arg3[%c0_13, %c0_14] : memref<400x32xf32, #tpu.memory_space<vmem>>, vector<64x32xf32>
    %cst_15 = arith.constant dense<0.000000e+00> : vector<16x32xf32>
    %46 = tpu.matmul %44, %45, %cst_15 {dimension_numbers = #tpu.dot_dimension_numbers<[1], [0], [0], [1], [0, 0, 1, 1], [], []>} : vector<16x64xf32>, vector<64x32xf32>, vector<16x32xf32> -> vector<16x32xf32>
    %47 = vector.extract_strided_slice %0 {offsets = [10, 0], sizes = [1, 32], strides = [1, 1]} : vector<24x32xf32> to vector<1x32xf32>
    %48 = vector.broadcast %47 : vector<1x32xf32> to vector<16x32xf32>
    %49 = arith.addf %46, %48 : vector<16x32xf32>
    %cst_16 = arith.constant 5.000000e-01 : f32
    %50 = vector.broadcast %cst_16 : f32 to vector<16x32xf32>
    %51 = arith.mulf %50, %49 : vector<16x32xf32>
    %52 = arith.addf %7, %51 : vector<16x32xf32>
    %53 = vector.extract_strided_slice %0 {offsets = [2, 0], sizes = [1, 32], strides = [1, 1]} : vector<24x32xf32> to vector<1x32xf32>
    %54 = vector.extract_strided_slice %0 {offsets = [3, 0], sizes = [1, 32], strides = [1, 1]} : vector<24x32xf32> to vector<1x32xf32>
    %cst_17 = arith.constant dense<0.000000e+00> : vector<16xf32>
    %55 = vector.multi_reduction <add>, %52, %cst_17 [1] : vector<16x32xf32> to vector<16xf32>
    %56 = vector.shape_cast %55 : vector<16xf32> to vector<16x1xf32>
    %cst_18 = arith.constant 3.200000e+01 : f32
    %57 = vector.broadcast %cst_18 : f32 to vector<16x1xf32>
    %58 = arith.divf %56, %57 : vector<16x1xf32>
    %59 = vector.broadcast %58 : vector<16x1xf32> to vector<16x32xf32>
    %60 = arith.subf %52, %59 : vector<16x32xf32>
    %61 = arith.mulf %60, %60 : vector<16x32xf32>
    %cst_19 = arith.constant dense<0.000000e+00> : vector<16xf32>
    %62 = vector.multi_reduction <add>, %61, %cst_19 [1] : vector<16x32xf32> to vector<16xf32>
    %63 = vector.shape_cast %62 : vector<16xf32> to vector<16x1xf32>
    %cst_20 = arith.constant 3.200000e+01 : f32
    %64 = vector.broadcast %cst_20 : f32 to vector<16x1xf32>
    %65 = arith.divf %63, %64 : vector<16x1xf32>
    %66 = vector.broadcast %58 : vector<16x1xf32> to vector<16x32xf32>
    %67 = arith.subf %52, %66 : vector<16x32xf32>
    %cst_21 = arith.constant 9.99999974E-6 : f32
    %68 = vector.broadcast %cst_21 : f32 to vector<16x1xf32>
    %69 = arith.addf %65, %68 : vector<16x1xf32>
    %70 = math.rsqrt %69 : vector<16x1xf32>
    %71 = vector.broadcast %70 : vector<16x1xf32> to vector<16x32xf32>
    %72 = arith.mulf %67, %71 : vector<16x32xf32>
    %73 = vector.broadcast %53 : vector<1x32xf32> to vector<16x32xf32>
    %74 = arith.mulf %72, %73 : vector<16x32xf32>
    %75 = vector.broadcast %54 : vector<1x32xf32> to vector<16x32xf32>
    %76 = arith.addf %74, %75 : vector<16x32xf32>
    %c0_22 = arith.constant 0 : index
    %c0_23 = arith.constant 0 : index
    %77 = vector.load %arg4[%c0_22, %c0_23] : memref<80x128xf32, #tpu.memory_space<vmem>>, vector<32x128xf32>
    %c32 = arith.constant 32 : index
    %c0_24 = arith.constant 0 : index
    %78 = vector.load %arg4[%c32, %c0_24] : memref<80x128xf32, #tpu.memory_space<vmem>>, vector<1x128xf32>
    %cst_25 = arith.constant dense<0.000000e+00> : vector<16x128xf32>
    %79 = tpu.matmul %76, %77, %cst_25 {dimension_numbers = #tpu.dot_dimension_numbers<[1], [0], [0], [1], [0, 0, 1, 1], [], []>} : vector<16x32xf32>, vector<32x128xf32>, vector<16x128xf32> -> vector<16x128xf32>
    %80 = vector.broadcast %78 : vector<1x128xf32> to vector<16x128xf32>
    %81 = arith.addf %79, %80 : vector<16x128xf32>
    %c0_26 = arith.constant 0 : index
    %c0_27 = arith.constant 0 : index
    %82 = vector.load %arg1[%c0_26, %c0_27] : memref<32x32xf32, #tpu.memory_space<vmem>>, vector<32x32xf32>
    %c288 = arith.constant 288 : index
    %c0_28 = arith.constant 0 : index
    %83 = vector.load %arg3[%c288, %c0_28] : memref<400x32xf32, #tpu.memory_space<vmem>>, vector<32x32xf32>
    %cst_29 = arith.constant dense<0.000000e+00> : vector<32x32xf32>
    %84 = tpu.matmul %82, %83, %cst_29 {dimension_numbers = #tpu.dot_dimension_numbers<[1], [0], [0], [1], [0, 0, 1, 1], [], []>} : vector<32x32xf32>, vector<32x32xf32>, vector<32x32xf32> -> vector<32x32xf32>
    %85 = vector.extract_strided_slice %81 {offsets = [0, 0], sizes = [16, 8], strides = [1, 1]} : vector<16x128xf32> to vector<16x8xf32>
    %86 = vector.shape_cast %85 : vector<16x8xf32> to vector<2x8x8xf32>
    %87 = vector.extract_strided_slice %81 {offsets = [0, 8], sizes = [16, 8], strides = [1, 1]} : vector<16x128xf32> to vector<16x8xf32>
    %88 = vector.shape_cast %87 : vector<16x8xf32> to vector<2x8x8xf32>
    %89 = vector.extract_strided_slice %81 {offsets = [0, 16], sizes = [16, 8], strides = [1, 1]} : vector<16x128xf32> to vector<16x8xf32>
    %90 = vector.shape_cast %89 : vector<16x8xf32> to vector<2x8x8xf32>
    %91 = vector.extract_strided_slice %81 {offsets = [0, 24], sizes = [16, 8], strides = [1, 1]} : vector<16x128xf32> to vector<16x8xf32>
    %92 = vector.shape_cast %91 : vector<16x8xf32> to vector<2x8x8xf32>
    %93 = tpu.concatenate %86, %88, %90, %92 in 0 : vector<2x8x8xf32>, vector<2x8x8xf32>, vector<2x8x8xf32>, vector<2x8x8xf32> -> vector<8x8x8xf32>
    %94 = vector.extract_strided_slice %81 {offsets = [0, 32], sizes = [16, 8], strides = [1, 1]} : vector<16x128xf32> to vector<16x8xf32>
    %95 = vector.shape_cast %94 : vector<16x8xf32> to vector<2x8x8xf32>
    %96 = vector.extract_strided_slice %81 {offsets = [0, 40], sizes = [16, 8], strides = [1, 1]} : vector<16x128xf32> to vector<16x8xf32>
    %97 = vector.shape_cast %96 : vector<16x8xf32> to vector<2x8x8xf32>
    %98 = vector.extract_strided_slice %81 {offsets = [0, 48], sizes = [16, 8], strides = [1, 1]} : vector<16x128xf32> to vector<16x8xf32>
    %99 = vector.shape_cast %98 : vector<16x8xf32> to vector<2x8x8xf32>
    %100 = vector.extract_strided_slice %81 {offsets = [0, 56], sizes = [16, 8], strides = [1, 1]} : vector<16x128xf32> to vector<16x8xf32>
    %101 = vector.shape_cast %100 : vector<16x8xf32> to vector<2x8x8xf32>
    %102 = tpu.concatenate %95, %97, %99, %101 in 0 : vector<2x8x8xf32>, vector<2x8x8xf32>, vector<2x8x8xf32>, vector<2x8x8xf32> -> vector<8x8x8xf32>
    %103 = vector.extract_strided_slice %81 {offsets = [0, 64], sizes = [16, 8], strides = [1, 1]} : vector<16x128xf32> to vector<16x8xf32>
    %104 = vector.shape_cast %103 : vector<16x8xf32> to vector<2x8x8xf32>
    %105 = vector.extract_strided_slice %81 {offsets = [0, 72], sizes = [16, 8], strides = [1, 1]} : vector<16x128xf32> to vector<16x8xf32>
    %106 = vector.shape_cast %105 : vector<16x8xf32> to vector<2x8x8xf32>
    %107 = vector.extract_strided_slice %81 {offsets = [0, 80], sizes = [16, 8], strides = [1, 1]} : vector<16x128xf32> to vector<16x8xf32>
    %108 = vector.shape_cast %107 : vector<16x8xf32> to vector<2x8x8xf32>
    %109 = vector.extract_strided_slice %81 {offsets = [0, 88], sizes = [16, 8], strides = [1, 1]} : vector<16x128xf32> to vector<16x8xf32>
    %110 = vector.shape_cast %109 : vector<16x8xf32> to vector<2x8x8xf32>
    %111 = tpu.concatenate %104, %106, %108, %110 in 0 : vector<2x8x8xf32>, vector<2x8x8xf32>, vector<2x8x8xf32>, vector<2x8x8xf32> -> vector<8x8x8xf32>
    %112 = vector.extract_strided_slice %81 {offsets = [0, 96], sizes = [16, 8], strides = [1, 1]} : vector<16x128xf32> to vector<16x8xf32>
    %113 = vector.shape_cast %112 : vector<16x8xf32> to vector<2x8x8xf32>
    %114 = vector.extract_strided_slice %81 {offsets = [0, 104], sizes = [16, 8], strides = [1, 1]} : vector<16x128xf32> to vector<16x8xf32>
    %115 = vector.shape_cast %114 : vector<16x8xf32> to vector<2x8x8xf32>
    %116 = vector.extract_strided_slice %81 {offsets = [0, 112], sizes = [16, 8], strides = [1, 1]} : vector<16x128xf32> to vector<16x8xf32>
    %117 = vector.shape_cast %116 : vector<16x8xf32> to vector<2x8x8xf32>
    %118 = vector.extract_strided_slice %81 {offsets = [0, 120], sizes = [16, 8], strides = [1, 1]} : vector<16x128xf32> to vector<16x8xf32>
    %119 = vector.shape_cast %118 : vector<16x8xf32> to vector<2x8x8xf32>
    %120 = tpu.concatenate %113, %115, %117, %119 in 0 : vector<2x8x8xf32>, vector<2x8x8xf32>, vector<2x8x8xf32>, vector<2x8x8xf32> -> vector<8x8x8xf32>
    %121 = vector.extract_strided_slice %84 {offsets = [0, 0], sizes = [32, 8], strides = [1, 1]} : vector<32x32xf32> to vector<32x8xf32>
    %122 = vector.shape_cast %121 : vector<32x8xf32> to vector<2x16x8xf32>
    %123 = vector.extract_strided_slice %84 {offsets = [0, 8], sizes = [32, 8], strides = [1, 1]} : vector<32x32xf32> to vector<32x8xf32>
    %124 = vector.shape_cast %123 : vector<32x8xf32> to vector<2x16x8xf32>
    %125 = vector.extract_strided_slice %84 {offsets = [0, 16], sizes = [32, 8], strides = [1, 1]} : vector<32x32xf32> to vector<32x8xf32>
    %126 = vector.shape_cast %125 : vector<32x8xf32> to vector<2x16x8xf32>
    %127 = vector.extract_strided_slice %84 {offsets = [0, 24], sizes = [32, 8], strides = [1, 1]} : vector<32x32xf32> to vector<32x8xf32>
    %128 = vector.shape_cast %127 : vector<32x8xf32> to vector<2x16x8xf32>
    %129 = tpu.concatenate %122, %124, %126, %128 in 0 : vector<2x16x8xf32>, vector<2x16x8xf32>, vector<2x16x8xf32>, vector<2x16x8xf32> -> vector<8x16x8xf32>
    "tpu.trace_start"() <{level = 10 : i32, message = "xtd,xsd->xts"}> : () -> ()
    %cst_30 = arith.constant dense<0.000000e+00> : vector<8x8x8xf32>
    %130 = tpu.matmul %93, %102, %cst_30 {dimension_numbers = #tpu.dot_dimension_numbers<[2], [2], [1], [1], [0, 0, 0, 1, 1, 1], [0], [0]>} : vector<8x8x8xf32>, vector<8x8x8xf32>, vector<8x8x8xf32> -> vector<8x8x8xf32>
    "tpu.trace_stop"() : () -> ()
    "tpu.trace_start"() <{level = 10 : i32, message = "xtd,xrd->xtr"}> : () -> ()
    %cst_31 = arith.constant dense<0.000000e+00> : vector<8x8x16xf32>
    %131 = tpu.matmul %120, %129, %cst_31 {dimension_numbers = #tpu.dot_dimension_numbers<[2], [2], [1], [1], [0, 0, 0, 1, 1, 1], [0], [0]>} : vector<8x8x8xf32>, vector<8x16x8xf32>, vector<8x8x16xf32> -> vector<8x8x16xf32>
    "tpu.trace_stop"() : () -> ()
    %132 = vector.extract_strided_slice %131 {offsets = [0, 0, 7], sizes = [8, 1, 8], strides = [1, 1, 1]} : vector<8x8x16xf32> to vector<8x1x8xf32>
    %133 = vector.extract_strided_slice %131 {offsets = [0, 1, 6], sizes = [8, 1, 8], strides = [1, 1, 1]} : vector<8x8x16xf32> to vector<8x1x8xf32>
    %134 = vector.extract_strided_slice %131 {offsets = [0, 2, 5], sizes = [8, 1, 8], strides = [1, 1, 1]} : vector<8x8x16xf32> to vector<8x1x8xf32>
    %135 = vector.extract_strided_slice %131 {offsets = [0, 3, 4], sizes = [8, 1, 8], strides = [1, 1, 1]} : vector<8x8x16xf32> to vector<8x1x8xf32>
    %136 = vector.extract_strided_slice %131 {offsets = [0, 4, 3], sizes = [8, 1, 8], strides = [1, 1, 1]} : vector<8x8x16xf32> to vector<8x1x8xf32>
    %137 = vector.extract_strided_slice %131 {offsets = [0, 5, 2], sizes = [8, 1, 8], strides = [1, 1, 1]} : vector<8x8x16xf32> to vector<8x1x8xf32>
    %138 = vector.extract_strided_slice %131 {offsets = [0, 6, 1], sizes = [8, 1, 8], strides = [1, 1, 1]} : vector<8x8x16xf32> to vector<8x1x8xf32>
    %139 = vector.extract_strided_slice %131 {offsets = [0, 7, 0], sizes = [8, 1, 8], strides = [1, 1, 1]} : vector<8x8x16xf32> to vector<8x1x8xf32>
    %140 = tpu.concatenate %132, %133, %134, %135, %136, %137, %138, %139 in 1 : vector<8x1x8xf32>, vector<8x1x8xf32>, vector<8x1x8xf32>, vector<8x1x8xf32>, vector<8x1x8xf32>, vector<8x1x8xf32>, vector<8x1x8xf32>, vector<8x1x8xf32> -> vector<8x8x8xf32>
    %141 = arith.addf %130, %140 : vector<8x8x8xf32>
    %cst_32 = arith.constant 0.353553385 : f32
    %142 = vector.broadcast %cst_32 : f32 to vector<8x8x8xf32>
    %143 = arith.mulf %141, %142 : vector<8x8x8xf32>
    %144 = vector.shape_cast %6 : vector<8x8xf32> to vector<8x1x8xf32>
    %145 = vector.broadcast %144 : vector<8x1x8xf32> to vector<8x8x8xf32>
    %146 = arith.addf %143, %145 : vector<8x8x8xf32>
    %cst_33 = arith.constant dense<0xFF800000> : vector<8x8xf32>
    %147 = vector.multi_reduction <maximumf>, %146, %cst_33 [2] : vector<8x8x8xf32> to vector<8x8xf32>
    %148 = vector.shape_cast %147 : vector<8x8xf32> to vector<8x8x1xf32>
    %149 = vector.broadcast %148 : vector<8x8x1xf32> to vector<8x8x8xf32>
    %150 = arith.subf %146, %149 : vector<8x8x8xf32>
    %151 = math.exp %150 : vector<8x8x8xf32>
    %cst_34 = arith.constant dense<0.000000e+00> : vector<8x8xf32>
    %152 = vector.multi_reduction <add>, %151, %cst_34 [2] : vector<8x8x8xf32> to vector<8x8xf32>
    %153 = vector.shape_cast %152 : vector<8x8xf32> to vector<8x8x1xf32>
    %154 = tpu.reciprocal %153 {approx = true} : vector<8x8x1xf32> -> vector<8x8x1xf32>
    %155 = vector.broadcast %154 : vector<8x8x1xf32> to vector<8x8x8xf32>
    %156 = arith.mulf %151, %155 : vector<8x8x8xf32>
    "tpu.trace_start"() <{level = 10 : i32, message = "xts,xsd->xtd"}> : () -> ()
    %cst_35 = arith.constant dense<0.000000e+00> : vector<8x8x8xf32>
    %157 = tpu.matmul %156, %111, %cst_35 {dimension_numbers = #tpu.dot_dimension_numbers<[2], [1], [1], [2], [0, 0, 0, 1, 1, 2], [0], [0]>} : vector<8x8x8xf32>, vector<8x8x8xf32>, vector<8x8x8xf32> -> vector<8x8x8xf32>
    "tpu.trace_stop"() : () -> ()
    %c320 = arith.constant 320 : index
    %c0_36 = arith.constant 0 : index
    %158 = vector.load %arg3[%c320, %c0_36] : memref<400x32xf32, #tpu.memory_space<vmem>>, vector<32x32xf32>
    %159 = vector.extract_strided_slice %0 {offsets = [12, 0], sizes = [1, 32], strides = [1, 1]} : vector<24x32xf32> to vector<1x32xf32>
    %160 = vector.extract_strided_slice %157 {offsets = [0, 0, 0], sizes = [2, 8, 8], strides = [1, 1, 1]} : vector<8x8x8xf32> to vector<2x8x8xf32>
    %161 = vector.shape_cast %160 : vector<2x8x8xf32> to vector<16x8xf32>
    %162 = vector.extract_strided_slice %158 {offsets = [0, 0], sizes = [8, 32], strides = [1, 1]} : vector<32x32xf32> to vector<8x32xf32>
    %cst_37 = arith.constant dense<0.000000e+00> : vector<16x32xf32>
    %163 = tpu.matmul %161, %162, %cst_37 {dimension_numbers = #tpu.dot_dimension_numbers<[1], [0], [0], [1], [0, 0, 1, 1], [], []>} : vector<16x8xf32>, vector<8x32xf32>, vector<16x32xf32> -> vector<16x32xf32>
    %164 = vector.broadcast %159 : vector<1x32xf32> to vector<16x32xf32>
    %165 = arith.addf %164, %163 : vector<16x32xf32>
    %166 = vector.extract_strided_slice %157 {offsets = [2, 0, 0], sizes = [2, 8, 8], strides = [1, 1, 1]} : vector<8x8x8xf32> to vector<2x8x8xf32>
    %167 = vector.shape_cast %166 : vector<2x8x8xf32> to vector<16x8xf32>
    %168 = vector.extract_strided_slice %158 {offsets = [8, 0], sizes = [8, 32], strides = [1, 1]} : vector<32x32xf32> to vector<8x32xf32>
    %cst_38 = arith.constant dense<0.000000e+00> : vector<16x32xf32>
    %169 = tpu.matmul %167, %168, %cst_38 {dimension_numbers = #tpu.dot_dimension_numbers<[1], [0], [0], [1], [0, 0, 1, 1], [], []>} : vector<16x8xf32>, vector<8x32xf32>, vector<16x32xf32> -> vector<16x32xf32>
    %170 = arith.addf %165, %169 : vector<16x32xf32>
    %171 = vector.extract_strided_slice %157 {offsets = [4, 0, 0], sizes = [2, 8, 8], strides = [1, 1, 1]} : vector<8x8x8xf32> to vector<2x8x8xf32>
    %172 = vector.shape_cast %171 : vector<2x8x8xf32> to vector<16x8xf32>
    %173 = vector.extract_strided_slice %158 {offsets = [16, 0], sizes = [8, 32], strides = [1, 1]} : vector<32x32xf32> to vector<8x32xf32>
    %cst_39 = arith.constant dense<0.000000e+00> : vector<16x32xf32>
    %174 = tpu.matmul %172, %173, %cst_39 {dimension_numbers = #tpu.dot_dimension_numbers<[1], [0], [0], [1], [0, 0, 1, 1], [], []>} : vector<16x8xf32>, vector<8x32xf32>, vector<16x32xf32> -> vector<16x32xf32>
    %175 = arith.addf %170, %174 : vector<16x32xf32>
    %176 = vector.extract_strided_slice %157 {offsets = [6, 0, 0], sizes = [2, 8, 8], strides = [1, 1, 1]} : vector<8x8x8xf32> to vector<2x8x8xf32>
    %177 = vector.shape_cast %176 : vector<2x8x8xf32> to vector<16x8xf32>
    %178 = vector.extract_strided_slice %158 {offsets = [24, 0], sizes = [8, 32], strides = [1, 1]} : vector<32x32xf32> to vector<8x32xf32>
    %cst_40 = arith.constant dense<0.000000e+00> : vector<16x32xf32>
    %179 = tpu.matmul %177, %178, %cst_40 {dimension_numbers = #tpu.dot_dimension_numbers<[1], [0], [0], [1], [0, 0, 1, 1], [], []>} : vector<16x8xf32>, vector<8x32xf32>, vector<16x32xf32> -> vector<16x32xf32>
    %180 = arith.addf %175, %179 : vector<16x32xf32>
    %181 = vector.extract_strided_slice %0 {offsets = [4, 0], sizes = [1, 32], strides = [1, 1]} : vector<24x32xf32> to vector<1x32xf32>
    %182 = vector.extract_strided_slice %0 {offsets = [5, 0], sizes = [1, 32], strides = [1, 1]} : vector<24x32xf32> to vector<1x32xf32>
    %cst_41 = arith.constant dense<0.000000e+00> : vector<16xf32>
    %183 = vector.multi_reduction <add>, %52, %cst_41 [1] : vector<16x32xf32> to vector<16xf32>
    %184 = vector.shape_cast %183 : vector<16xf32> to vector<16x1xf32>
    %cst_42 = arith.constant 3.200000e+01 : f32
    %185 = vector.broadcast %cst_42 : f32 to vector<16x1xf32>
    %186 = arith.divf %184, %185 : vector<16x1xf32>
    %187 = vector.broadcast %186 : vector<16x1xf32> to vector<16x32xf32>
    %188 = arith.subf %52, %187 : vector<16x32xf32>
    %189 = arith.mulf %188, %188 : vector<16x32xf32>
    %cst_43 = arith.constant dense<0.000000e+00> : vector<16xf32>
    %190 = vector.multi_reduction <add>, %189, %cst_43 [1] : vector<16x32xf32> to vector<16xf32>
    %191 = vector.shape_cast %190 : vector<16xf32> to vector<16x1xf32>
    %cst_44 = arith.constant 3.200000e+01 : f32
    %192 = vector.broadcast %cst_44 : f32 to vector<16x1xf32>
    %193 = arith.divf %191, %192 : vector<16x1xf32>
    %194 = vector.broadcast %186 : vector<16x1xf32> to vector<16x32xf32>
    %195 = arith.subf %52, %194 : vector<16x32xf32>
    %cst_45 = arith.constant 9.99999974E-6 : f32
    %196 = vector.broadcast %cst_45 : f32 to vector<16x1xf32>
    %197 = arith.addf %193, %196 : vector<16x1xf32>
    %198 = math.rsqrt %197 : vector<16x1xf32>
    %199 = vector.broadcast %198 : vector<16x1xf32> to vector<16x32xf32>
    %200 = arith.mulf %195, %199 : vector<16x32xf32>
    %201 = vector.broadcast %181 : vector<1x32xf32> to vector<16x32xf32>
    %202 = arith.mulf %200, %201 : vector<16x32xf32>
    %203 = vector.broadcast %182 : vector<1x32xf32> to vector<16x32xf32>
    %204 = arith.addf %202, %203 : vector<16x32xf32>
    %c128 = arith.constant 128 : index
    %c0_46 = arith.constant 0 : index
    %205 = vector.load %arg3[%c128, %c0_46] : memref<400x32xf32, #tpu.memory_space<vmem>>, vector<32x32xf32>
    %cst_47 = arith.constant dense<0.000000e+00> : vector<16x32xf32>
    %206 = tpu.matmul %204, %205, %cst_47 {dimension_numbers = #tpu.dot_dimension_numbers<[1], [0], [0], [1], [0, 0, 1, 1], [], []>} : vector<16x32xf32>, vector<32x32xf32>, vector<16x32xf32> -> vector<16x32xf32>
    %207 = vector.extract_strided_slice %0 {offsets = [13, 0], sizes = [1, 32], strides = [1, 1]} : vector<24x32xf32> to vector<1x32xf32>
    %208 = vector.broadcast %207 : vector<1x32xf32> to vector<16x32xf32>
    %209 = arith.addf %206, %208 : vector<16x32xf32>
    %cst_48 = arith.constant 5.000000e-01 : f32
    %210 = vector.broadcast %cst_48 : f32 to vector<16x32xf32>
    %211 = arith.mulf %210, %209 : vector<16x32xf32>
    %cst_49 = arith.constant 4.471500e-02 : f32
    %212 = vector.broadcast %cst_49 : f32 to vector<16x32xf32>
    %213 = arith.mulf %212, %209 : vector<16x32xf32>
    %214 = arith.mulf %213, %209 : vector<16x32xf32>
    %215 = arith.mulf %214, %209 : vector<16x32xf32>
    %216 = arith.addf %209, %215 : vector<16x32xf32>
    %cst_50 = arith.constant 0.797884583 : f32
    %217 = vector.broadcast %cst_50 : f32 to vector<16x32xf32>
    %218 = arith.mulf %217, %216 : vector<16x32xf32>
    %219 = math.tanh %218 : vector<16x32xf32>
    %cst_51 = arith.constant 1.000000e+00 : f32
    %220 = vector.broadcast %cst_51 : f32 to vector<16x32xf32>
    %221 = arith.addf %220, %219 : vector<16x32xf32>
    %222 = arith.mulf %211, %221 : vector<16x32xf32>
    %c160 = arith.constant 160 : index
    %c0_52 = arith.constant 0 : index
    %223 = vector.load %arg3[%c160, %c0_52] : memref<400x32xf32, #tpu.memory_space<vmem>>, vector<32x32xf32>
    %cst_53 = arith.constant dense<0.000000e+00> : vector<16x32xf32>
    %224 = tpu.matmul %204, %223, %cst_53 {dimension_numbers = #tpu.dot_dimension_numbers<[1], [0], [0], [1], [0, 0, 1, 1], [], []>} : vector<16x32xf32>, vector<32x32xf32>, vector<16x32xf32> -> vector<16x32xf32>
    %225 = vector.extract_strided_slice %0 {offsets = [14, 0], sizes = [1, 32], strides = [1, 1]} : vector<24x32xf32> to vector<1x32xf32>
    %226 = vector.broadcast %225 : vector<1x32xf32> to vector<16x32xf32>
    %227 = arith.addf %224, %226 : vector<16x32xf32>
    %cst_54 = arith.constant 5.000000e-01 : f32
    %228 = vector.broadcast %cst_54 : f32 to vector<16x32xf32>
    %229 = arith.mulf %228, %227 : vector<16x32xf32>
    %cst_55 = arith.constant 4.471500e-02 : f32
    %230 = vector.broadcast %cst_55 : f32 to vector<16x32xf32>
    %231 = arith.mulf %230, %227 : vector<16x32xf32>
    %232 = arith.mulf %231, %227 : vector<16x32xf32>
    %233 = arith.mulf %232, %227 : vector<16x32xf32>
    %234 = arith.addf %227, %233 : vector<16x32xf32>
    %cst_56 = arith.constant 0.797884583 : f32
    %235 = vector.broadcast %cst_56 : f32 to vector<16x32xf32>
    %236 = arith.mulf %235, %234 : vector<16x32xf32>
    %237 = math.tanh %236 : vector<16x32xf32>
    %cst_57 = arith.constant 1.000000e+00 : f32
    %238 = vector.broadcast %cst_57 : f32 to vector<16x32xf32>
    %239 = arith.addf %238, %237 : vector<16x32xf32>
    %240 = arith.mulf %229, %239 : vector<16x32xf32>
    %241 = vector.extract_strided_slice %0 {offsets = [15, 0], sizes = [1, 32], strides = [1, 1]} : vector<24x32xf32> to vector<1x32xf32>
    %242 = vector.extract_strided_slice %0 {offsets = [16, 0], sizes = [1, 32], strides = [1, 1]} : vector<24x32xf32> to vector<1x32xf32>
    %cst_58 = arith.constant dense<0.000000e+00> : vector<16xf32>
    %243 = vector.multi_reduction <add>, %240, %cst_58 [1] : vector<16x32xf32> to vector<16xf32>
    %244 = vector.shape_cast %243 : vector<16xf32> to vector<16x1xf32>
    %cst_59 = arith.constant 3.200000e+01 : f32
    %245 = vector.broadcast %cst_59 : f32 to vector<16x1xf32>
    %246 = arith.divf %244, %245 : vector<16x1xf32>
    %247 = vector.broadcast %246 : vector<16x1xf32> to vector<16x32xf32>
    %248 = arith.subf %240, %247 : vector<16x32xf32>
    %249 = arith.mulf %248, %248 : vector<16x32xf32>
    %cst_60 = arith.constant dense<0.000000e+00> : vector<16xf32>
    %250 = vector.multi_reduction <add>, %249, %cst_60 [1] : vector<16x32xf32> to vector<16xf32>
    %251 = vector.shape_cast %250 : vector<16xf32> to vector<16x1xf32>
    %cst_61 = arith.constant 3.200000e+01 : f32
    %252 = vector.broadcast %cst_61 : f32 to vector<16x1xf32>
    %253 = arith.divf %251, %252 : vector<16x1xf32>
    %254 = vector.broadcast %246 : vector<16x1xf32> to vector<16x32xf32>
    %255 = arith.subf %240, %254 : vector<16x32xf32>
    %cst_62 = arith.constant 9.99999974E-6 : f32
    %256 = vector.broadcast %cst_62 : f32 to vector<16x1xf32>
    %257 = arith.addf %253, %256 : vector<16x1xf32>
    %258 = math.rsqrt %257 : vector<16x1xf32>
    %259 = vector.broadcast %258 : vector<16x1xf32> to vector<16x32xf32>
    %260 = arith.mulf %255, %259 : vector<16x32xf32>
    %261 = vector.broadcast %241 : vector<1x32xf32> to vector<16x32xf32>
    %262 = arith.mulf %260, %261 : vector<16x32xf32>
    %263 = vector.broadcast %242 : vector<1x32xf32> to vector<16x32xf32>
    %264 = arith.addf %262, %263 : vector<16x32xf32>
    %265 = vector.broadcast %2 : vector<16x1xf32> to vector<16x32xf32>
    %266 = arith.mulf %264, %265 : vector<16x32xf32>
    %c352 = arith.constant 352 : index
    %c0_63 = arith.constant 0 : index
    %267 = vector.load %arg3[%c352, %c0_63] : memref<400x32xf32, #tpu.memory_space<vmem>>, vector<3x32xf32>
    %268 = vector.extract_strided_slice %0 {offsets = [17, 0], sizes = [1, 32], strides = [1, 1]} : vector<24x32xf32> to vector<1x32xf32>
    %cst_64 = arith.constant 0.000000e+00 : f32
    %269 = vector.broadcast %cst_64 : f32 to vector<1x32xf32>
    %270 = vector.extract_strided_slice %266 {offsets = [0, 0], sizes = [15, 32], strides = [1, 1]} : vector<16x32xf32> to vector<15x32xf32>
    %271 = tpu.concatenate %269, %270 in 0 : vector<1x32xf32>, vector<15x32xf32> -> vector<16x32xf32>
    %272 = vector.broadcast %3 : vector<16x1xf32> to vector<16x32xf32>
    %273 = arith.mulf %271, %272 : vector<16x32xf32>
    %274 = vector.extract_strided_slice %267 {offsets = [0, 0], sizes = [1, 32], strides = [1, 1]} : vector<3x32xf32> to vector<1x32xf32>
    %275 = vector.broadcast %274 : vector<1x32xf32> to vector<16x32xf32>
    %276 = arith.mulf %273, %275 : vector<16x32xf32>
    %277 = vector.extract_strided_slice %267 {offsets = [1, 0], sizes = [1, 32], strides = [1, 1]} : vector<3x32xf32> to vector<1x32xf32>
    %278 = vector.broadcast %277 : vector<1x32xf32> to vector<16x32xf32>
    %279 = arith.mulf %266, %278 : vector<16x32xf32>
    %280 = arith.addf %276, %279 : vector<16x32xf32>
    %cst_65 = arith.constant 0.000000e+00 : f32
    %281 = vector.broadcast %cst_65 : f32 to vector<1x32xf32>
    %282 = vector.extract_strided_slice %266 {offsets = [1, 0], sizes = [15, 32], strides = [1, 1]} : vector<16x32xf32> to vector<15x32xf32>
    %283 = tpu.concatenate %282, %281 in 0 : vector<15x32xf32>, vector<1x32xf32> -> vector<16x32xf32>
    %284 = vector.broadcast %4 : vector<16x1xf32> to vector<16x32xf32>
    %285 = arith.mulf %283, %284 : vector<16x32xf32>
    %286 = vector.extract_strided_slice %267 {offsets = [2, 0], sizes = [1, 32], strides = [1, 1]} : vector<3x32xf32> to vector<1x32xf32>
    %287 = vector.broadcast %286 : vector<1x32xf32> to vector<16x32xf32>
    %288 = arith.mulf %285, %287 : vector<16x32xf32>
    %289 = arith.addf %280, %288 : vector<16x32xf32>
    %290 = vector.broadcast %268 : vector<1x32xf32> to vector<16x32xf32>
    %291 = arith.addf %289, %290 : vector<16x32xf32>
    %292 = arith.mulf %222, %291 : vector<16x32xf32>
    %c192 = arith.constant 192 : index
    %c0_66 = arith.constant 0 : index
    %293 = vector.load %arg3[%c192, %c0_66] : memref<400x32xf32, #tpu.memory_space<vmem>>, vector<32x32xf32>
    %cst_67 = arith.constant dense<0.000000e+00> : vector<16x32xf32>
    %294 = tpu.matmul %292, %293, %cst_67 {dimension_numbers = #tpu.dot_dimension_numbers<[1], [0], [0], [1], [0, 0, 1, 1], [], []>} : vector<16x32xf32>, vector<32x32xf32>, vector<16x32xf32> -> vector<16x32xf32>
    %295 = vector.extract_strided_slice %0 {offsets = [18, 0], sizes = [1, 32], strides = [1, 1]} : vector<24x32xf32> to vector<1x32xf32>
    %296 = vector.broadcast %295 : vector<1x32xf32> to vector<16x32xf32>
    %297 = arith.addf %294, %296 : vector<16x32xf32>
    %298 = vector.broadcast %2 : vector<16x1xf32> to vector<16x32xf32>
    %299 = arith.mulf %180, %298 : vector<16x32xf32>
    %300 = vector.broadcast %2 : vector<16x1xf32> to vector<16x32xf32>
    %301 = arith.mulf %297, %300 : vector<16x32xf32>
    %c360 = arith.constant 360 : index
    %c0_68 = arith.constant 0 : index
    %302 = vector.load %arg3[%c360, %c0_68] : memref<400x32xf32, #tpu.memory_space<vmem>>, vector<3x32xf32>
    %303 = vector.extract_strided_slice %0 {offsets = [19, 0], sizes = [1, 32], strides = [1, 1]} : vector<24x32xf32> to vector<1x32xf32>
    %cst_69 = arith.constant 0.000000e+00 : f32
    %304 = vector.broadcast %cst_69 : f32 to vector<1x32xf32>
    %305 = vector.extract_strided_slice %299 {offsets = [0, 0], sizes = [15, 32], strides = [1, 1]} : vector<16x32xf32> to vector<15x32xf32>
    %306 = tpu.concatenate %304, %305 in 0 : vector<1x32xf32>, vector<15x32xf32> -> vector<16x32xf32>
    %307 = vector.broadcast %3 : vector<16x1xf32> to vector<16x32xf32>
    %308 = arith.mulf %306, %307 : vector<16x32xf32>
    %309 = vector.extract_strided_slice %302 {offsets = [0, 0], sizes = [1, 32], strides = [1, 1]} : vector<3x32xf32> to vector<1x32xf32>
    %310 = vector.broadcast %309 : vector<1x32xf32> to vector<16x32xf32>
    %311 = arith.mulf %308, %310 : vector<16x32xf32>
    %312 = vector.extract_strided_slice %302 {offsets = [1, 0], sizes = [1, 32], strides = [1, 1]} : vector<3x32xf32> to vector<1x32xf32>
    %313 = vector.broadcast %312 : vector<1x32xf32> to vector<16x32xf32>
    %314 = arith.mulf %299, %313 : vector<16x32xf32>
    %315 = arith.addf %311, %314 : vector<16x32xf32>
    %cst_70 = arith.constant 0.000000e+00 : f32
    %316 = vector.broadcast %cst_70 : f32 to vector<1x32xf32>
    %317 = vector.extract_strided_slice %299 {offsets = [1, 0], sizes = [15, 32], strides = [1, 1]} : vector<16x32xf32> to vector<15x32xf32>
    %318 = tpu.concatenate %317, %316 in 0 : vector<15x32xf32>, vector<1x32xf32> -> vector<16x32xf32>
    %319 = vector.broadcast %4 : vector<16x1xf32> to vector<16x32xf32>
    %320 = arith.mulf %318, %319 : vector<16x32xf32>
    %321 = vector.extract_strided_slice %302 {offsets = [2, 0], sizes = [1, 32], strides = [1, 1]} : vector<3x32xf32> to vector<1x32xf32>
    %322 = vector.broadcast %321 : vector<1x32xf32> to vector<16x32xf32>
    %323 = arith.mulf %320, %322 : vector<16x32xf32>
    %324 = arith.addf %315, %323 : vector<16x32xf32>
    %325 = vector.broadcast %303 : vector<1x32xf32> to vector<16x32xf32>
    %326 = arith.addf %324, %325 : vector<16x32xf32>
    %c368 = arith.constant 368 : index
    %c0_71 = arith.constant 0 : index
    %327 = vector.load %arg3[%c368, %c0_71] : memref<400x32xf32, #tpu.memory_space<vmem>>, vector<3x32xf32>
    %328 = vector.extract_strided_slice %0 {offsets = [20, 0], sizes = [1, 32], strides = [1, 1]} : vector<24x32xf32> to vector<1x32xf32>
    %cst_72 = arith.constant 0.000000e+00 : f32
    %329 = vector.broadcast %cst_72 : f32 to vector<1x32xf32>
    %330 = vector.extract_strided_slice %301 {offsets = [0, 0], sizes = [15, 32], strides = [1, 1]} : vector<16x32xf32> to vector<15x32xf32>
    %331 = tpu.concatenate %329, %330 in 0 : vector<1x32xf32>, vector<15x32xf32> -> vector<16x32xf32>
    %332 = vector.broadcast %3 : vector<16x1xf32> to vector<16x32xf32>
    %333 = arith.mulf %331, %332 : vector<16x32xf32>
    %334 = vector.extract_strided_slice %327 {offsets = [0, 0], sizes = [1, 32], strides = [1, 1]} : vector<3x32xf32> to vector<1x32xf32>
    %335 = vector.broadcast %334 : vector<1x32xf32> to vector<16x32xf32>
    %336 = arith.mulf %333, %335 : vector<16x32xf32>
    %337 = vector.extract_strided_slice %327 {offsets = [1, 0], sizes = [1, 32], strides = [1, 1]} : vector<3x32xf32> to vector<1x32xf32>
    %338 = vector.broadcast %337 : vector<1x32xf32> to vector<16x32xf32>
    %339 = arith.mulf %301, %338 : vector<16x32xf32>
    %340 = arith.addf %336, %339 : vector<16x32xf32>
    %cst_73 = arith.constant 0.000000e+00 : f32
    %341 = vector.broadcast %cst_73 : f32 to vector<1x32xf32>
    %342 = vector.extract_strided_slice %301 {offsets = [1, 0], sizes = [15, 32], strides = [1, 1]} : vector<16x32xf32> to vector<15x32xf32>
    %343 = tpu.concatenate %342, %341 in 0 : vector<15x32xf32>, vector<1x32xf32> -> vector<16x32xf32>
    %344 = vector.broadcast %4 : vector<16x1xf32> to vector<16x32xf32>
    %345 = arith.mulf %343, %344 : vector<16x32xf32>
    %346 = vector.extract_strided_slice %327 {offsets = [2, 0], sizes = [1, 32], strides = [1, 1]} : vector<3x32xf32> to vector<1x32xf32>
    %347 = vector.broadcast %346 : vector<1x32xf32> to vector<16x32xf32>
    %348 = arith.mulf %345, %347 : vector<16x32xf32>
    %349 = arith.addf %340, %348 : vector<16x32xf32>
    %350 = vector.broadcast %328 : vector<1x32xf32> to vector<16x32xf32>
    %351 = arith.addf %349, %350 : vector<16x32xf32>
    %352 = arith.addf %299, %326 : vector<16x32xf32>
    %c224 = arith.constant 224 : index
    %c0_74 = arith.constant 0 : index
    %353 = vector.load %arg3[%c224, %c0_74] : memref<400x32xf32, #tpu.memory_space<vmem>>, vector<32x32xf32>
    %cst_75 = arith.constant dense<0.000000e+00> : vector<16x32xf32>
    %354 = tpu.matmul %352, %353, %cst_75 {dimension_numbers = #tpu.dot_dimension_numbers<[1], [0], [0], [1], [0, 0, 1, 1], [], []>} : vector<16x32xf32>, vector<32x32xf32>, vector<16x32xf32> -> vector<16x32xf32>
    %355 = arith.addf %301, %351 : vector<16x32xf32>
    %c256 = arith.constant 256 : index
    %c0_76 = arith.constant 0 : index
    %356 = vector.load %arg3[%c256, %c0_76] : memref<400x32xf32, #tpu.memory_space<vmem>>, vector<32x32xf32>
    %cst_77 = arith.constant dense<0.000000e+00> : vector<16x32xf32>
    %357 = tpu.matmul %355, %356, %cst_77 {dimension_numbers = #tpu.dot_dimension_numbers<[1], [0], [0], [1], [0, 0, 1, 1], [], []>} : vector<16x32xf32>, vector<32x32xf32>, vector<16x32xf32> -> vector<16x32xf32>
    %358 = arith.addf %354, %357 : vector<16x32xf32>
    %359 = vector.extract_strided_slice %0 {offsets = [21, 0], sizes = [1, 32], strides = [1, 1]} : vector<24x32xf32> to vector<1x32xf32>
    %360 = vector.broadcast %359 : vector<1x32xf32> to vector<16x32xf32>
    %361 = arith.addf %358, %360 : vector<16x32xf32>
    %362 = arith.addf %52, %361 : vector<16x32xf32>
    %363 = vector.extract_strided_slice %0 {offsets = [6, 0], sizes = [1, 32], strides = [1, 1]} : vector<24x32xf32> to vector<1x32xf32>
    %364 = vector.extract_strided_slice %0 {offsets = [7, 0], sizes = [1, 32], strides = [1, 1]} : vector<24x32xf32> to vector<1x32xf32>
    %cst_78 = arith.constant dense<0.000000e+00> : vector<16xf32>
    %365 = vector.multi_reduction <add>, %362, %cst_78 [1] : vector<16x32xf32> to vector<16xf32>
    %366 = vector.shape_cast %365 : vector<16xf32> to vector<16x1xf32>
    %cst_79 = arith.constant 3.200000e+01 : f32
    %367 = vector.broadcast %cst_79 : f32 to vector<16x1xf32>
    %368 = arith.divf %366, %367 : vector<16x1xf32>
    %369 = vector.broadcast %368 : vector<16x1xf32> to vector<16x32xf32>
    %370 = arith.subf %362, %369 : vector<16x32xf32>
    %371 = arith.mulf %370, %370 : vector<16x32xf32>
    %cst_80 = arith.constant dense<0.000000e+00> : vector<16xf32>
    %372 = vector.multi_reduction <add>, %371, %cst_80 [1] : vector<16x32xf32> to vector<16xf32>
    %373 = vector.shape_cast %372 : vector<16xf32> to vector<16x1xf32>
    %cst_81 = arith.constant 3.200000e+01 : f32
    %374 = vector.broadcast %cst_81 : f32 to vector<16x1xf32>
    %375 = arith.divf %373, %374 : vector<16x1xf32>
    %376 = vector.broadcast %368 : vector<16x1xf32> to vector<16x32xf32>
    %377 = arith.subf %362, %376 : vector<16x32xf32>
    %cst_82 = arith.constant 9.99999974E-6 : f32
    %378 = vector.broadcast %cst_82 : f32 to vector<16x1xf32>
    %379 = arith.addf %375, %378 : vector<16x1xf32>
    %380 = math.rsqrt %379 : vector<16x1xf32>
    %381 = vector.broadcast %380 : vector<16x1xf32> to vector<16x32xf32>
    %382 = arith.mulf %377, %381 : vector<16x32xf32>
    %383 = vector.broadcast %363 : vector<1x32xf32> to vector<16x32xf32>
    %384 = arith.mulf %382, %383 : vector<16x32xf32>
    %385 = vector.broadcast %364 : vector<1x32xf32> to vector<16x32xf32>
    %386 = arith.addf %384, %385 : vector<16x32xf32>
    %387 = vector.extract_strided_slice %8 {offsets = [0, 64], sizes = [32, 64], strides = [1, 1]} : vector<32x128xf32> to vector<32x64xf32>
    %cst_83 = arith.constant dense<0.000000e+00> : vector<16x64xf32>
    %388 = tpu.matmul %386, %387, %cst_83 {dimension_numbers = #tpu.dot_dimension_numbers<[1], [0], [0], [1], [0, 0, 1, 1], [], []>} : vector<16x32xf32>, vector<32x64xf32>, vector<16x64xf32> -> vector<16x64xf32>
    %389 = vector.extract_strided_slice %9 {offsets = [0, 64], sizes = [1, 64], strides = [1, 1]} : vector<1x128xf32> to vector<1x64xf32>
    %390 = vector.broadcast %389 : vector<1x64xf32> to vector<16x64xf32>
    %391 = arith.addf %388, %390 : vector<16x64xf32>
    %392 = arith.negf %391 : vector<16x64xf32>
    %393 = math.exp %392 : vector<16x64xf32>
    %cst_84 = arith.constant 1.000000e+00 : f32
    %394 = vector.broadcast %cst_84 : f32 to vector<16x64xf32>
    %395 = arith.addf %394, %393 : vector<16x64xf32>
    %396 = arith.divf %394, %395 : vector<16x64xf32>
    %397 = arith.mulf %391, %396 : vector<16x64xf32>
    %c64 = arith.constant 64 : index
    %c0_85 = arith.constant 0 : index
    %398 = vector.load %arg3[%c64, %c0_85] : memref<400x32xf32, #tpu.memory_space<vmem>>, vector<64x32xf32>
    %cst_86 = arith.constant dense<0.000000e+00> : vector<16x32xf32>
    %399 = tpu.matmul %397, %398, %cst_86 {dimension_numbers = #tpu.dot_dimension_numbers<[1], [0], [0], [1], [0, 0, 1, 1], [], []>} : vector<16x64xf32>, vector<64x32xf32>, vector<16x32xf32> -> vector<16x32xf32>
    %400 = vector.extract_strided_slice %0 {offsets = [11, 0], sizes = [1, 32], strides = [1, 1]} : vector<24x32xf32> to vector<1x32xf32>
    %401 = vector.broadcast %400 : vector<1x32xf32> to vector<16x32xf32>
    %402 = arith.addf %399, %401 : vector<16x32xf32>
    %cst_87 = arith.constant 5.000000e-01 : f32
    %403 = vector.broadcast %cst_87 : f32 to vector<16x32xf32>
    %404 = arith.mulf %403, %402 : vector<16x32xf32>
    %405 = arith.addf %362, %404 : vector<16x32xf32>
    %406 = vector.extract_strided_slice %0 {offsets = [8, 0], sizes = [1, 32], strides = [1, 1]} : vector<24x32xf32> to vector<1x32xf32>
    %407 = vector.extract_strided_slice %0 {offsets = [9, 0], sizes = [1, 32], strides = [1, 1]} : vector<24x32xf32> to vector<1x32xf32>
    %cst_88 = arith.constant dense<0.000000e+00> : vector<16xf32>
    %408 = vector.multi_reduction <add>, %405, %cst_88 [1] : vector<16x32xf32> to vector<16xf32>
    %409 = vector.shape_cast %408 : vector<16xf32> to vector<16x1xf32>
    %cst_89 = arith.constant 3.200000e+01 : f32
    %410 = vector.broadcast %cst_89 : f32 to vector<16x1xf32>
    %411 = arith.divf %409, %410 : vector<16x1xf32>
    %412 = vector.broadcast %411 : vector<16x1xf32> to vector<16x32xf32>
    %413 = arith.subf %405, %412 : vector<16x32xf32>
    %414 = arith.mulf %413, %413 : vector<16x32xf32>
    %cst_90 = arith.constant dense<0.000000e+00> : vector<16xf32>
    %415 = vector.multi_reduction <add>, %414, %cst_90 [1] : vector<16x32xf32> to vector<16xf32>
    %416 = vector.shape_cast %415 : vector<16xf32> to vector<16x1xf32>
    %cst_91 = arith.constant 3.200000e+01 : f32
    %417 = vector.broadcast %cst_91 : f32 to vector<16x1xf32>
    %418 = arith.divf %416, %417 : vector<16x1xf32>
    %419 = vector.broadcast %411 : vector<16x1xf32> to vector<16x32xf32>
    %420 = arith.subf %405, %419 : vector<16x32xf32>
    %cst_92 = arith.constant 9.99999974E-6 : f32
    %421 = vector.broadcast %cst_92 : f32 to vector<16x1xf32>
    %422 = arith.addf %418, %421 : vector<16x1xf32>
    %423 = math.rsqrt %422 : vector<16x1xf32>
    %424 = vector.broadcast %423 : vector<16x1xf32> to vector<16x32xf32>
    %425 = arith.mulf %420, %424 : vector<16x32xf32>
    %426 = vector.broadcast %406 : vector<1x32xf32> to vector<16x32xf32>
    %427 = arith.mulf %425, %426 : vector<16x32xf32>
    %428 = vector.broadcast %407 : vector<1x32xf32> to vector<16x32xf32>
    %429 = arith.addf %427, %428 : vector<16x32xf32>
    %c0_93 = arith.constant 0 : index
    %c0_94 = arith.constant 0 : index
    %430 = vector.load %arg5[%c0_93, %c0_94] : memref<16x32xf32, #tpu.memory_space<vmem>>, vector<16x32xf32>
    tpu.vector_store %arg5[%c0_93, %c0_94], %429 {strides = array<i32>} : memref<16x32xf32, #tpu.memory_space<vmem>>, vector<16x32xf32>,
    return
  }
}

</mosaic_0001>

<bundles_post_ra>
// kernel: tpu_custom_call.1
= control target key start
LH: loop header
LB: loop body
LE: loop exit
PB: predicated region body
PF: predicated region fallthrough
CT: control target
= control target key end

     0   :  { %vm34_vm0 = vcmask 261120   ;;  %s3328_s0 = inlined_call_operand.vmem [shape: f32[16,32], index: 0, kind: input, shape index: {}]   ;;  %s3329_s1 = inlined_call_operand.vmem [shape: f32[32,32], index: 1, kind: input, shape index: {}]   ;;  %s3330_s2 = inlined_call_operand.vmem [shape: f32[24,32], index: 2, kind: input, shape index: {}]   ;;  %s3331_s3 = inlined_call_operand.vmem [shape: f32[400,32], index: 3, kind: input, shape index: {}]   ;;  %s3332_s4 = inlined_call_operand.vmem [shape: f32[80,128], index: 4, kind: input, shape index: {}]   ;;  %s3333_s5 = inlined_call_operand.hbm [shape: f32[16,32], index: 5, kind: output, shape index: {}]  }
   0x1   :  { %v2425_v0 = vld [vmem:[%s3328_s0] sm:$0xff] }
   0x2   :  { %v35_v1 = vsel %vm34_vm0, %v2425_v0, 0.0 }
   0x3   :  { %10 = vsyncpa [#allocation3], 0  ;;  %36 = vadd.xlane.f32.xlu0 %v35_v1  ;;  %v2432_v2 = vld [vmem:[%s3328_s0 + $0x8] sm:$0xff]  ;;  %v2369_v4 = vmov 32.0   ;;  %v2447_v21 = vld [vmem:[%s3332_s4 + $0x40] sm:$0xff]  ;;  %vm171_vm12 = vcmask 523264  }
   0x4   :  { %v38_v3 = vsel %vm34_vm0, %v2432_v2, 0.0  ;;  %2260 = vrcp.f32 %v2369_v4  ;;  %111 = vmatpush.msra.mxu0 %v2447_v21  ;;  %v2453_v22 = vld [vmem:[%s3332_s4 + $0x38] sm:$0xff]  ;;  %v2459_v23 = vld [vmem:[%s3332_s4 + $0x30] sm:$0xff]  ;;  %v2465_v24 = vld [vmem:[%s3332_s4 + $0x28] sm:$0xff]  ;;  %s2370_s25 = smov 120   ;;  %s2371_s26 = smov 104  }
   0x5   :  { %v2248_v25 = vpack.i.bf16 %v2453_v22, %v2447_v21  ;;  %v2253_v26 = vpack.i.bf16 %v2465_v24, %v2459_v23  ;;  %v2477_v38 = vld [vmem:[%s3331_s3 + $0x178] sm:$0xff]  ;;  %v168_v57 = vld [vmem:[%s3331_s3 + $0x30] sm:$0xff]  ;;  %v167_v58 = vld [vmem:[%s3331_s3 + $0x28] sm:$0xff]  ;;  %s2373_s27 = smov 96   ;;  %s2374_s28 = smov 112  }
   0x6   :  { %112 = vmatpush.msra.mxu0 %v2453_v22  ;;  %v86_v42 = vperm.slane %v2477_v38, 0  ;;  %v89_v46 = vperm.slane %v2477_v38, 1  ;;  %v169_v56 = vld [vmem:[%s3331_s3 + $0x38] sm:$0xff]  ;;  %v166_v59 = vld [vmem:[%s3331_s3 + $0x20] sm:$0xff]  ;;  %v164_v61 = vld [vmem:[%s3331_s3 + $0x10] sm:$0xff]  ;;  %s2375_s29 = smov 2  }
   0x7   :  { %186 = vmatpush.msra.mxu1 %v169_v56  ;;  %v165_v60 = vld [vmem:[%s3331_s3 + $0x18] sm:$0xff]  ;;  %v2258_v62 = vld [vmem:[%s3332_s4 + $0x48] ss:$0 sm:$0xff]  ;;  %v162_v1 = vld [vmem:[%s3331_s3] sm:$0xff]  ;;  %s2376_s30 = smov 1   ;;  %s2377_s6 = smov 3  }
   0x8   :  { %113 = vmatpush.msra.mxu0 %v2459_v23  ;;  %v163_v63 = vld [vmem:[%s3331_s3 + $0x8] sm:$0xff]  ;;  %s2378_s7 = smov 5   ;;  %s2379_s8 = smov 4  }
   0x9   :  { %187 = vmatpush.msra.mxu1 %v168_v57  ;;  %s2380_s9 = smov 6   ;;  %s2381_s10 = smov 7   ;;  %v2340_v23 = vld [vmem:[%s3332_s4 + $0x48] ss:$0 sm:$0xff] }
   0xa   :  { %v2261_v5 = vpop.eup %2260  ;;  %114 = vmatpush.msra.mxu0 %v2465_v24  ;;  %s2382_s11 = smov 121   ;;  %s2383_s14 = smov 64  }
   0xb   :  { %39 = vadd.xlane.f32.xlu0 %v38_v3  ;;  %v42_v6 = vmul.f32 32.0, %v2261_v5  ;;  %vm46_vm1 = vweird.f32 %v2261_v5  ;;  %188 = vmatpush.msra.mxu1 %v167_v58 }
   0xd   :  { %v43_v7 = vsub.f32 1.0, %v42_v6  ;;  %189 = vmatpush.msra.mxu1 %v166_v59 }
   0xf   :  { %v44_v8 = vmul.f32 %v2261_v5, %v43_v7  ;;  %190 = vmatpush.msra.mxu1 %v165_v60 }
  0x11   :  { %v45_v9 = vadd.f32 %v2261_v5, %v44_v8  ;;  %191 = vmatpush.msra.mxu1 %v164_v61 }
  0x13   :  { %v2436_v10 = vsel %vm46_vm1, %v2261_v5, %v45_v9  ;;  %192 = vmatpush.msra.mxu1 %v163_v63  ;;  %v258_v63 = vld [vmem:[%s3332_s4 + $0x18] sm:$0xff] }
  0x14   :  { %279 = vmatpush.msra.mxu2 %v258_v63 }
  0x15   :  { %193 = vmatpush.msra.mxu1 %v162_v1  ;;  %v257_v1 = vld [vmem:[%s3332_s4 + $0x10] sm:$0xff] }
  0x16   :  { %280 = vmatpush.msra.mxu2 %v257_v1 }
  0x76   :  { %v37_v11 = vpop.xlane.xlu0 %36 }
  0x77   :  { %v48_v12 = vmul.f32 %v2436_v10, %v37_v11 }
  0x79   :  { %v50_v13 = vsub.f32 %v2425_v0, %v48_v12 }
  0x7b   :  { %v52_v14 = vmul.f32 %v50_v13, %v50_v13 }
  0x7d   :  { %v54_v15 = vsel %vm34_vm0, %v52_v14, 0.0 }
  0x7e   :  { %55 = vadd.xlane.f32.xlu1 %v54_v15  ;;  %v40_v16 = vpop.xlane.xlu0 %39 }
  0x7f   :  { %v49_v17 = vmul.f32 %v2436_v10, %v40_v16 }
  0x81   :  { %v51_v18 = vsub.f32 %v2432_v2, %v49_v17 }
  0x83   :  { %v53_v19 = vmul.f32 %v51_v18, %v51_v18 }
  0x85   :  { %v57_v20 = vsel %vm34_vm0, %v53_v19, 0.0 }
  0x86   :  { %58 = vadd.xlane.f32.xlu1 %v57_v20 }
  0xf1   :  { %v56_v27 = vpop.xlane.xlu1 %55 }
  0xf2   :  { %v60_v28 = vmul.f32 %v56_v27, %v2436_v10 }
  0xf4   :  { %v62_v29 = vadd.f32 1e-05, %v60_v28 }
  0xf6   :  { %2262 = vrsqrt.f32 %v62_v29  ;;  %vm70_vm3 = vweird.f32 %v62_v29 }
  0xf9   :  { %v59_v30 = vpop.xlane.xlu1 %58 }
  0xfa   :  { %v61_v31 = vmul.f32 %v59_v30, %v2436_v10 }
  0xfc   :  { %v2263_v32 = vpop.eup %2262  ;;  %v63_v33 = vadd.f32 1e-05, %v61_v31 }
  0xfd   :  { %v65_v34 = vmul.f32 %v2263_v32, %v62_v29  ;;  %vm71_vm2 = vweird.f32 %v2263_v32 }
  0xfe   :  { %2264 = vrsqrt.f32 %v63_v33  ;;  %vm72_vm4 = vmor %vm70_vm3, %vm71_vm2  ;;  %vm80_vm6 = vweird.f32 %v63_v33 }
  0xff   :  { %v66_v35 = vmul.f32 %v2263_v32, %v65_v34 }
 0x101   :  { %v67_v36 = vmul.f32 0.5, %v66_v35 }
 0x103   :  { %v68_v37 = vsub.f32 1.5, %v67_v36 }
 0x104   :  { %v2265_v39 = vpop.eup %2264 }
 0x105   :  { %v69_v40 = vmul.f32 %v2263_v32, %v68_v37  ;;  %v75_v41 = vmul.f32 %v2265_v39, %v63_v33  ;;  %vm81_vm5 = vweird.f32 %v2265_v39 }
 0x106   :  { %vm82_vm7 = vmor %vm80_vm6, %vm81_vm5 }
 0x107   :  { %v73_v43 = vsel %vm72_vm4, %v2263_v32, %v69_v40  ;;  %v76_v44 = vmul.f32 %v2265_v39, %v75_v41 }
 0x108   :  { %v84_v45 = vmul.f32 %v73_v43, %v50_v13  ;;  %v22_v43 = vld [vmem:[%s3331_s3 + $0x180] sm:$0xff] }
 0x109   :  { %v77_v47 = vmul.f32 0.5, %v76_v44  ;;  %v170_v44 = vperm.slane %v22_v43, 2 }
 0x10a   :  { %v87_v48 = vmul.f32 %v86_v42, %v84_v45 }
 0x10b   :  { %v78_v49 = vsub.f32 1.5, %v77_v47 }
 0x10c   :  { %v90_v50 = vadd.f32 %v89_v46, %v87_v48 }
 0x10d   :  { %v79_v51 = vmul.f32 %v2265_v39, %v78_v49 }
 0x10e   :  { %2126 = vmatmul.msk.f32.vlgmr.msra.gmra.mxu0 %vm34_vm0, %v90_v50 }
 0x10f   :  { %v83_v52 = vsel %vm82_vm7, %v2265_v39, %v79_v51 }
 0x110   :  { %v85_v53 = vmul.f32 %v83_v52, %v51_v18 }
 0x112   :  { %v88_v54 = vmul.f32 %v86_v42, %v85_v53 }
 0x114   :  { %v91_v55 = vadd.f32 %v89_v46, %v88_v54 }
 0x116   :  { %2127 = vmatmul.msk.f32.gmra.mxu0 %vm34_vm0, %v91_v55 }
 0x18b   :  { %v116_v3 = vpop.f32.mrf.mxu0 }
 0x18c   :  { %v117_v4 = vadd.f32 %v2258_v62, %v116_v3  ;;  %v256_v3 = vld [vmem:[%s3332_s4 + $0x8] sm:$0xff] }
 0x18d   :  { %281 = vmatpush.msra.mxu2 %v256_v3 }
 0x18e   :  { %v2128_v5 = vmul.f32 -1.442695, %v117_v4 }
 0x190   :  { %2266 = vpow2.f32 %v2128_v5 }
 0x193   :  { %v119_v6 = vpop.f32.mrf.mxu0 }
 0x194   :  { %v120_v7 = vadd.f32 %v2258_v62, %v119_v6 }
 0x196   :  { %v2267_v8 = vpop.eup %2266  ;;  %v2129_v9 = vmul.f32 -1.442695, %v120_v7 }
 0x197   :  { %v128_v11 = vadd.f32 1.0, %v2267_v8  ;;  %v297_v8 = vld [vmem:[%s3331_s3 + $0x138] sm:$0xff] }
 0x198   :  { %2268 = vpow2.f32 %v2129_v9  ;;  %v296_v9 = vld [vmem:[%s3331_s3 + $0x130] sm:$0xff]  ;;  %322 = vmatpush.msra.mxu3 %v297_v8 }
 0x199   :  { %2270 = vrcp.f32 %v128_v11  ;;  %v141_v17 = vand.u32 2147483648, %v128_v11  ;;  %v139_v19 = vand.u32 2147483647, %v128_v11  ;;  %vm135_vm9 = vweird.f32 %v128_v11 }
 0x19a   :  { %323 = vmatpush.msra.mxu3 %v296_v9 }
 0x19b   :  { %v142_v28 = vor.u32 1.1754944e-38, %v141_v17  ;;  %vm140_vm11 = vcmp.eq.f32.partialorder %v139_v19, 8.507059e+37 }
 0x19e   :  { %v2269_v12 = vpop.eup %2268 }
 0x19f   :  { %v2271_v13 = vpop.eup %2270  ;;  %v129_v14 = vadd.f32 1.0, %v2269_v12 }
 0x1a0   :  { %v131_v15 = vmul.f32 %v2271_v13, %v128_v11  ;;  %vm136_vm8 = vweird.f32 %v2271_v13  ;;  %v295_v11 = vld [vmem:[%s3331_s3 + $0x128] sm:$0xff] }
 0x1a1   :  { %2272 = vrcp.f32 %v129_v14  ;;  %vm137_vm10 = vmor %vm135_vm9, %vm136_vm8  ;;  %v156_v34 = vand.u32 2147483648, %v129_v14  ;;  %v154_v36 = vand.u32 2147483647, %v129_v14  ;;  %vm150_vm14 = vweird.f32 %v129_v14  ;;  %324 = vmatpush.msra.mxu3 %v295_v11 }
 0x1a2   :  { %v132_v16 = vsub.f32 1.0, %v131_v15  ;;  %v290_v15 = vld [vmem:[%s3329_s1] sm:$0xff]  ;;  %vm383_vm8 = vcmask 64512   ;;  %vm782_vm9 = vcmask 1040384  }
 0x1a3   :  { %v157_v39 = vor.u32 1.1754944e-38, %v156_v34  ;;  %vm155_vm1 = vcmp.eq.f32.partialorder %v154_v36, 8.507059e+37  ;;  %v252_v36 = vperm.slane %v2477_v38, 3 }
 0x1a4   :  { %v133_v18 = vmul.f32 %v2271_v13, %v132_v16 }
 0x1a6   :  { %v134_v20 = vadd.f32 %v2271_v13, %v133_v18 }
 0x1a7   :  { %v2273_v27 = vpop.eup %2272 }
 0x1a8   :  { %v138_v29 = vsel %vm137_vm10, %v2271_v13, %v134_v20  ;;  %v146_v30 = vmul.f32 %v2273_v27, %v129_v14  ;;  %vm151_vm13 = vweird.f32 %v2273_v27  ;;  %v294_v14 = vld [vmem:[%s3331_s3 + $0x120] sm:$0xff]  ;;  %vm791_vm10 = vcmask 1041408  }
 0x1a9   :  { %v143_v31 = vsel %vm140_vm11, %v142_v28, %v138_v29  ;;  %vm152_vm15 = vmor %vm150_vm14, %vm151_vm13  ;;  %325 = vmatpush.msra.mxu3 %v294_v14  ;;  %v291_v28 = vld [vmem:[%s3329_s1 + $0x8] sm:$0xff]  ;;  %vm800_vm11 = vcmask 1042432   ;;  %vm809_vm13 = vcmask 1043456   ;;  %vm818_vm14 = vcmask 1044480  }
 0x1aa   :  { %v160_v32 = vmul.f32 %v143_v31, %v117_v4  ;;  %v147_v33 = vsub.f32 1.0, %v146_v30  ;;  %v255_v4 = vld [vmem:[%s3332_s4] sm:$0xff]  ;;  %2134 = vmatmul.msk.f32.vlgmr.msra.gmra.mxu3 %vm34_vm0, %v290_v15 }
 0x1ab   :  { %282 = vmatpush.msra.mxu2 %v255_v4 }
 0x1ac   :  { %v148_v35 = vmul.f32 %v2273_v27, %v147_v33  ;;  %2130 = vmatmul.msk.f32.vlgmr.msra.gmra.mxu1 %vm171_vm12, %v160_v32  ;;  %v249_v32 = vperm.slane %v2477_v38, 2 }
 0x1ae   :  { %v149_v37 = vadd.f32 %v2273_v27, %v148_v35 }
 0x1b0   :  { %v153_v40 = vsel %vm152_vm15, %v2273_v27, %v149_v37  ;;  %vm827_vm15 = vcmask 1045504  }
 0x1b1   :  { %v158_v41 = vsel %vm155_vm1, %v157_v39, %v153_v40  ;;  %vm836_vm1 = vcmask 1046528  }
 0x1b2   :  { %v161_v42 = vmul.f32 %v158_v41, %v120_v7  ;;  %2135 = vmatmul.msk.f32.gmra.mxu3 %vm34_vm0, %v291_v28  ;;  %v292_v41 = vld [vmem:[%s3329_s1 + $0x10] sm:$0xff] }
 0x1b4   :  { %2131 = vmatmul.msk.f32.gmra.mxu1 %vm171_vm12, %v161_v42 }
 0x1ba   :  { %2136 = vmatmul.msk.f32.gmra.mxu3 %vm34_vm0, %v292_v41 }
 0x229   :  { %v195_v45 = vpop.f32.mrf.mxu1 }
 0x22a   :  { %v196_v46 = vadd.f32 %v195_v45, %v170_v44 }
 0x22c   :  { %v201_v47 = vmul.f32 0.5, %v196_v46  ;;  %v293_v46 = vld [vmem:[%s3329_s1 + $0x18] sm:$0xff]  ;;  %s2372_s1 = smov 32  }
 0x22d   :  { %2137 = vmatmul.msk.f32.gmra.mxu3 %vm34_vm0, %v293_v46 }
 0x22e   :  { %v2516_v48 = vadd.f32 %v201_v47, %v2425_v0 }
 0x230   :  { %v205_v49 = vsel %vm34_vm0, %v2516_v48, 0.0 }
 0x231   :  { %v198_v50 = vpop.f32.mrf.mxu1  ;;  %206 = vadd.xlane.f32.xlu2 %v205_v49  ;;  %v327_v49 = vpop.f32.mrf.mxu3 }
 0x232   :  { %v199_v51 = vadd.f32 %v198_v50, %v170_v44  ;;  %v2259_v50 = vld [vmem:[%s3332_s4 + $0x20] ss:$0 sm:$0xff] }
 0x234   :  { %v202_v52 = vmul.f32 0.5, %v199_v51 }
 0x236   :  { %v2521_v53 = vadd.f32 %v202_v52, %v2432_v2 }
 0x238   :  { %v208_v54 = vsel %vm34_vm0, %v2521_v53, 0.0 }
 0x239   :  { %209 = vadd.xlane.f32.xlu2 %v208_v54  ;;  %v330_v51 = vpop.f32.mrf.mxu3 }
 0x23a   :  { %2138 = vmatpush.xpose.msk.msrb.mxu0 %vm383_vm8, %v330_v51 }
 0x23e   :  { %2139 = vmatpush.xpose.msk.msrb.mxu0 %vm383_vm8, %v327_v49 }
 0x2a4   :  { %v207_v55 = vpop.xlane.xlu2 %206 }
 0x2a5   :  { %v211_v56 = vmul.f32 %v207_v55, %v2436_v10  ;;  %v333_v55 = vpop.f32.mrf.mxu3 }
 0x2a7   :  { %v213_v0 = vsub.f32 %v2516_v48, %v211_v56 }
 0x2a9   :  { %v215_v57 = vmul.f32 %v213_v0, %v213_v0 }
 0x2ab   :  { %v217_v58 = vsel %vm34_vm0, %v215_v57, 0.0 }
 0x2ac   :  { %218 = vadd.xlane.f32.xlu0 %v217_v58  ;;  %v210_v59 = vpop.xlane.xlu2 %209 }
 0x2ad   :  { %v212_v60 = vmul.f32 %v210_v59, %v2436_v10 }
 0x2af   :  { %v214_v61 = vsub.f32 %v2521_v53, %v212_v60 }
 0x2b0   :  { %v2596_v57 = vpop.f32.mrf.mxu3 }
 0x2b1   :  { %v216_v2 = vmul.f32 %v214_v61, %v214_v61  ;;  %2141 = vmatpush.xpose.msk.msrb.mxu2 %vm383_vm8, %v2596_v57 }
 0x2b3   :  { %v220_v62 = vsel %vm34_vm0, %v216_v2, 0.0 }
 0x2b4   :  { %221 = vadd.xlane.f32.xlu1 %v220_v62 }
 0x2b5   :  { %2142 = vmatpush.xpose.msk.msrb.mxu2 %vm383_vm8, %v333_v55 }
 0x31f   :  { %v219_v5 = vpop.xlane.xlu0 %218 }
 0x320   :  { %v223_v6 = vmul.f32 %v219_v5, %v2436_v10 }
 0x322   :  { %v225_v7 = vadd.f32 1e-05, %v223_v6 }
 0x324   :  { %2274 = vrsqrt.f32 %v225_v7  ;;  %vm233_vm3 = vweird.f32 %v225_v7 }
 0x327   :  { %v222_v12 = vpop.xlane.xlu1 %221 }
 0x328   :  { %v224_v13 = vmul.f32 %v222_v12, %v2436_v10 }
 0x32a   :  { %v2275_v16 = vpop.eup %2274  ;;  %v226_v17 = vadd.f32 1e-05, %v224_v13 }
 0x32b   :  { %v228_v18 = vmul.f32 %v2275_v16, %v225_v7  ;;  %vm234_vm2 = vweird.f32 %v2275_v16 }
 0x32c   :  { %2276 = vrsqrt.f32 %v226_v17  ;;  %vm235_vm4 = vmor %vm233_vm3, %vm234_vm2  ;;  %vm243_vm6 = vweird.f32 %v226_v17 }
 0x32d   :  { %v229_v19 = vmul.f32 %v2275_v16, %v228_v18 }
 0x32f   :  { %v230_v20 = vmul.f32 0.5, %v229_v19 }
 0x331   :  { %v231_v27 = vsub.f32 1.5, %v230_v20 }
 0x332   :  { %v2277_v29 = vpop.eup %2276 }
 0x333   :  { %v232_v30 = vmul.f32 %v2275_v16, %v231_v27  ;;  %v238_v31 = vmul.f32 %v2277_v29, %v226_v17  ;;  %vm244_vm5 = vweird.f32 %v2277_v29 }
 0x334   :  { %vm245_vm7 = vmor %vm243_vm6, %vm244_vm5 }
 0x335   :  { %v239_v33 = vmul.f32 %v2277_v29, %v238_v31  ;;  %v236_v34 = vsel %vm235_vm4, %v2275_v16, %v232_v30 }
 0x336   :  { %v2566_v35 = vmul.f32 %v236_v34, %v213_v0 }
 0x337   :  { %v240_v37 = vmul.f32 0.5, %v239_v33 }
 0x338   :  { %v250_v39 = vmul.f32 %v249_v32, %v2566_v35 }
 0x339   :  { %v241_v40 = vsub.f32 1.5, %v240_v37 }
 0x33a   :  { %v253_v42 = vadd.f32 %v252_v36, %v250_v39 }
 0x33b   :  { %v242_v43 = vmul.f32 %v2277_v29, %v241_v40 }
 0x33c   :  { %2132 = vmatmul.msk.f32.vlgmr.msra.gmra.mxu2 %vm34_vm0, %v253_v42 }
 0x33d   :  { %v246_v44 = vsel %vm245_vm7, %v2277_v29, %v242_v43 }
 0x33e   :  { %v2575_v45 = vmul.f32 %v246_v44, %v214_v61 }
 0x340   :  { %v251_v38 = vmul.f32 %v249_v32, %v2575_v45 }
 0x342   :  { %v254_v47 = vadd.f32 %v252_v36, %v251_v38 }
 0x344   :  { %2133 = vmatmul.msk.f32.gmra.mxu2 %vm34_vm0, %v254_v47 }
 0x3bf   :  { %v284_v52 = vpop.f32.mrf.mxu2 }
 0x3c0   :  { %v2586_v54 = vadd.f32 %v2259_v50, %v284_v52 }
 0x3c2   :  { %341 = vrot.lane.b32.xlu2 %v2586_v54, %s2370_s25  ;;  %349 = vrot.lane.b32.xlu1 %v2586_v54, %s2371_s26 }
 0x3c7   :  { %v287_v56 = vpop.f32.mrf.mxu2 }
 0x3c8   :  { %v2591_v0 = vadd.f32 %v2259_v50, %v287_v56 }
 0x3ca   :  { %381 = vrot.lane.b32.xlu2 %v2586_v54, %s2372_s1  ;;  %343 = vrot.lane.b32.xlu0 %v2591_v0, %s2370_s25 }
 0x3cb   :  { %357 = vrot.lane.b32.xlu1 %v327_v49, %s2370_s25 }
 0x3d2   :  { %359 = vrot.lane.b32.xlu0 %v330_v51, %s2370_s25  ;;  %363 = vrot.lane.b32.xlu2 %v2596_v57, %s2370_s25 }
 0x3da   :  { %361 = vrot.lane.b32.xlu0 %v333_v55, %s2370_s25  ;;  %s2114_s25 = sshll.u32 %s3333_s5, 4  ;;  %s2115_s25 = int_to_ptr.hbm [resolvable:$true] %s2114_s25 }
 0x3e2   :  { %375 = vrot.lane.b32.xlu0 %v330_v51, %s2371_s26 }
 0x41c   :  { %v2605_v58 = vpop.permute.xlu2 %341 }
 0x41d   :  { %905 = vrot.lane.b32.xlu0 %v2605_v58, %s2373_s27  ;;  %438 = vrot.lane.b32.xlu2 %v2605_v58, %s2372_s1 }
 0x424   :  { %v382_v59 = vpop.permute.xlu2 %381 }
 0x425   :  { %351 = vrot.lane.b32.xlu0 %v2591_v0, %s2371_s26  ;;  %2140 = vmatmul.msk.f32.vlgmr.msrb.gmra.mxu0 %vm383_vm8, %v382_v59 }
 0x426   :  { %373 = vrot.lane.b32.xlu2 %v327_v49, %s2371_s26 }
 0x42c   :  { %v364_v61 = vpop.permute.xlu2 %363 }
 0x42d   :  { %367 = vrot.lane.b32.xlu0 %v330_v51, %s2374_s28  ;;  %2147 = vmatpush.xpose.msk.msrb.mxu1 %vm383_vm8, %v364_v61 }
 0x434   :  { %v2616_v60 = vpop.permute.xlu1 %349 }
 0x435   :  { %1025 = vrot.lane.b32.xlu2 %v2616_v60, %s2373_s27  ;;  %379 = vrot.lane.b32.xlu0 %v2596_v57, %s2371_s26 }
 0x43c   :  { %v2623_v2 = vpop.permute.xlu0 %343 }
 0x43d   :  { %466 = vrot.lane.b32.xlu1 %v2623_v2, %s2372_s1  ;;  %347 = vrot.lane.b32.xlu2 %v2591_v0, %s2374_s28  ;;  %v358_v63 = vpop.permute.xlu1 %357 }
 0x444   :  { %v360_v62 = vpop.permute.xlu0 %359 }
 0x445   :  { %550 = vrot.lane.b32.xlu1 %v2616_v60, %s2372_s1  ;;  %365 = vrot.lane.b32.xlu2 %v327_v49, %s2374_s28 }
 0x446   :  { %2144 = vmatpush.xpose.msk.msra.mxu0 %vm383_vm8, %v360_v62 }
 0x44a   :  { %2145 = vmatpush.xpose.msk.msra.mxu0 %vm383_vm8, %v358_v63 }
 0x44c   :  { %v362_v1 = vpop.permute.xlu0 %361 }
 0x44d   :  { %345 = vrot.lane.b32.xlu1 %v2586_v54, %s2374_s28  ;;  %377 = vrot.lane.b32.xlu2 %v333_v55, %s2371_s26  ;;  %s2391_s26 = smov 128  }
 0x44e   :  { %2148 = vmatpush.xpose.msk.msrb.mxu1 %vm383_vm8, %v362_v1 }
 0x454   :  { %v376_v3 = vpop.permute.xlu0 %375 }
 0x455   :  { %410 = vrot.lane.b32.xlu1 %v2591_v0, %s2372_s1  ;;  %369 = vrot.lane.b32.xlu2 %v333_v55, %s2374_s28 }
 0x456   :  { %2156 = vmatpush.xpose.msk.msra.mxu1 %vm383_vm8, %v376_v3 }
 0x477   :  { %v439_v4 = vpop.permute.xlu2 %438 }
 0x478   :  { %2146 = vmatmul.msk.f32.vlgmr.msra.gmra.mxu0 %vm383_vm8, %v439_v4 }
 0x480   :  { %v374_v5 = vpop.permute.xlu2 %373 }
 0x481   :  { %2157 = vmatpush.xpose.msk.msra.mxu1 %vm383_vm8, %v374_v5 }
 0x48f   :  { %v906_v6 = vpop.permute.xlu0 %905  ;;  %v1026_v7 = vpop.permute.xlu2 %1025 }
 0x497   :  { %v2644_v8 = vpop.permute.xlu0 %351  ;;  %v2648_v9 = vpop.permute.xlu2 %347 }
 0x498   :  { %578 = vrot.lane.b32.xlu0 %v2644_v8, %s2372_s1 }
 0x49f   :  { %v368_v11 = vpop.permute.xlu0 %367  ;;  %v366_v12 = vpop.permute.xlu2 %365 }
 0x4a0   :  { %2150 = vmatpush.xpose.msk.msra.mxu2 %vm383_vm8, %v368_v11 }
 0x4a2   :  { %v2675_v19 = vpop.f32.mrf.mxu0 }
 0x4a4   :  { %2151 = vmatpush.xpose.msk.msra.mxu2 %vm383_vm8, %v366_v12 }
 0x4a7   :  { %v380_v16 = vpop.permute.xlu0 %379  ;;  %v378_v18 = vpop.permute.xlu2 %377 }
 0x4af   :  { %v467_v13 = vpop.permute.xlu1 %466  ;;  %v370_v32 = vpop.permute.xlu2 %369 }
 0x4b0   :  { %2149 = vmatmul.msk.f32.vlgmr.msrb.gmra.mxu1 %vm383_vm8, %v467_v13 }
 0x4b1   :  { %2166 = vmatpush.xpose.msk.msrb.mxu1 %vm383_vm8, %v906_v6 }
 0x4b7   :  { %v551_v14 = vpop.permute.xlu1 %550 }
 0x4b8   :  { %2158 = vmatmul.msk.f32.vlgmr.msra.gmra.mxu1 %vm383_vm8, %v551_v14 }
 0x4b9   :  { %2174 = vmatpush.xpose.msk.msra.mxu1 %vm383_vm8, %v1026_v7 }
 0x4bf   :  { %v2656_v15 = vpop.permute.xlu1 %345 }
 0x4c0   :  { %494 = vrot.lane.b32.xlu1 %v2656_v15, %s2372_s1  ;;  %965 = vrot.lane.b32.xlu2 %v2656_v15, %s2373_s27 }
 0x4c1   :  { %2167 = vmatmul.msk.f32.vlgmr.msrb.gmra.mxu1 %vm383_vm8, %v2605_v58 }
 0x4c7   :  { %v411_v17 = vpop.permute.xlu1 %410 }
 0x4c8   :  { %371 = vrot.lane.b32.xlu1 %v2596_v57, %s2374_s28  ;;  %2143 = vmatmul.msk.f32.vlgmr.msrb.gmra.mxu2 %vm383_vm8, %v411_v17 }
 0x4c9   :  { %2159 = vmatpush.xpose.msk.msrb.mxu2 %vm383_vm8, %v380_v16  ;;  %2175 = vmatmul.msk.f32.vlgmr.msra.gmra.mxu1 %vm383_vm8, %v2616_v60 }
 0x4cd   :  { %2160 = vmatpush.xpose.msk.msrb.mxu2 %vm383_vm8, %v378_v18 }
 0x4d0   :  { %845 = vrot.lane.b32.xlu1 %v2586_v54, %s2373_s27 }
 0x4d8   :  { %522 = vrot.lane.b32.xlu1 %v2648_v9, %s2372_s1 }
 0x4f5   :  { %v463_v20 = vpop.f32.mrf.mxu0 }
 0x4f6   :  { %642 = vrot.lane.b32.xlu2 %v463_v20, %s2375_s29  ;;  %618 = vrot.lane.b32.xlu0 %v463_v20, %s2376_s30 }
 0x4f7   :  { %666 = vrot.lane.b32.xlu1 %v463_v20, %s2377_s6 }
 0x4fe   :  { %714 = vrot.lane.b32.xlu2 %v463_v20, %s2378_s7  ;;  %690 = vrot.lane.b32.xlu0 %v463_v20, %s2379_s8 }
 0x4ff   :  { %738 = vrot.lane.b32.xlu1 %v463_v20, %s2380_s9 }
 0x506   :  { %762 = vrot.lane.b32.xlu0 %v463_v20, %s2381_s10 }
 0x50a   :  { %v579_v30 = vpop.permute.xlu0 %578 }
 0x51a   :  { %v966_v34 = vpop.permute.xlu2 %965 }
 0x52d   :  { %v2684_v27 = vpop.f32.mrf.mxu1 }
 0x532   :  { %v495_v28 = vpop.permute.xlu1 %494 }
 0x533   :  { %2152 = vmatmul.msk.f32.vlgmr.msra.gmra.mxu2 %vm383_vm8, %v495_v28 }
 0x535   :  { %v2687_v29 = vpop.f32.mrf.mxu1 }
 0x536   :  { %674 = vrot.lane.b32.xlu0 %v2687_v29, %s2377_s6  ;;  %626 = vrot.lane.b32.xlu2 %v2687_v29, %s2376_s30 }
 0x537   :  { %650 = vrot.lane.b32.xlu1 %v2687_v29, %s2375_s29 }
 0x53a   :  { %v372_v31 = vpop.permute.xlu1 %371 }
 0x53b   :  { %2153 = vmatpush.xpose.msk.msrb.mxu0 %vm383_vm8, %v372_v31  ;;  %2161 = vmatmul.msk.f32.vlgmr.msrb.gmra.mxu2 %vm383_vm8, %v579_v30 }
 0x53e   :  { %698 = vrot.lane.b32.xlu2 %v2687_v29, %s2379_s8  ;;  %995 = vrot.lane.b32.xlu0 %v2648_v9, %s2373_s27 }
 0x53f   :  { %722 = vrot.lane.b32.xlu1 %v2687_v29, %s2378_s7  ;;  %2154 = vmatpush.xpose.msk.msrb.mxu0 %vm383_vm8, %v370_v32 }
 0x542   :  { %v846_v33 = vpop.permute.xlu1 %845 }
 0x543   :  { %2162 = vmatpush.xpose.msk.msrb.mxu3 %vm383_vm8, %v846_v33 }
 0x546   :  { %2163 = vmatmul.msk.f32.vlgmr.msrb.gmra.mxu3 %vm383_vm8, %v2586_v54  ;;  %875 = vrot.lane.b32.xlu2 %v2591_v0, %s2373_s27 }
 0x547   :  { %2170 = vmatpush.xpose.msk.msra.mxu3 %vm383_vm8, %v966_v34  ;;  %614 = vrot.lane.b32.xlu0 %v2675_v19, %s2376_s30 }
 0x548   :  { %935 = vrot.lane.b32.xlu1 %v2623_v2, %s2373_s27 }
 0x54a   :  { %v523_v36 = vpop.permute.xlu1 %522 }
 0x54b   :  { %2155 = vmatmul.msk.f32.vlgmr.msrb.gmra.mxu0 %vm383_vm8, %v523_v36  ;;  %v2723_v37 = vpop.f32.mrf.mxu2 }
 0x54e   :  { %734 = vrot.lane.b32.xlu2 %v2675_v19, %s2380_s9  ;;  %2171 = vmatmul.msk.f32.vlgmr.msra.gmra.mxu3 %vm383_vm8, %v2656_v15 }
 0x54f   :  { %638 = vrot.lane.b32.xlu0 %v2675_v19, %s2375_s29 }
 0x550   :  { %1055 = vrot.lane.b32.xlu1 %v2644_v8, %s2373_s27  ;;  %v643_v39 = vpop.permute.xlu2 %642 }
 0x556   :  { %640 = vrot.lane.b32.xlu2 %v2723_v37, %s2375_s29 }
 0x557   :  { %662 = vrot.lane.b32.xlu0 %v2675_v19, %s2377_s6 }
 0x558   :  { %758 = vrot.lane.b32.xlu1 %v2675_v19, %s2381_s10  ;;  %v715_v46 = vpop.permute.xlu2 %714 }
 0x55e   :  { %664 = vrot.lane.b32.xlu2 %v2723_v37, %s2377_s6 }
 0x55f   :  { %686 = vrot.lane.b32.xlu0 %v2675_v19, %s2379_s8 }
 0x560   :  { %644 = vrot.lane.b32.xlu1 %v2684_v27, %s2375_s29 }
 0x566   :  { %770 = vrot.lane.b32.xlu2 %v2687_v29, %s2381_s10 }
 0x567   :  { %710 = vrot.lane.b32.xlu0 %v2675_v19, %s2378_s7 }
 0x568   :  { %668 = vrot.lane.b32.xlu1 %v2684_v27, %s2377_s6  ;;  %v619_v40 = vpop.permute.xlu0 %618 }
 0x569   :  { %v785_v41 = vsel %vm782_vm9, %v463_v20, %v619_v40  ;;  %v667_v43 = vpop.permute.xlu1 %666 }
 0x56a   :  { %v794_v42 = vsel %vm791_vm10, %v785_v41, %v643_v39 }
 0x56b   :  { %v803_v44 = vsel %vm800_vm11, %v794_v42, %v667_v43 }
 0x56e   :  { %688 = vrot.lane.b32.xlu2 %v2723_v37, %s2379_s8 }
 0x56f   :  { %616 = vrot.lane.b32.xlu0 %v2723_v37, %s2376_s30 }
 0x570   :  { %692 = vrot.lane.b32.xlu1 %v2684_v27, %s2379_s8  ;;  %v691_v38 = vpop.permute.xlu0 %690 }
 0x571   :  { %v812_v47 = vsel %vm809_vm13, %v803_v44, %v691_v38  ;;  %v739_v56 = vpop.permute.xlu1 %738 }
 0x572   :  { %v821_v49 = vsel %vm818_vm14, %v812_v47, %v715_v46 }
 0x573   :  { %v830_v20 = vsel %vm827_vm15, %v821_v49, %v739_v56 }
 0x576   :  { %712 = vrot.lane.b32.xlu2 %v2723_v37, %s2378_s7 }
 0x577   :  { %746 = vrot.lane.b32.xlu0 %v2687_v29, %s2380_s9 }
 0x578   :  { %716 = vrot.lane.b32.xlu1 %v2684_v27, %s2378_s7  ;;  %v763_v52 = vpop.permute.xlu0 %762 }
 0x579   :  { %v839_v28 = vsel %vm836_vm1, %v830_v20, %v763_v52 }
 0x57e   :  { %736 = vrot.lane.b32.xlu2 %v2723_v37, %s2380_s9 }
 0x586   :  { %740 = vrot.lane.b32.xlu2 %v2684_v27, %s2380_s9 }
 0x590   :  { %v627_v50 = vpop.permute.xlu2 %626 }
 0x591   :  { %v789_v59 = vsel %vm782_vm9, %v2687_v29, %v627_v50 }
 0x598   :  { %v699_v51 = vpop.permute.xlu2 %698 }
 0x5a0   :  { %v876_v55 = vpop.permute.xlu2 %875 }
 0x5a1   :  { %2164 = vmatpush.xpose.msk.msra.mxu0 %vm383_vm8, %v876_v55 }
 0x5a4   :  { %2165 = vmatmul.msk.f32.vlgmr.msra.gmra.mxu0 %vm383_vm8, %v2591_v0 }
 0x5a8   :  { %v675_v57 = vpop.permute.xlu0 %674 }
 0x5a9   :  { %v651_v61 = vpop.permute.xlu1 %650 }
 0x5aa   :  { %v798_v62 = vsel %vm791_vm10, %v789_v59, %v651_v61 }
 0x5ab   :  { %v807_v63 = vsel %vm800_vm11, %v798_v62, %v675_v57 }
 0x5ac   :  { %v816_v1 = vsel %vm809_vm13, %v807_v63, %v699_v51 }
 0x5b0   :  { %v996_v3 = vpop.permute.xlu0 %995 }
 0x5b1   :  { %v723_v4 = vpop.permute.xlu1 %722  ;;  %2172 = vmatpush.xpose.msk.msrb.mxu0 %vm383_vm8, %v996_v3 }
 0x5b2   :  { %v825_v46 = vsel %vm818_vm14, %v816_v1, %v723_v4 }
 0x5b4   :  { %2173 = vmatmul.msk.f32.vlgmr.msrb.gmra.mxu0 %vm383_vm8, %v2648_v9 }
 0x5b6   :  { %v2775_v5 = vpop.f32.mrf.mxu2 }
 0x5b7   :  { %766 = vrot.lane.b32.xlu2 %v2775_v5, %s2381_s10  ;;  %622 = vrot.lane.b32.xlu0 %v2775_v5, %s2376_s30 }
 0x5b9   :  { %v615_v6 = vpop.permute.xlu0 %614 }
 0x5ba   :  { %v936_v7 = vpop.permute.xlu1 %935  ;;  %v783_v11 = vsel %vm782_vm9, %v2675_v19, %v615_v6  ;;  %v735_v19 = vpop.permute.xlu2 %734 }
 0x5bb   :  { %2168 = vmatpush.xpose.msk.msra.mxu2 %vm383_vm8, %v936_v7 }
 0x5be   :  { %2169 = vmatmul.msk.f32.vlgmr.msra.gmra.mxu2 %vm383_vm8, %v2623_v2  ;;  %v2814_v41 = vpop.f32.mrf.mxu2 }
 0x5bf   :  { %620 = vrot.lane.b32.xlu0 %v2684_v27, %s2376_s30 }
 0x5c1   :  { %v639_v12 = vpop.permute.xlu0 %638 }
 0x5c2   :  { %v1056_v13 = vpop.permute.xlu1 %1055  ;;  %v792_v14 = vsel %vm791_vm10, %v783_v11, %v639_v12  ;;  %v641_v31 = vpop.permute.xlu2 %640 }
 0x5c3   :  { %2176 = vmatpush.xpose.msk.msrb.mxu2 %vm383_vm8, %v1056_v13  ;;  %v2868_v13 = vld [vmem:[%s3330_s2 + $0x10] sm:$0xff] }
 0x5c6   :  { %2177 = vmatmul.msk.f32.vlgmr.msrb.gmra.mxu2 %vm383_vm8, %v2644_v8 }
 0x5c7   :  { %646 = vrot.lane.b32.xlu0 %v2775_v5, %s2375_s29 }
 0x5c8   :  { %v2794_v16 = vpop.f32.mrf.mxu0 }
 0x5c9   :  { %v663_v17 = vpop.permute.xlu0 %662  ;;  %696 = vrot.lane.b32.xlu1 %v2794_v16, %s2379_s8  ;;  %624 = vrot.lane.b32.xlu2 %v2794_v16, %s2376_s30 }
 0x5ca   :  { %v801_v18 = vsel %vm800_vm11, %v792_v14, %v663_v17  ;;  %v759_v34 = vpop.permute.xlu1 %758  ;;  %v665_v40 = vpop.permute.xlu2 %664  ;;  %v1095_v14 = vrot.slane %v2868_v13, 2 }
 0x5cb   :  { %v932_v17 = vpop.f32.mrf.mxu1 }
 0x5cc   :  { %v1103_v20 = vperm.slane %v1095_v14, 0 }
 0x5cf   :  { %908 = vrot.lane.b32.xlu0 %v839_v28, %s2382_s11 }
 0x5d1   :  { %v687_v29 = vpop.permute.xlu0 %686  ;;  %648 = vrot.lane.b32.xlu2 %v2794_v16, %s2375_s29 }
 0x5d2   :  { %v810_v30 = vsel %vm809_vm13, %v801_v18, %v687_v29  ;;  %v771_v49 = vpop.permute.xlu2 %770 }
 0x5d9   :  { %v711_v32 = vpop.permute.xlu0 %710  ;;  %672 = vrot.lane.b32.xlu2 %v2794_v16, %s2377_s6 }
 0x5da   :  { %v819_v33 = vsel %vm818_vm14, %v810_v30, %v711_v32  ;;  %v2830_v52 = vpop.permute.xlu2 %688  ;;  %v1099_v30 = vrot.slane %v2868_v13, 6 }
 0x5db   :  { %v828_v36 = vsel %vm827_vm15, %v819_v33, %v735_v19 }
 0x5dc   :  { %v2812_v39 = vsel %vm836_vm1, %v828_v36, %v759_v34  ;;  %v1107_v34 = vperm.slane %v1099_v30, 0 }
 0x5e1   :  { %v617_v42 = vpop.permute.xlu0 %616  ;;  %700 = vrot.lane.b32.xlu2 %v2814_v41, %s2379_s8 }
 0x5e2   :  { %v784_v43 = vsel %vm782_vm9, %v2723_v37, %v617_v42  ;;  %v2834_v55 = vpop.permute.xlu2 %712 }
 0x5e3   :  { %v793_v44 = vsel %vm791_vm10, %v784_v43, %v641_v31  ;;  %v1052_v31 = vpop.f32.mrf.mxu1 }
 0x5e4   :  { %v2822_v38 = vsel %vm800_vm11, %v793_v44, %v665_v40  ;;  %v645_v44 = vpop.permute.xlu1 %644 }
 0x5e9   :  { %v747_v47 = vpop.permute.xlu0 %746 }
 0x5ea   :  { %v834_v50 = vsel %vm827_vm15, %v825_v46, %v747_v47  ;;  %v2838_v56 = vpop.permute.xlu2 %736 }
 0x5eb   :  { %v843_v51 = vsel %vm836_vm1, %v834_v50, %v771_v49 }
 0x5ec   :  { %1028 = vrot.lane.b32.xlu0 %v843_v51, %s2382_s11 }
 0x5f2   :  { %v2842_v57 = vpop.permute.xlu2 %740 }
 0x5f4   :  { %670 = vrot.lane.b32.xlu0 %v2775_v5, %s2377_s6 }
 0x5fc   :  { %694 = vrot.lane.b32.xlu0 %v2775_v5, %s2379_s8 }
 0x604   :  { %718 = vrot.lane.b32.xlu0 %v2775_v5, %s2378_s7 }
 0x60c   :  { %742 = vrot.lane.b32.xlu0 %v2775_v5, %s2380_s9 }
 0x611   :  { %v2846_v59 = vpop.permute.xlu2 %766 }
 0x614   :  { %760 = vrot.lane.b32.xlu0 %v2723_v37, %s2381_s10 }
 0x61c   :  { %764 = vrot.lane.b32.xlu0 %v2684_v27, %s2381_s10 }
 0x623   :  { %v625_v61 = vpop.permute.xlu2 %624 }
 0x624   :  { %628 = vrot.lane.b32.xlu0 %v2814_v41, %s2376_s30  ;;  %v788_v63 = vsel %vm782_vm9, %v2794_v16, %v625_v61 }
 0x629   :  { %v623_v62 = vpop.permute.xlu0 %622 }
 0x62a   :  { %v787_v7 = vsel %vm782_vm9, %v2775_v5, %v623_v62 }
 0x62b   :  { %v649_v1 = vpop.permute.xlu2 %648 }
 0x62c   :  { %652 = vrot.lane.b32.xlu0 %v2814_v41, %s2375_s29  ;;  %v797_v3 = vsel %vm791_vm10, %v788_v63, %v649_v1  ;;  %v811_v1 = vsel %vm809_vm13, %v2822_v38, %v2830_v52 }
 0x631   :  { %v621_v37 = vpop.permute.xlu0 %620 }
 0x632   :  { %v786_v61 = vsel %vm782_vm9, %v2684_v27, %v621_v37 }
 0x633   :  { %v673_v4 = vpop.permute.xlu2 %672 }
 0x634   :  { %676 = vrot.lane.b32.xlu0 %v2814_v41, %s2377_s6  ;;  %v2860_v6 = vsel %vm800_vm11, %v797_v3, %v673_v4  ;;  %v795_v3 = vsel %vm791_vm10, %v786_v61, %v645_v44  ;;  %v820_v4 = vsel %vm818_vm14, %v811_v1, %v2834_v55 }
 0x639   :  { %v647_v11 = vpop.permute.xlu0 %646 }
 0x63a   :  { %v796_v12 = vsel %vm791_vm10, %v787_v7, %v647_v11 }
 0x63c   :  { %720 = vrot.lane.b32.xlu0 %v2794_v16, %s2378_s7 }
 0x641   :  { %v909_v18 = vpop.permute.xlu0 %908 }
 0x642   :  { %v933_v19 = vadd.f32 %v932_v17, %v909_v18 }
 0x644   :  { %v1087_v28 = vmul.f32 0.35355338, %v933_v19  ;;  %744 = vrot.lane.b32.xlu0 %v2794_v16, %s2380_s9 }
 0x646   :  { %v1119_v5 = vadd.f32 %v1103_v20, %v1087_v28 }
 0x648   :  { %v1131_v29 = vsel %vm383_vm8, %v1119_v5, -inf }
 0x649   :  { %1132 = vmax.xlane.f32.xlu2 %v1131_v29  ;;  %v701_v29 = vpop.permute.xlu2 %700 }
 0x64c   :  { %748 = vrot.lane.b32.xlu0 %v2814_v41, %s2380_s9 }
 0x654   :  { %1265 = vrot.lane.b32.xlu0 %v2605_v58, %s2383_s14 }
 0x65c   :  { %1369 = vrot.lane.b32.xlu0 %v2616_v60, %s2383_s14  ;;  %v669_v60 = vpop.permute.xlu1 %668 }
 0x65d   :  { %v804_v7 = vsel %vm800_vm11, %v795_v3, %v669_v60 }
 0x65e   :  { %v1029_v32 = vpop.permute.xlu0 %1028 }
 0x65f   :  { %v1053_v33 = vadd.f32 %v1052_v31, %v1029_v32 }
 0x661   :  { %v1091_v36 = vmul.f32 0.35355338, %v1053_v33  ;;  %724 = vrot.lane.b32.xlu2 %v2814_v41, %s2378_s7 }
 0x663   :  { %v1123_v40 = vadd.f32 %v1107_v34, %v1091_v36 }
 0x664   :  { %v693_v63 = vpop.permute.xlu1 %692 }
 0x665   :  { %v1143_v42 = vsel %vm383_vm8, %v1123_v40, -inf  ;;  %v813_v37 = vsel %vm809_vm13, %v804_v7, %v693_v63 }
 0x666   :  { %1144 = vmax.xlane.f32.xlu1 %v1143_v42  ;;  %v671_v43 = vpop.permute.xlu0 %670 }
 0x667   :  { %v805_v58 = vsel %vm800_vm11, %v796_v12, %v671_v43  ;;  %v829_v12 = vsel %vm827_vm15, %v820_v4, %v2838_v56 }
 0x66c   :  { %v717_v14 = vpop.permute.xlu1 %716 }
 0x66d   :  { %v822_v38 = vsel %vm818_vm14, %v813_v37, %v717_v14 }
 0x66e   :  { %v695_v46 = vpop.permute.xlu0 %694  ;;  %v831_v17 = vsel %vm827_vm15, %v822_v38, %v2842_v57 }
 0x66f   :  { %v814_v47 = vsel %vm809_vm13, %v805_v58, %v695_v46 }
 0x674   :  { %v697_v32 = vpop.permute.xlu1 %696 }
 0x675   :  { %v815_v57 = vsel %vm809_vm13, %v2860_v6, %v697_v32  ;;  %v1101_v32 = vperm.slane %v2868_v13, 0 }
 0x676   :  { %v719_v49 = vpop.permute.xlu0 %718 }
 0x677   :  { %v823_v50 = vsel %vm818_vm14, %v814_v47, %v719_v49 }
 0x67e   :  { %v743_v51 = vpop.permute.xlu0 %742 }
 0x67f   :  { %v832_v62 = vsel %vm827_vm15, %v823_v50, %v743_v51 }
 0x680   :  { %v841_v7 = vsel %vm836_vm1, %v832_v62, %v2846_v59  ;;  %v1545_v59 = vld [vmem:[%s3331_s3 + $0xa0] sm:$0xff] }
 0x686   :  { %v761_v11 = vpop.permute.xlu0 %760 }
 0x687   :  { %v838_v27 = vsel %vm836_vm1, %v829_v12, %v761_v11 }
 0x688   :  { %878 = vrot.lane.b32.xlu0 %v838_v27, %s2382_s11 }
 0x68e   :  { %v765_v52 = vpop.permute.xlu0 %764 }
 0x68f   :  { %v840_v55 = vsel %vm836_vm1, %v831_v17, %v765_v52 }
 0x690   :  { %938 = vrot.lane.b32.xlu0 %v840_v55, %s2382_s11  ;;  %v2338_v55 = vld [vmem:[%s3331_s3 + $0x178] sm:$0xff] }
 0x696   :  { %v629_v18 = vpop.permute.xlu0 %628 }
 0x697   :  { %v790_v56 = vsel %vm782_vm9, %v2814_v41, %v629_v18  ;;  %v1487_v18 = vperm.slane %v2338_v55, 4 }
 0x69e   :  { %v653_v19 = vpop.permute.xlu0 %652 }
 0x69f   :  { %v799_v20 = vsel %vm791_vm10, %v790_v56, %v653_v19  ;;  %v872_v19 = vpop.f32.mrf.mxu3 }
 0x6a6   :  { %v677_v28 = vpop.permute.xlu0 %676 }
 0x6a7   :  { %v808_v30 = vsel %vm800_vm11, %v799_v20, %v677_v28  ;;  %vm1451_vm11 = vcmask 130048  }
 0x6a8   :  { %v817_v31 = vsel %vm809_vm13, %v808_v30, %v701_v29  ;;  %v1488_v29 = vmul.f32 %v1487_v18, %v2566_v35  ;;  %v1489_v35 = vmul.f32 %v1487_v18, %v2575_v45  ;;  %v1097_v45 = vrot.slane %v2868_v13, 4 }
 0x6a9   :  { %vm1454_vm13 = vcmask 195584  }
 0x6ae   :  { %v721_v33 = vpop.permute.xlu0 %720 }
 0x6af   :  { %v824_v34 = vsel %vm818_vm14, %v815_v57, %v721_v33  ;;  %v962_v57 = vpop.f32.mrf.mxu2 }
 0x6b6   :  { %v745_v36 = vpop.permute.xlu0 %744 }
 0x6b7   :  { %v833_v42 = vsel %vm827_vm15, %v824_v34, %v745_v36  ;;  %v1096_v36 = vrot.slane %v2868_v13, 3 }
 0x6bc   :  { %v1133_v43 = vpop.xlane.xlu2 %1132 }
 0x6bd   :  { %v1151_v58 = vsub.f32 %v1119_v5, %v1133_v43 }
 0x6be   :  { %v749_v44 = vpop.permute.xlu0 %748 }
 0x6bf   :  { %v1161_v46 = vmul.f32 1.442695, %v1151_v58 }
 0x6c1   :  { %2278 = vpow2.f32 %v1161_v46  ;;  %v1104_v46 = vperm.slane %v1096_v36, 0 }
 0x6c4   :  { %v725_v47 = vpop.permute.xlu2 %724 }
 0x6c5   :  { %v826_v60 = vsel %vm818_vm14, %v817_v31, %v725_v47  ;;  %v1490_v31 = vperm.slane %v2338_v55, 5 }
 0x6c6   :  { %v1266_v49 = vpop.permute.xlu0 %1265  ;;  %v835_v50 = vsel %vm827_vm15, %v826_v60, %v749_v44 }
 0x6c7   :  { %v2279_v51 = vpop.eup %2278  ;;  %1286 = vmatpush.msrb.mxu1 %v1266_v49  ;;  %v2961_v60 = vadd.f32 %v1490_v31, %v1489_v35  ;;  %v902_v49 = vpop.f32.mrf.mxu0 }
 0x6c8   :  { %v1179_v6 = vsel %vm383_vm8, %v2279_v51, 0.0 }
 0x6c9   :  { %1180 = vadd.xlane.f32.xlu1 %v1179_v6  ;;  %v1094_v6 = vrot.slane %v2868_v13, 1 }
 0x6ce   :  { %v1370_v61 = vpop.permute.xlu0 %1369 }
 0x6cf   :  { %1390 = vmatpush.msra.mxu1 %v1370_v61 }
 0x6d9   :  { %v1145_v63 = vpop.xlane.xlu1 %1144 }
 0x6da   :  { %v1155_v1 = vsub.f32 %v1123_v40, %v1145_v63 }
 0x6dc   :  { %v1169_v3 = vmul.f32 1.442695, %v1155_v1  ;;  %v1102_v1 = vperm.slane %v1094_v6, 0 }
 0x6de   :  { %2280 = vpow2.f32 %v1169_v3  ;;  %v992_v3 = vpop.f32.mrf.mxu3 }
 0x6e2   :  { %768 = vrot.lane.b32.xlu1 %v2794_v16, %s2381_s10  ;;  %v1548_v16 = vld [vmem:[%s3331_s3 + $0xb8] sm:$0xff] }
 0x6e4   :  { %v2281_v5 = vpop.eup %2280 }
 0x6e5   :  { %v1191_v4 = vsel %vm383_vm8, %v2281_v5, 0.0 }
 0x6e6   :  { %1192 = vadd.xlane.f32.xlu2 %v1191_v4 }
 0x6ea   :  { %772 = vrot.lane.b32.xlu1 %v2814_v41, %s2381_s10  ;;  %v1547_v41 = vld [vmem:[%s3331_s3 + $0xb0] sm:$0xff]  ;;  %s2387_s10 = smov 8  }
 0x6f2   :  { %848 = vrot.lane.b32.xlu1 %v2812_v39, %s2382_s11  ;;  %v1546_v39 = vld [vmem:[%s3331_s3 + $0xa8] sm:$0xff] }
 0x6fa   :  { %968 = vrot.lane.b32.xlu1 %v841_v7, %s2382_s11  ;;  %v879_v14 = vpop.permute.xlu0 %878 }
 0x702   :  { %v939_v20 = vpop.permute.xlu0 %938 }
 0x703   :  { %v963_v33 = vadd.f32 %v962_v57, %v939_v20 }
 0x705   :  { %v1088_v58 = vmul.f32 0.35355338, %v963_v33 }
 0x707   :  { %v1120_v47 = vadd.f32 %v1104_v46, %v1088_v58 }
 0x73c   :  { %v1181_v40 = vpop.xlane.xlu1 %1180 }
 0x73d   :  { %2282 = vrcp.f32 %v1181_v40  ;;  %v1105_v40 = vperm.slane %v1097_v45, 0 }
 0x743   :  { %v2283_v11 = vpop.eup %2282 }
 0x744   :  { %v1207_v12 = vmul.f32 %v2283_v11, %v2279_v51  ;;  %v1134_v51 = vsel %vm383_vm8, %v1120_v47, -inf }
 0x746   :  { %2180 = vmatmul.msk.f32.vlgmr.msrb.gmra.mxu1 %vm383_vm8, %v1207_v12 }
 0x747   :  { %1562 = vmatpush.msrb.mxu1 %v1548_v16 }
 0x749   :  { %1563 = vmatpush.msrb.mxu1 %v1547_v41  ;;  %v1100_v41 = vrot.slane %v2868_v13, 7 }
 0x74b   :  { %1564 = vmatpush.msrb.mxu1 %v1546_v39  ;;  %v1082_v39 = vpop.f32.mrf.mxu2 }
 0x74d   :  { %1565 = vmatpush.msrb.mxu1 %v1545_v59 }
 0x754   :  { %v769_v62 = vpop.permute.xlu1 %768 }
 0x755   :  { %v842_v27 = vsel %vm836_vm1, %v833_v42, %v769_v62  ;;  %v2955_v42 = vadd.f32 %v1490_v31, %v1488_v29 }
 0x756   :  { %998 = vrot.lane.b32.xlu1 %v842_v27, %s2382_s11  ;;  %v1108_v27 = vperm.slane %v1100_v41, 0 }
 0x759   :  { %v1193_v37 = vpop.xlane.xlu2 %1192 }
 0x75a   :  { %2284 = vrcp.f32 %v1193_v37 }
 0x75c   :  { %v773_v38 = vpop.permute.xlu1 %772 }
 0x75d   :  { %v844_v52 = vsel %vm836_vm1, %v835_v50, %v773_v38  ;;  %v903_v50 = vadd.f32 %v902_v49, %v879_v14 }
 0x75e   :  { %1058 = vrot.lane.b32.xlu2 %v844_v52, %s2382_s11  ;;  %v1098_v52 = vrot.slane %v2868_v13, 5  ;;  %s2388_s11 = smov 24  }
 0x75f   :  { %v1086_v61 = vmul.f32 0.35355338, %v903_v50 }
 0x760   :  { %v2285_v17 = vpop.eup %2284 }
 0x761   :  { %v1211_v56 = vmul.f32 %v2285_v17, %v2281_v5  ;;  %v1118_v4 = vadd.f32 %v1102_v1, %v1086_v61  ;;  %v1022_v17 = vpop.f32.mrf.mxu0 }
 0x763   :  { %2184 = vmatmul.msk.f32.vlgmr.msra.gmra.mxu1 %vm383_vm8, %v1211_v56  ;;  %v1128_v11 = vsel %vm383_vm8, %v1118_v4, -inf  ;;  %v1106_v56 = vperm.slane %v1098_v52, 0 }
 0x764   :  { %v849_v28 = vpop.permute.xlu1 %848 }
 0x765   :  { %v873_v30 = vadd.f32 %v872_v19, %v849_v28 }
 0x767   :  { %v1085_v34 = vmul.f32 0.35355338, %v873_v30 }
 0x769   :  { %v1117_v43 = vadd.f32 %v1101_v32, %v1085_v34 }
 0x76b   :  { %2190 = vmatmul.msk.f32.vlgmr.msrb.gmra.mxu1 %vm34_vm0, %v2955_v42  ;;  %v1125_v44 = vsel %vm383_vm8, %v1117_v43, -inf }
 0x76c   :  { %1126 = vmax.xlane.f32.xlu0 %v1125_v44  ;;  %v969_v63 = vpop.permute.xlu1 %968 }
 0x76d   :  { %v993_v5 = vadd.f32 %v992_v3, %v969_v63  ;;  %v2997_v3 = vld [vmem:[%s3331_s3 + $0x180] sm:$0xff] }
 0x76f   :  { %v1089_v7 = vmul.f32 0.35355338, %v993_v5  ;;  %v1549_v5 = vperm.slane %v2997_v3, 6 }
 0x771   :  { %v1121_v12 = vadd.f32 %v1105_v40, %v1089_v7 }
 0x773   :  { %2191 = vmatmul.msk.f32.gmra.mxu1 %vm34_vm0, %v2961_v60  ;;  %v1137_v16 = vsel %vm383_vm8, %v1121_v12, -inf }
 0x774   :  { %1135 = vmax.xlane.f32.xlu0 %v1134_v51 }
 0x780   :  { %1129 = vmax.xlane.f32.xlu1 %v1128_v11 }
 0x787   :  { %1138 = vmax.xlane.f32.xlu2 %v1137_v16 }
 0x7b8   :  { %v1059_v59 = vpop.permute.xlu2 %1058 }
 0x7b9   :  { %v1083_v62 = vadd.f32 %v1082_v39, %v1059_v59 }
 0x7bb   :  { %v1092_v37 = vmul.f32 0.35355338, %v1083_v62 }
 0x7bd   :  { %v1124_v14 = vadd.f32 %v1108_v27, %v1092_v37 }
 0x7bf   :  { %v1146_v38 = vsel %vm383_vm8, %v1124_v14, -inf }
 0x7c0   :  { %1147 = vmax.xlane.f32.xlu0 %v1146_v38 }
 0x7c3   :  { %v2984_v51 = vpop.f32.mrf.mxu1 }
 0x7c8   :  { %v999_v55 = vpop.permute.xlu1 %998 }
 0x7c9   :  { %v1023_v18 = vadd.f32 %v1022_v17, %v999_v55 }
 0x7cb   :  { %v1090_v19 = vmul.f32 0.35355338, %v1023_v18 }
 0x7cd   :  { %v1122_v20 = vadd.f32 %v1106_v56, %v1090_v19 }
 0x7cf   :  { %v1140_v28 = vsel %vm383_vm8, %v1122_v20, -inf }
 0x7d0   :  { %1141 = vmax.xlane.f32.xlu1 %v1140_v28  ;;  %v2237_v28 = vpack.i.bf16 %v2644_v8, %v2648_v9 }
 0x7df   :  { %v1127_v29 = vpop.xlane.xlu0 %1126 }
 0x7e0   :  { %v1149_v30 = vsub.f32 %v1117_v43, %v1127_v29  ;;  %v2992_v1 = vpop.f32.mrf.mxu1 }
 0x7e2   :  { %v1157_v31 = vmul.f32 1.442695, %v1149_v30  ;;  %v2232_v30 = vpack.i.bf16 %v2623_v2, %v2656_v15 }
 0x7e4   :  { %2286 = vpow2.f32 %v1157_v31 }
 0x7e7   :  { %v1136_v32 = vpop.xlane.xlu0 %1135 }
 0x7e8   :  { %v1152_v57 = vsub.f32 %v1120_v47, %v1136_v32  ;;  %v1567_v45 = vpop.f32.mrf.mxu1  ;;  %v2384_v32 = vmov 1  }
 0x7e9   :  { %v1568_v7 = vadd.f32 %v1567_v45, %v1549_v5  ;;  %2244 = vset.pattern.permute.xlu2 %v2384_v32 }
 0x7ea   :  { %v2974_v33 = vpop.eup %2286  ;;  %v1163_v34 = vmul.f32 1.442695, %v1152_v57 }
 0x7eb   :  { %v1173_v13 = vsel %vm383_vm8, %v2974_v33, 0.0  ;;  %v1575_v40 = vmul.f32 0.044715, %v1568_v7  ;;  %v1573_v38 = vmul.f32 0.5, %v1568_v7 }
 0x7ec   :  { %2288 = vpow2.f32 %v1163_v34  ;;  %1174 = vadd.xlane.f32.xlu1 %v1173_v13 }
 0x7ed   :  { %v1577_v11 = vmul.f32 %v1575_v40, %v1568_v7  ;;  %v2385_v40 = vmov 2  }
 0x7f0   :  { %v1570_v29 = vpop.f32.mrf.mxu1 }
 0x7f1   :  { %v1571_v31 = vadd.f32 %v1570_v29, %v1549_v5 }
 0x7f2   :  { %v2978_v36 = vpop.eup %2288 }
 0x7f3   :  { %v1130_v58 = vpop.xlane.xlu1 %1129  ;;  %v1182_v44 = vsel %vm383_vm8, %v2978_v36, 0.0  ;;  %v1576_v8 = vmul.f32 0.044715, %v1571_v31  ;;  %v1574_v5 = vmul.f32 0.5, %v1571_v31 }
 0x7f4   :  { %v1150_v46 = vsub.f32 %v1118_v4, %v1130_v58  ;;  %1183 = vadd.xlane.f32.xlu2 %v1182_v44  ;;  %v2227_v4 = vpack.i.bf16 %v2591_v0, %v2586_v54 }
 0x7f5   :  { %v1578_v9 = vmul.f32 %v1576_v8, %v1571_v31 }
 0x7f6   :  { %v1159_v43 = vmul.f32 1.442695, %v1150_v46 }
 0x7f7   :  { %v1580_v57 = vmul.f32 %v1578_v9, %v1571_v31 }
 0x7f8   :  { %2290 = vpow2.f32 %v1159_v43 }
 0x7f9   :  { %v1582_v34 = vadd.f32 %v1580_v57, %v1571_v31 }
 0x7fa   :  { %v1139_v35 = vpop.xlane.xlu2 %1138 }
 0x7fb   :  { %v1153_v47 = vsub.f32 %v1121_v12, %v1139_v35  ;;  %v1579_v12 = vmul.f32 %v1577_v11, %v1568_v7  ;;  %v1584_v2 = vmul.f32 0.7978846, %v1582_v34  ;;  %v2386_v11 = vmov 0  }
 0x7fc   :  { %2242 = vset.pattern.permute.xlu0 %v2386_v11  ;;  %2243 = vset.pattern.permute.xlu1 %v2386_v11 }
 0x7fd   :  { %v1165_v49 = vmul.f32 1.442695, %v1153_v47  ;;  %v1581_v16 = vadd.f32 %v1579_v12, %v1568_v7 }
 0x7fe   :  { %v2982_v50 = vpop.eup %2290 }
 0x7ff   :  { %2292 = vpow2.f32 %v1165_v49  ;;  %v1176_v6 = vsel %vm383_vm8, %v2982_v50, 0.0  ;;  %v1583_v41 = vmul.f32 0.7978846, %v1581_v16 }
 0x800   :  { %1177 = vadd.xlane.f32.xlu0 %v1176_v6 }
 0x801   :  { %2294 = vtanh.f32 %v1583_v41 }
 0x805   :  { %v2988_v61 = vpop.eup %2292 }
 0x806   :  { %v1185_v63 = vsel %vm383_vm8, %v2988_v61, 0.0 }
 0x807   :  { %1186 = vadd.xlane.f32.xlu1 %v1185_v63  ;;  %v2295_v39 = vpop.eup %2294 }
 0x808   :  { %v1587_v27 = vadd.f32 1.0, %v2295_v39 }
 0x80a   :  { %v1589_v52 = vmul.f32 %v1587_v27, %v1573_v38  ;;  %v1495_v38 = vld [vmem:[%s3331_s3 + $0x90] sm:$0xff] }
 0x80c   :  { %v1591_v17 = vsel %vm34_vm0, %v1589_v52, 0.0 }
 0x814   :  { %2228 = vrot.lane.b32.xlu0 %v2227_v4, %s2383_s14 }
 0x833   :  { %v1148_v59 = vpop.xlane.xlu0 %1147 }
 0x834   :  { %v1156_v62 = vsub.f32 %v1124_v14, %v1148_v59 }
 0x836   :  { %v1171_v37 = vmul.f32 1.442695, %v1156_v62 }
 0x838   :  { %2296 = vpow2.f32 %v1171_v37  ;;  %v1496_v37 = vld [vmem:[%s3331_s3 + $0x98] sm:$0xff] }
 0x83e   :  { %v3004_v54 = vpop.eup %2296  ;;  %1592 = vadd.xlane.f32.xlu0 %v1591_v17  ;;  %v1493_v17 = vld [vmem:[%s3331_s3 + $0x80] sm:$0xff] }
 0x83f   :  { %v1194_v0 = vsel %vm383_vm8, %v3004_v54, 0.0 }
 0x840   :  { %1195 = vadd.xlane.f32.xlu2 %v1194_v0 }
 0x843   :  { %v1142_v55 = vpop.xlane.xlu1 %1141 }
 0x844   :  { %v1154_v18 = vsub.f32 %v1122_v20, %v1142_v55  ;;  %v3021_v20 = vld [vmem:[%s3330_s2] sm:$0xff] }
 0x846   :  { %v1167_v56 = vmul.f32 1.442695, %v1154_v18 }
 0x848   :  { %2298 = vpow2.f32 %v1167_v56 }
 0x84e   :  { %v3008_v19 = vpop.eup %2298 }
 0x84f   :  { %v1188_v14 = vsel %vm383_vm8, %v3008_v19, 0.0 }
 0x850   :  { %1189 = vadd.xlane.f32.xlu1 %v1188_v14 }
 0x852   :  { %1643 = vperm.xlu0 %2242, %v3021_v20  }
 0x858   :  { %2238 = vrot.lane.b32.xlu2 %v2237_v28, %s2383_s14 }
 0x85a   :  { %2247 = vset.pattern.permute.xlu0 %v2385_v40 }
 0x85f   :  { %v1175_v13 = vpop.xlane.xlu1 %1174 }
 0x860   :  { %1662 = vperm.xlu2 %2244, %v3021_v20   ;;  %2300 = vrcp.f32 %v1175_v13 }
 0x866   :  { %v2301_v15 = vpop.eup %2300 }
 0x867   :  { %v1205_v49 = vmul.f32 %v2301_v15, %v2974_v33  ;;  %v1184_v7 = vpop.xlane.xlu2 %1183 }
 0x868   :  { %2245 = vset.pattern.permute.xlu2 %v2385_v40 }
 0x869   :  { %2233 = vrot.lane.b32.xlu1 %v2232_v30, %s2383_s14 }
 0x873   :  { %v1178_v58 = vpop.xlane.xlu0 %1177 }
 0x874   :  { %2302 = vrcp.f32 %v1178_v58 }
 0x875   :  { %2304 = vtanh.f32 %v1584_v2 }
 0x87a   :  { %v2303_v44 = vpop.eup %2302  ;;  %v1187_v59 = vpop.xlane.xlu1 %1186 }
 0x87b   :  { %v2305_v43 = vpop.eup %2304  ;;  %v1206_v6 = vmul.f32 %v2303_v44, %v2982_v50 }
 0x87c   :  { %v1588_v63 = vadd.f32 1.0, %v2305_v43 }
 0x87e   :  { %v3029_v45 = vmul.f32 %v1588_v63, %v1574_v5  ;;  %v1497_v63 = vperm.slane %v2997_v3, 5 }
 0x880   :  { %v1594_v4 = vsel %vm34_vm0, %v3029_v45, 0.0 }
 0x886   :  { %v2229_v46 = vpop.permute.xlu0 %2228 }
 0x887   :  { %v2231_v35 = vunpack.i.h.bf16 %v2229_v46  ;;  %v2230_v47 = vunpack.i.l.bf16 %v2229_v46 }
 0x889   :  { %1234 = vmatpush.msrb.mxu3 %v2230_v47  ;;  %1260 = vmatpush.msra.mxu0 %v2231_v35 }
 0x88a   :  { %2178 = vmatmul.msk.f32.vlgmr.msrb.gmra.mxu3 %vm383_vm8, %v1205_v49  ;;  %2179 = vmatmul.msk.f32.vlgmr.msra.gmra.mxu0 %vm383_vm8, %v1206_v6 }
 0x893   :  { %1595 = vadd.xlane.f32.xlu1 %v1594_v4 }
 0x8b1   :  { %v1593_v33 = vpop.xlane.xlu0 %1592 }
 0x8b2   :  { %v1597_v50 = vmul.f32 %v1593_v33, %v2436_v10 }
 0x8b3   :  { %v1196_v12 = vpop.xlane.xlu2 %1195 }
 0x8b4   :  { %v3035_v16 = vsub.f32 %v1589_v52, %v1597_v50  ;;  %v1494_v52 = vld [vmem:[%s3331_s3 + $0x88] sm:$0xff]  ;;  %v1707_v50 = vld [vmem:[%s3331_s3 + $0xd8] sm:$0xff] }
 0x8b6   :  { %v1601_v41 = vmul.f32 %v3035_v16, %v3035_v16 }
 0x8b8   :  { %v1603_v39 = vsel %vm34_vm0, %v1601_v41, 0.0  ;;  %v1706_v41 = vld [vmem:[%s3331_s3 + $0xd0] sm:$0xff] }
 0x8b9   :  { %1604 = vadd.xlane.f32.xlu2 %v1603_v39  ;;  %v1705_v39 = vld [vmem:[%s3331_s3 + $0xc8] sm:$0xff] }
 0x8bb   :  { %v2239_v62 = vpop.permute.xlu2 %2238 }
 0x8bc   :  { %v2240_v27 = vunpack.i.l.bf16 %v2239_v62 }
 0x8be   :  { %1364 = vmatpush.msrb.mxu0 %v2240_v27  ;;  %v1704_v27 = vld [vmem:[%s3331_s3 + $0xc0] sm:$0xff] }
 0x8c0   :  { %1516 = vmatpush.msra.mxu0 %v1496_v37 }
 0x8c2   :  { %1517 = vmatpush.msra.mxu0 %v1495_v38 }
 0x8c3   :  { %v1190_v0 = vpop.xlane.xlu1 %1189  ;;  %v3083_v34 = vpop.permute.xlu2 %1662 }
 0x8c4   :  { %1518 = vmatpush.msra.mxu0 %v1494_v52  ;;  %2306 = vrcp.f32 %v1190_v0  ;;  %v3087_v47 = vpop.permute.xlu0 %1643 }
 0x8c5   :  { %2308 = vrcp.f32 %v1184_v7 }
 0x8c6   :  { %1519 = vmatpush.msra.mxu0 %v1493_v17  ;;  %2310 = vrcp.f32 %v1187_v59 }
 0x8c7   :  { %2312 = vrcp.f32 %v1196_v12 }
 0x8ca   :  { %v2307_v55 = vpop.eup %2306 }
 0x8cb   :  { %v1210_v18 = vmul.f32 %v2307_v55, %v3008_v19  ;;  %v2309_v56 = vpop.eup %2308  ;;  %v1635_v55 = vperm.slane %v2997_v3, 7 }
 0x8cc   :  { %v2311_v14 = vpop.eup %2310  ;;  %v1208_v19 = vmul.f32 %v2309_v56, %v2978_v36  ;;  %v3114_v56 = vld [vmem:[%s3331_s3 + $0x188] sm:$0xff] }
 0x8cd   :  { %2183 = vmatmul.msk.f32.vlgmr.msrb.gmra.mxu0 %vm383_vm8, %v1210_v18  ;;  %v1209_v31 = vmul.f32 %v2311_v14, %v2988_v61 }
 0x8d1   :  { %1685 = vperm.xlu2 %2245, %v3021_v20   ;;  %v2241_v20 = vunpack.i.h.bf16 %v2239_v62 }
 0x8d5   :  { %2188 = vmatmul.msk.f32.vlgmr.msra.gmra.mxu0 %vm34_vm0, %v2955_v42  ;;  %v2313_v42 = vpop.eup %2312 }
 0x8d9   :  { %1427 = vrot.lane.b32.xlu2 %v2984_v51, %s2387_s10  ;;  %v1212_v51 = vmul.f32 %v2313_v42, %v3004_v54 }
 0x8db   :  { %v2234_v28 = vpop.permute.xlu1 %2233 }
 0x8dc   :  { %v2236_v29 = vunpack.i.h.bf16 %v2234_v28  ;;  %v2235_v30 = vunpack.i.l.bf16 %v2234_v28 }
 0x8dd   :  { %2189 = vmatmul.msk.f32.gmra.mxu0 %vm34_vm0, %v2961_v60  ;;  %v25_v60 = vld [vmem:[%s3330_s2 + $0x8] sm:$0xff]  ;;  %s2389_s2 = smov 16  }
 0x8de   :  { %1312 = vmatpush.msra.mxu2 %v2236_v29  ;;  %1338 = vmatpush.msra.mxu3 %v2235_v30 }
 0x8df   :  { %2181 = vmatmul.msk.f32.vlgmr.msra.gmra.mxu2 %vm383_vm8, %v1208_v19  ;;  %2182 = vmatmul.msk.f32.vlgmr.msra.gmra.mxu3 %vm383_vm8, %v1209_v31  ;;  %v1638_v19 = vperm.slane %v3114_v56, 0 }
 0x8e0   :  { %1416 = vmatpush.msrb.mxu2 %v2241_v20  ;;  %1648 = vperm.xlu1 %2243, %v25_v60  }
 0x8e1   :  { %1443 = vrot.lane.b32.xlu2 %v2992_v1, %s2388_s11 }
 0x8e2   :  { %1727 = vmatpush.msra.mxu2 %v1707_v50 }
 0x8e4   :  { %1728 = vmatpush.msra.mxu2 %v1706_v41 }
 0x8e6   :  { %1729 = vmatpush.msra.mxu2 %v1705_v39 }
 0x8e7   :  { %2185 = vmatmul.msk.f32.vlgmr.msrb.gmra.mxu2 %vm383_vm8, %v1212_v51 }
 0x8e8   :  { %2246 = vset.pattern.permute.xlu1 %v2384_v32  ;;  %1730 = vmatpush.msra.mxu2 %v1704_v27 }
 0x8e9   :  { %1666 = vperm.xlu1 %2246, %v25_v60  }
 0x906   :  { %v1596_v36 = vpop.xlane.xlu1 %1595 }
 0x907   :  { %v1598_v61 = vmul.f32 %v1596_v36, %v2436_v10  ;;  %v3079_v9 = vpop.f32.mrf.mxu0  ;;  %v1656_v36 = vlaneseq }
 0x909   :  { %v3074_v8 = vsub.f32 %v3029_v45, %v1598_v61 }
 0x90b   :  { %v1602_v1 = vmul.f32 %v3074_v8, %v3074_v8 }
 0x90d   :  { %v1606_v54 = vsel %vm34_vm0, %v1602_v1, 0.0  ;;  %v3081_v32 = vpop.f32.mrf.mxu3 }
 0x90e   :  { %1607 = vadd.xlane.f32.xlu0 %v1606_v54 }
 0x922   :  { %1689 = vperm.xlu0 %2247, %v25_v60  }
 0x92c   :  { %v1605_v2 = vpop.xlane.xlu2 %1604 }
 0x92d   :  { %v1609_v15 = vmul.f32 %v1605_v2, %v2436_v10 }
 0x92f   :  { %v1611_v46 = vadd.f32 1e-05, %v1609_v15 }
 0x931   :  { %2314 = vrsqrt.f32 %v1611_v46  ;;  %vm1619_vm3 = vweird.f32 %v1611_v46 }
 0x937   :  { %v2315_v43 = vpop.eup %2314 }
 0x938   :  { %v1614_v35 = vmul.f32 %v2315_v43, %v1611_v46  ;;  %vm1620_vm2 = vweird.f32 %v2315_v43 }
 0x939   :  { %vm1621_vm4 = vmor %vm1619_vm3, %vm1620_vm2 }
 0x93a   :  { %v1615_v49 = vmul.f32 %v2315_v43, %v1614_v35 }
 0x93c   :  { %v1616_v6 = vmul.f32 0.5, %v1615_v49 }
 0x93e   :  { %v1617_v40 = vsub.f32 1.5, %v1616_v6 }
 0x940   :  { %v1618_v11 = vmul.f32 %v2315_v43, %v1617_v40 }
 0x942   :  { %v1622_v37 = vsel %vm1621_vm4, %v2315_v43, %v1618_v11 }
 0x943   :  { %v1633_v18 = vmul.f32 %v1622_v37, %v3035_v16 }
 0x945   :  { %v1636_v31 = vmul.f32 %v1635_v55, %v1633_v18  ;;  %v1423_v18 = vld [vmem:[%s3331_s3 + $0x150] sm:$0xff] }
 0x947   :  { %v1639_v61 = vadd.f32 %v1638_v19, %v1636_v31 }
 0x949   :  { %v1651_v2 = vmul.f32 %v3087_v47, %v1639_v61 }
 0x94a   :  { %v1366_v57 = vpop.f32.mrf.mxu0 }
 0x94b   :  { %1437 = vrot.lane.b32.xlu0 %v1366_v57, %s2389_s2  ;;  %v1679_v35 = vrot.slane %v1651_v2, 1 }
 0x952   :  { %v1521_v5 = vpop.f32.mrf.mxu0  ;;  %v3121_v51 = vpop.permute.xlu1 %1648 }
 0x953   :  { %v3091_v33 = vadd.f32 %v1521_v5, %v1497_v63 }
 0x955   :  { %v1529_v12 = vmul.f32 0.044715, %v3091_v33 }
 0x957   :  { %v1531_v38 = vmul.f32 %v1529_v12, %v3091_v33 }
 0x959   :  { %v1533_v14 = vmul.f32 %v1531_v38, %v3091_v33 }
 0x95a   :  { %v1524_v59 = vpop.f32.mrf.mxu0 }
 0x95b   :  { %v3107_v17 = vadd.f32 %v1524_v59, %v1497_v63  ;;  %v1535_v20 = vadd.f32 %v1533_v14, %v3091_v33  ;;  %v3135_v63 = vpop.permute.xlu1 %1666 }
 0x95d   :  { %v1530_v29 = vmul.f32 0.044715, %v3107_v17  ;;  %v1537_v54 = vmul.f32 0.7978846, %v1535_v20  ;;  %v1422_v20 = vld [vmem:[%s3331_s3 + $0x148] sm:$0xff] }
 0x95f   :  { %v1532_v16 = vmul.f32 %v1530_v29, %v3107_v17 }
 0x962   :  { %v1314_v13 = vpop.f32.mrf.mxu2  ;;  %v1340_v58 = vpop.f32.mrf.mxu3 }
 0x963   :  { %1435 = vrot.lane.b32.xlu1 %v1340_v58, %s2389_s2  ;;  %v3125_v58 = vshrl.u32 %v1656_v36, 7 }
 0x965   :  { %vm1681_vm9 = vcmp.lt.s32.totalorder %v3125_v58, 7  ;;  %vm1658_vm10 = vcmp.lt.s32.totalorder %v3125_v58, 1 }
 0x96a   :  { %v1418_v44 = vpop.f32.mrf.mxu2 }
 0x96b   :  { %1429 = vrot.lane.b32.xlu1 %v1314_v13, %s2387_s10  ;;  %1445 = vrot.lane.b32.xlu2 %v1418_v44, %s2388_s11  ;;  %v1534_v13 = vmul.f32 %v1532_v16, %v3107_v17  ;;  %v1653_v44 = vld [vmem:[%s3331_s3 + $0x160] sm:$0x7] }
 0x96c   :  { %v1674_v5 = vperm.slane %v1653_v44, 1  ;;  %v1694_v41 = vperm.slane %v1653_v44, 2 }
 0x96d   :  { %v1536_v43 = vadd.f32 %v1534_v13, %v3107_v17 }
 0x96e   :  { %v1675_v38 = vmul.f32 %v1674_v5, %v1651_v2 }
 0x96f   :  { %v1538_v11 = vmul.f32 0.7978846, %v1536_v43 }
 0x981   :  { %v1608_v45 = vpop.xlane.xlu0 %1607 }
 0x982   :  { %v1610_v4 = vmul.f32 %v1608_v45, %v2436_v10  ;;  %v1671_v45 = vperm.slane %v1653_v44, 0 }
 0x984   :  { %v1612_v7 = vadd.f32 1e-05, %v1610_v4  ;;  %v3137_v4 = vpop.permute.xlu2 %1685 }
 0x986   :  { %2316 = vrsqrt.f32 %v1612_v7  ;;  %vm1629_vm6 = vweird.f32 %v1612_v7 }
 0x987   :  { %2318 = vtanh.f32 %v1537_v54 }
 0x988   :  { %2320 = vtanh.f32 %v1538_v11 }
 0x98c   :  { %v2317_v62 = vpop.eup %2316 }
 0x98d   :  { %v1624_v52 = vmul.f32 %v2317_v62, %v1612_v7  ;;  %vm1630_vm5 = vweird.f32 %v2317_v62  ;;  %v2319_v12 = vpop.eup %2318 }
 0x98e   :  { %vm1631_vm7 = vmor %vm1629_vm6, %vm1630_vm5  ;;  %v1541_v14 = vadd.f32 1.0, %v2319_v12  ;;  %v2321_v54 = vpop.eup %2320 }
 0x98f   :  { %v1625_v0 = vmul.f32 %v2317_v62, %v1624_v52 }
 0x991   :  { %v1626_v28 = vmul.f32 0.5, %v1625_v0 }
 0x993   :  { %v1627_v30 = vsub.f32 1.5, %v1626_v28  ;;  %v1699_v28 = vperm.slane %v3114_v56, 1 }
 0x994   :  { %v3148_v27 = vpop.permute.xlu0 %1689 }
 0x995   :  { %v1628_v42 = vmul.f32 %v2317_v62, %v1627_v30 }
 0x997   :  { %v1632_v60 = vsel %vm1631_vm7, %v2317_v62, %v1628_v42  ;;  %v1527_v42 = vmul.f32 0.5, %v3091_v33  ;;  %v1421_v33 = vld [vmem:[%s3331_s3 + $0x140] sm:$0xff] }
 0x998   :  { %v1634_v1 = vmul.f32 %v1632_v60, %v3074_v8  ;;  %v1654_v8 = vrot.slane %v1651_v2, 7  ;;  %v1542_v2 = vadd.f32 1.0, %v2321_v54 }
 0x999   :  { %v1543_v61 = vmul.f32 %v1541_v14, %v1527_v42 }
 0x99a   :  { %v1637_v57 = vmul.f32 %v1635_v55, %v1634_v1  ;;  %v1424_v55 = vld [vmem:[%s3331_s3 + $0x158] sm:$0xff] }
 0x99b   :  { %1476 = vmatpush.msrb.mxu3 %v1424_v55  ;;  %v1771_v55 = vld [vmem:[%s3331_s3 + $0x170] sm:$0x7] }
 0x99c   :  { %v1640_v15 = vadd.f32 %v1638_v19, %v1637_v57 }
 0x99d   :  { %1477 = vmatpush.msrb.mxu3 %v1423_v18 }
 0x99e   :  { %v1652_v46 = vmul.f32 %v3121_v51, %v1640_v15  ;;  %v1528_v15 = vmul.f32 0.5, %v3107_v17 }
 0x99f   :  { %1478 = vmatpush.msrb.mxu3 %v1422_v20 }
 0x9a0   :  { %v1655_v49 = vrot.slane %v1652_v46, 7  ;;  %v1680_v6 = vrot.slane %v1652_v46, 1  ;;  %v1676_v29 = vmul.f32 %v1674_v5, %v1652_v46  ;;  %v1544_v46 = vmul.f32 %v1542_v2, %v1528_v15 }
 0x9a1   :  { %1479 = vmatpush.msrb.mxu3 %v1421_v33  ;;  %v1797_v15 = vperm.slane %v3114_v56, 4 }
 0x9a2   :  { %v1682_v7 = vsel %vm1681_vm9, %v1679_v35, %v1680_v6  ;;  %v1659_v40 = vsel %vm1658_vm10, %v1654_v8, %v1655_v49  ;;  %v1660_v50 = vsel %vm1658_vm10, %v1655_v49, %v1654_v8  ;;  %v1683_v37 = vsel %vm1681_vm9, %v1680_v6, %v1679_v35  ;;  %v1428_v8 = vpop.permute.xlu2 %1427 }
 0x9a3   :  { %v1692_v39 = vmul.f32 %v3137_v4, %v1682_v7  ;;  %v1669_v59 = vmul.f32 %v3083_v34, %v1660_v50  ;;  %v1670_v62 = vmul.f32 %v3135_v63, %v1659_v40  ;;  %v1693_v30 = vmul.f32 %v3148_v27, %v1683_v37 }
 0x9a4   :  { %v1449_v35 = vsel %vm383_vm8, %v3081_v32, %v1428_v8  ;;  %v1811_v32 = vld [vmem:[%s3331_s3 + $0x118] sm:$0xff] }
 0x9a5   :  { %v1672_v52 = vmul.f32 %v1671_v45, %v1669_v59  ;;  %v1673_v0 = vmul.f32 %v1671_v45, %v1670_v62  ;;  %v1695_v19 = vmul.f32 %v1694_v41, %v1692_v39  ;;  %v1696_v36 = vmul.f32 %v1694_v41, %v1693_v30  ;;  %v1810_v41 = vld [vmem:[%s3331_s3 + $0x110] sm:$0xff]  ;;  %1830 = vmatpush.msra.mxu3 %v1811_v32  ;;  %v1809_v39 = vld [vmem:[%s3331_s3 + $0x108] sm:$0xff] }
 0x9a6   :  { %v1708_v62 = vperm.slane %v3114_v56, 2 }
 0x9a7   :  { %v1677_v31 = vadd.f32 %v1675_v38, %v1672_v52  ;;  %v1678_v16 = vadd.f32 %v1676_v29, %v1673_v0  ;;  %1831 = vmatpush.msra.mxu3 %v1810_v41  ;;  %v1457_v41 = vperm.slane %v2997_v3, 4 }
 0x9a9   :  { %v1697_v60 = vadd.f32 %v1695_v19, %v1677_v31  ;;  %v1698_v13 = vadd.f32 %v1696_v36, %v1678_v16  ;;  %1832 = vmatpush.msra.mxu3 %v1809_v39  ;;  %v1778_v19 = vperm.slane %v1771_v55, 0  ;;  %v1781_v31 = vperm.slane %v1771_v55, 1 }
 0x9aa   :  { %v1444_v6 = vpop.permute.xlu2 %1443 }
 0x9ab   :  { %v1700_v1 = vadd.f32 %v1699_v28, %v1697_v60  ;;  %v1701_v44 = vadd.f32 %v1699_v28, %v1698_v13  ;;  %v1792_v60 = vperm.slane %v1771_v55, 2 }
 0x9ad   :  { %v1702_v57 = vmul.f32 %v1700_v1, %v1543_v61  ;;  %v1703_v43 = vmul.f32 %v1701_v44, %v1544_v46 }
 0x9af   :  { %2192 = vmatmul.msk.f32.vlgmr.msra.gmra.mxu2 %vm34_vm0, %v1702_v57 }
 0x9b7   :  { %2193 = vmatmul.msk.f32.gmra.mxu2 %vm34_vm0, %v1703_v43 }
 0x9bd   :  { %v1438_v7 = vpop.permute.xlu0 %1437 }
 0x9c5   :  { %v1446_v50 = vpop.permute.xlu2 %1445 }
 0x9d5   :  { %v1436_v49 = vpop.permute.xlu1 %1435 }
 0x9d6   :  { %v1452_v5 = vsel %vm1451_vm11, %v1449_v35, %v1436_v49 }
 0x9d7   :  { %v1455_v17 = vsel %vm1454_vm13, %v1452_v5, %v1444_v6 }
 0x9d8   :  { %2186 = vmatmul.msk.f32.vlgmr.msrb.gmra.mxu3 %vm34_vm0, %v1455_v17 }
 0x9dd   :  { %v1430_v45 = vpop.permute.xlu1 %1429 }
 0x9de   :  { %v1450_v40 = vsel %vm383_vm8, %v3079_v9, %v1430_v45  ;;  %v1808_v9 = vld [vmem:[%s3331_s3 + $0x100] sm:$0xff]  ;;  %v1805_v45 = vld [vmem:[%s3331_s3 + $0xf8] sm:$0xff] }
 0x9df   :  { %v1453_v11 = vsel %vm1451_vm11, %v1450_v40, %v1438_v7  ;;  %1833 = vmatpush.msra.mxu3 %v1808_v9  ;;  %v1804_v7 = vld [vmem:[%s3331_s3 + $0xf0] sm:$0xff]  ;;  %1859 = vmatpush.msrb.mxu0 %v1805_v45 }
 0x9e0   :  { %v1456_v12 = vsel %vm1454_vm13, %v1453_v11, %v1446_v50  ;;  %v1803_v50 = vld [vmem:[%s3331_s3 + $0xe8] sm:$0xff]  ;;  %v1802_v11 = vld [vmem:[%s3331_s3 + $0xe0] sm:$0xff] }
 0x9e1   :  { %2187 = vmatmul.msk.f32.gmra.mxu3 %vm34_vm0, %v1456_v12  ;;  %1860 = vmatpush.msrb.mxu0 %v1804_v7 }
 0x9e3   :  { %1861 = vmatpush.msrb.mxu0 %v1803_v50 }
 0x9e5   :  { %1862 = vmatpush.msrb.mxu0 %v1802_v11 }
 0xa32   :  { %v1732_v59 = vpop.f32.mrf.mxu2 }
 0xa33   :  { %v1733_v37 = vadd.f32 %v1732_v59, %v1708_v62 }
 0xa35   :  { %v1740_v52 = vmul.f32 %v1733_v37, %v3087_v47  ;;  %v1742_v37 = vld [vmem:[%s3331_s3 + $0x168] sm:$0x7] }
 0xa37   :  { %v1772_v14 = vrot.slane %v1740_v52, 7  ;;  %v1786_v28 = vrot.slane %v1740_v52, 1  ;;  %v1782_v57 = vmul.f32 %v1781_v31, %v1740_v52 }
 0xa3a   :  { %v1735_v38 = vpop.f32.mrf.mxu2 }
 0xa3b   :  { %v1736_v0 = vadd.f32 %v1735_v38, %v1708_v62 }
 0xa3d   :  { %v1741_v18 = vmul.f32 %v1736_v0, %v3121_v51 }
 0xa3f   :  { %v1773_v29 = vrot.slane %v1741_v18, 7  ;;  %v1787_v30 = vrot.slane %v1741_v18, 1  ;;  %v1783_v44 = vmul.f32 %v1781_v31, %v1741_v18 }
 0xa41   :  { %v1775_v20 = vsel %vm1658_vm10, %v1773_v29, %v1772_v14  ;;  %v1788_v42 = vsel %vm1681_vm9, %v1786_v28, %v1787_v30  ;;  %v1774_v16 = vsel %vm1658_vm10, %v1772_v14, %v1773_v29  ;;  %v1789_v54 = vsel %vm1681_vm9, %v1787_v30, %v1786_v28 }
 0xa42   :  { %v1776_v36 = vmul.f32 %v1775_v20, %v3083_v34  ;;  %v1790_v61 = vmul.f32 %v1788_v42, %v3137_v4  ;;  %v1777_v1 = vmul.f32 %v1774_v16, %v3135_v63  ;;  %v1791_v33 = vmul.f32 %v1789_v54, %v3148_v27 }
 0xa43   :  { %v1749_v14 = vperm.slane %v1742_v37, 0  ;;  %v1752_v28 = vperm.slane %v1742_v37, 1  ;;  %v1763_v30 = vperm.slane %v1742_v37, 2 }
 0xa44   :  { %v1779_v13 = vmul.f32 %v1778_v19, %v1776_v36  ;;  %v1780_v2 = vmul.f32 %v1778_v19, %v1777_v1  ;;  %v1793_v43 = vmul.f32 %v1792_v60, %v1790_v61  ;;  %v1794_v6 = vmul.f32 %v1792_v60, %v1791_v33 }
 0xa45   :  { %v1768_v36 = vperm.slane %v3114_v56, 3 }
 0xa46   :  { %v1784_v46 = vadd.f32 %v1782_v57, %v1779_v13  ;;  %v1785_v35 = vadd.f32 %v1783_v44, %v1780_v2 }
 0xa48   :  { %v1795_v8 = vadd.f32 %v1793_v43, %v1784_v46  ;;  %v1796_v17 = vadd.f32 %v1794_v6, %v1785_v35  ;;  %v1870_v43 = vperm.slane %v3114_v56, 5 }
 0xa4a   :  { %v1798_v49 = vadd.f32 %v1797_v15, %v1795_v8  ;;  %v1799_v40 = vadd.f32 %v1797_v15, %v1796_v17 }
 0xa4c   :  { %v1806_v5 = vadd.f32 %v1798_v49, %v1740_v52  ;;  %v1807_v12 = vadd.f32 %v1799_v40, %v1741_v18 }
 0xa4e   :  { %2194 = vmatmul.msk.f32.vlgmr.msra.gmra.mxu3 %vm34_vm0, %v1806_v5 }
 0xa56   :  { %2195 = vmatmul.msk.f32.gmra.mxu3 %vm34_vm0, %v1807_v12 }
 0xa5b   :  { %v1481_v32 = vpop.f32.mrf.mxu3 }
 0xa5c   :  { %v1482_v39 = vadd.f32 %v1481_v32, %v1457_v41 }
 0xa5e   :  { %v1738_v59 = vmul.f32 %v3087_v47, %v1482_v39 }
 0xa60   :  { %v1743_v52 = vrot.slane %v1738_v59, 7  ;;  %v1757_v0 = vrot.slane %v1738_v59, 1  ;;  %v1753_v42 = vmul.f32 %v1752_v28, %v1738_v59 }
 0xa64   :  { %v1484_v9 = vpop.f32.mrf.mxu3 }
 0xa65   :  { %v1485_v62 = vadd.f32 %v1484_v9, %v1457_v41 }
 0xa67   :  { %v1739_v38 = vmul.f32 %v3121_v51, %v1485_v62 }
 0xa69   :  { %v1744_v55 = vrot.slane %v1739_v38, 7  ;;  %v1758_v18 = vrot.slane %v1739_v38, 1  ;;  %v1754_v61 = vmul.f32 %v1752_v28, %v1739_v38 }
 0xa6b   :  { %v1746_v3 = vsel %vm1658_vm10, %v1744_v55, %v1743_v52  ;;  %v1759_v29 = vsel %vm1681_vm9, %v1757_v0, %v1758_v18  ;;  %v1745_v47 = vsel %vm1658_vm10, %v1743_v52, %v1744_v55  ;;  %v1760_v20 = vsel %vm1681_vm9, %v1758_v18, %v1757_v0 }
 0xa6c   :  { %v1747_v19 = vmul.f32 %v1746_v3, %v3083_v34  ;;  %v1761_v51 = vmul.f32 %v1759_v29, %v3137_v4  ;;  %v1748_v31 = vmul.f32 %v1745_v47, %v3135_v63  ;;  %v1762_v57 = vmul.f32 %v1760_v20, %v3148_v27 }
 0xa6e   :  { %v1750_v16 = vmul.f32 %v1749_v14, %v1747_v19  ;;  %v1751_v60 = vmul.f32 %v1749_v14, %v1748_v31  ;;  %v1764_v54 = vmul.f32 %v1763_v30, %v1761_v51  ;;  %v1765_v15 = vmul.f32 %v1763_v30, %v1762_v57  ;;  %v2341_v51 = vld [vmem:[%s3331_s3 + $0x178] sm:$0xff] }
 0xa6f   :  { %v1919_v31 = vperm.slane %v2341_v51, 6 }
 0xa70   :  { %v1755_v1 = vadd.f32 %v1753_v42, %v1750_v16  ;;  %v1756_v2 = vadd.f32 %v1754_v61, %v1751_v60  ;;  %v1922_v60 = vperm.slane %v2341_v51, 7 }
 0xa72   :  { %v1766_v13 = vadd.f32 %v1764_v54, %v1755_v1  ;;  %v1767_v44 = vadd.f32 %v1765_v15, %v1756_v2 }
 0xa74   :  { %v1769_v34 = vadd.f32 %v1768_v36, %v1766_v13  ;;  %v1770_v58 = vadd.f32 %v1768_v36, %v1767_v44  ;;  %v2020_v44 = vld [vmem:[%s3331_s3 + $0x70] sm:$0xff] }
 0xa76   :  { %v1800_v4 = vadd.f32 %v1769_v34, %v1738_v59  ;;  %v1801_v63 = vadd.f32 %v1770_v58, %v1739_v38  ;;  %v2019_v58 = vld [vmem:[%s3331_s3 + $0x68] sm:$0xff] }
 0xa78   :  { %2196 = vmatmul.msk.f32.vlgmr.msrb.gmra.mxu0 %vm34_vm0, %v1800_v4  ;;  %v2021_v4 = vld [vmem:[%s3331_s3 + $0x78] sm:$0xff] }
 0xa79   :  { %2037 = vmatpush.msrb.mxu2 %v2021_v4 }
 0xa7b   :  { %2038 = vmatpush.msrb.mxu2 %v2020_v44 }
 0xa7d   :  { %2039 = vmatpush.msrb.mxu2 %v2019_v58 }
 0xa80   :  { %2197 = vmatmul.msk.f32.gmra.mxu0 %vm34_vm0, %v1801_v63  ;;  %v2018_v63 = vld [vmem:[%s3331_s3 + $0x60] sm:$0xff] }
 0xa81   :  { %2040 = vmatpush.msrb.mxu2 %v2018_v63 }
 0xad1   :  { %v1835_v46 = vpop.f32.mrf.mxu3 }
 0xad9   :  { %v1838_v6 = vpop.f32.mrf.mxu3 }
 0xaf5   :  { %v1864_v33 = vpop.f32.mrf.mxu0 }
 0xaf6   :  { %v1865_v8 = vadd.f32 %v1864_v33, %v1835_v46  ;;  %v2017_v46 = vld [vmem:[%s3331_s3 + $0x58] sm:$0xff] }
 0xaf7   :  { %2041 = vmatpush.msrb.mxu2 %v2017_v46 }
 0xaf8   :  { %v1871_v35 = vadd.f32 %v1870_v43, %v1865_v8  ;;  %v2015_v8 = vld [vmem:[%s3331_s3 + $0x48] sm:$0xff] }
 0xafa   :  { %v3244_v27 = vadd.f32 %v1871_v35, %v2516_v48 }
 0xafc   :  { %v1875_v49 = vsel %vm34_vm0, %v3244_v27, 0.0 }
 0xafd   :  { %v1867_v5 = vpop.f32.mrf.mxu0  ;;  %1876 = vadd.xlane.f32.xlu1 %v1875_v49  ;;  %v2014_v49 = vld [vmem:[%s3331_s3 + $0x40] sm:$0xff] }
 0xafe   :  { %v1868_v17 = vadd.f32 %v1867_v5, %v1838_v6 }
 0xb00   :  { %v1872_v45 = vadd.f32 %v1870_v43, %v1868_v17  ;;  %v2016_v43 = vld [vmem:[%s3331_s3 + $0x50] sm:$0xff] }
 0xb01   :  { %2042 = vmatpush.msrb.mxu2 %v2016_v43 }
 0xb02   :  { %v3249_v7 = vadd.f32 %v1872_v45, %v2521_v53 }
 0xb03   :  { %2043 = vmatpush.msrb.mxu2 %v2015_v8 }
 0xb04   :  { %v1878_v56 = vsel %vm34_vm0, %v3249_v7, 0.0 }
 0xb05   :  { %1879 = vadd.xlane.f32.xlu0 %v1878_v56  ;;  %2044 = vmatpush.msrb.mxu2 %v2014_v49 }
 0xb19   :  { %2254 = vrot.lane.b32.xlu0 %v2253_v26, %s2383_s14 }
 0xb70   :  { %v1877_v48 = vpop.xlane.xlu1 %1876 }
 0xb71   :  { %v1881_v40 = vmul.f32 %v1877_v48, %v2436_v10 }
 0xb73   :  { %v1883_v50 = vsub.f32 %v3244_v27, %v1881_v40 }
 0xb75   :  { %v1885_v11 = vmul.f32 %v1883_v50, %v1883_v50 }
 0xb77   :  { %v1887_v12 = vsel %vm34_vm0, %v1885_v11, 0.0 }
 0xb78   :  { %1888 = vadd.xlane.f32.xlu2 %v1887_v12  ;;  %v1880_v53 = vpop.xlane.xlu0 %1879 }
 0xb79   :  { %v1882_v32 = vmul.f32 %v1880_v53, %v2436_v10 }
 0xb7b   :  { %v1884_v41 = vsub.f32 %v3249_v7, %v1882_v32 }
 0xb7d   :  { %v1886_v39 = vmul.f32 %v1884_v41, %v1884_v41 }
 0xb7f   :  { %v1890_v9 = vsel %vm34_vm0, %v1886_v39, 0.0 }
 0xb80   :  { %1891 = vadd.xlane.f32.xlu1 %v1890_v9 }
 0xb8b   :  { %v2255_v62 = vpop.permute.xlu0 %2254 }
 0xb8c   :  { %v2257_v14 = vunpack.i.h.bf16 %v2255_v62 }
 0xb90   :  { %2249 = vrot.lane.b32.xlu2 %v2248_v25, %s2383_s14  ;;  %v2256_v25 = vunpack.i.l.bf16 %v2255_v62 }
 0xb99   :  { %1942 = vrot.lane.b32.xlu1 %v2340_v23, %s2383_s14 }
 0xbeb   :  { %v1889_v24 = vpop.xlane.xlu2 %1888 }
 0xbec   :  { %v1893_v26 = vmul.f32 %v1889_v24, %v2436_v10 }
 0xbee   :  { %v1895_v59 = vadd.f32 1e-05, %v1893_v26 }
 0xbf0   :  { %2322 = vrsqrt.f32 %v1895_v59  ;;  %vm1903_vm14 = vweird.f32 %v1895_v59 }
 0xbf3   :  { %v1892_v37 = vpop.xlane.xlu1 %1891  ;;  %v2250_v38 = vpop.permute.xlu2 %2249 }
 0xbf4   :  { %v1894_v52 = vmul.f32 %v1892_v37, %v2436_v10  ;;  %v2252_v0 = vunpack.i.h.bf16 %v2250_v38  ;;  %v2251_v55 = vunpack.i.l.bf16 %v2250_v38 }
 0xbf6   :  { %v2323_v21 = vpop.eup %2322  ;;  %v1896_v22 = vadd.f32 1e-05, %v1894_v52  ;;  %1963 = vmatpush.msra.mxu1 %v2251_v55 }
 0xbf7   :  { %v1898_v18 = vmul.f32 %v2323_v21, %v1895_v59  ;;  %vm1904_vm8 = vweird.f32 %v2323_v21 }
 0xbf8   :  { %2324 = vrsqrt.f32 %v1896_v22  ;;  %1964 = vmatpush.msra.mxu1 %v2252_v0  ;;  %vm1905_vm15 = vmor %vm1903_vm14, %vm1904_vm8  ;;  %vm1913_vm2 = vweird.f32 %v1896_v22 }
 0xbf9   :  { %v1899_v28 = vmul.f32 %v2323_v21, %v1898_v18 }
 0xbfa   :  { %1965 = vmatpush.msra.mxu1 %v2256_v25 }
 0xbfb   :  { %v1900_v3 = vmul.f32 0.5, %v1899_v28 }
 0xbfc   :  { %1966 = vmatpush.msra.mxu1 %v2257_v14 }
 0xbfd   :  { %v1901_v29 = vsub.f32 1.5, %v1900_v3  ;;  %v3307_v3 = vld [vmem:[%s3331_s3 + $0x180] sm:$0xff]  ;;  %s2390_s3 = smov [#allocation2]  }
 0xbfe   :  { %v2325_v47 = vpop.eup %2324  ;;  %s2112_s22 = sshll.u32 %s2390_s3, 4  ;;  %s2113_s22 = int_to_ptr.vmem [resolvable:$true] %s2112_s22 }
 0xbff   :  { %v1902_v30 = vmul.f32 %v2323_v21, %v1901_v29  ;;  %v1908_v19 = vmul.f32 %v2325_v47, %v1896_v22  ;;  %vm1914_vm1 = vweird.f32 %v2325_v47  ;;  %v2022_v29 = vperm.slane %v3307_v3, 3 }
 0xc00   :  { %vm1915_vm3 = vmor %vm1913_vm2, %vm1914_vm1 }
 0xc01   :  { %v1906_v20 = vsel %vm1905_vm15, %v2323_v21, %v1902_v30  ;;  %v1909_v42 = vmul.f32 %v2325_v47, %v1908_v19 }
 0xc02   :  { %v1917_v16 = vmul.f32 %v1906_v20, %v1883_v50 }
 0xc03   :  { %v1910_v36 = vmul.f32 0.5, %v1909_v42 }
 0xc04   :  { %v1920_v61 = vmul.f32 %v1919_v31, %v1917_v16 }
 0xc05   :  { %v1911_v1 = vsub.f32 1.5, %v1910_v36 }
 0xc06   :  { %v1923_v54 = vadd.f32 %v1922_v60, %v1920_v61 }
 0xc07   :  { %v1912_v57 = vmul.f32 %v2325_v47, %v1911_v1 }
 0xc08   :  { %2198 = vmatmul.msk.f32.vlgmr.msra.gmra.mxu1 %vm34_vm0, %v1923_v54 }
 0xc09   :  { %v1916_v13 = vsel %vm1915_vm3, %v2325_v47, %v1912_v57 }
 0xc0a   :  { %v1918_v2 = vmul.f32 %v1916_v13, %v1884_v41 }
 0xc0b   :  { %v1943_v33 = vpop.permute.xlu1 %1942 }
 0xc0c   :  { %v1921_v34 = vmul.f32 %v1919_v31, %v1918_v2 }
 0xc0e   :  { %v1924_v15 = vadd.f32 %v1922_v60, %v1921_v34 }
 0xc10   :  { %2199 = vmatmul.msk.f32.gmra.mxu1 %vm34_vm0, %v1924_v15 }
 0xc85   :  { %v1968_v35 = vpop.f32.mrf.mxu1 }
 0xc86   :  { %v1969_v6 = vadd.f32 %v1968_v35, %v1943_v33 }
 0xc88   :  { %v2200_v5 = vmul.f32 -1.442695, %v1969_v6 }
 0xc8a   :  { %2326 = vpow2.f32 %v2200_v5 }
 0xc8d   :  { %v1971_v17 = vpop.f32.mrf.mxu1 }
 0xc8e   :  { %v1972_v45 = vadd.f32 %v1971_v17, %v1943_v33 }
 0xc90   :  { %v2327_v56 = vpop.eup %2326  ;;  %v2201_v48 = vmul.f32 -1.442695, %v1972_v45 }
 0xc91   :  { %v1980_v40 = vadd.f32 1.0, %v2327_v56  ;;  %v2100_v56 = vperm.slane %v3307_v3, 0 }
 0xc92   :  { %2328 = vpow2.f32 %v2201_v48 }
 0xc93   :  { %2330 = vrcp.f32 %v1980_v40  ;;  %v1993_v41 = vand.u32 2147483648, %v1980_v40  ;;  %v1991_v9 = vand.u32 2147483647, %v1980_v40  ;;  %vm1987_vm5 = vweird.f32 %v1980_v40 }
 0xc95   :  { %v1994_v26 = vor.u32 1.1754944e-38, %v1993_v41  ;;  %vm1992_vm7 = vcmp.eq.f32.partialorder %v1991_v9, 8.507059e+37 }
 0xc98   :  { %v2329_v50 = vpop.eup %2328 }
 0xc99   :  { %v2331_v11 = vpop.eup %2330  ;;  %v1981_v12 = vadd.f32 1.0, %v2329_v50 }
 0xc9a   :  { %v1983_v53 = vmul.f32 %v2331_v11, %v1980_v40  ;;  %vm1988_vm4 = vweird.f32 %v2331_v11 }
 0xc9b   :  { %2332 = vrcp.f32 %v1981_v12  ;;  %vm1989_vm6 = vmor %vm1987_vm5, %vm1988_vm4  ;;  %v2008_v0 = vand.u32 2147483648, %v1981_v12  ;;  %v2006_v21 = vand.u32 2147483647, %v1981_v12  ;;  %vm2002_vm10 = vweird.f32 %v1981_v12 }
 0xc9c   :  { %v1984_v32 = vsub.f32 1.0, %v1983_v53 }
 0xc9d   :  { %v2009_v25 = vor.u32 1.1754944e-38, %v2008_v0  ;;  %vm2007_vm13 = vcmp.eq.f32.partialorder %v2006_v21, 8.507059e+37 }
 0xc9e   :  { %v1985_v39 = vmul.f32 %v2331_v11, %v1984_v32 }
 0xca0   :  { %v1986_v23 = vadd.f32 %v2331_v11, %v1985_v39 }
 0xca1   :  { %v2333_v24 = vpop.eup %2332 }
 0xca2   :  { %v1990_v59 = vsel %vm1989_vm6, %v2331_v11, %v1986_v23  ;;  %v1998_v62 = vmul.f32 %v2333_v24, %v1981_v12  ;;  %vm2003_vm9 = vweird.f32 %v2333_v24 }
 0xca3   :  { %v1995_v37 = vsel %vm1992_vm7, %v1994_v26, %v1990_v59  ;;  %vm2004_vm11 = vmor %vm2002_vm10, %vm2003_vm9 }
 0xca4   :  { %v2012_v38 = vmul.f32 %v1995_v37, %v1969_v6  ;;  %v1999_v52 = vsub.f32 1.0, %v1998_v62 }
 0xca6   :  { %v2000_v55 = vmul.f32 %v2333_v24, %v1999_v52  ;;  %2202 = vmatmul.msk.f32.vlgmr.msrb.gmra.mxu2 %vm171_vm12, %v2012_v38 }
 0xca8   :  { %v2001_v22 = vadd.f32 %v2333_v24, %v2000_v55 }
 0xcaa   :  { %v2005_v18 = vsel %vm2004_vm11, %v2333_v24, %v2001_v22 }
 0xcab   :  { %v2010_v14 = vsel %vm2007_vm13, %v2009_v25, %v2005_v18 }
 0xcac   :  { %v2013_v28 = vmul.f32 %v2010_v14, %v1972_v45 }
 0xcae   :  { %2203 = vmatmul.msk.f32.gmra.mxu2 %vm171_vm12, %v2013_v28 }
 0xd29   :  { %v2046_v47 = vpop.f32.mrf.mxu2 }
 0xd2a   :  { %v2047_v30 = vadd.f32 %v2046_v47, %v2022_v29 }
 0xd2c   :  { %v2052_v19 = vmul.f32 0.5, %v2047_v30 }
 0xd2e   :  { %v2054_v51 = vadd.f32 %v2052_v19, %v3244_v27 }
 0xd30   :  { %v2056_v31 = vsel %vm34_vm0, %v2054_v51, 0.0 }
 0xd31   :  { %v2049_v20 = vpop.f32.mrf.mxu2  ;;  %2057 = vadd.xlane.f32.xlu0 %v2056_v31 }
 0xd32   :  { %v2050_v42 = vadd.f32 %v2049_v20, %v2022_v29 }
 0xd34   :  { %v2053_v16 = vmul.f32 0.5, %v2050_v42 }
 0xd36   :  { %v2055_v60 = vadd.f32 %v2053_v16, %v3249_v7 }
 0xd38   :  { %v2059_v36 = vsel %vm34_vm0, %v2055_v60, 0.0 }
 0xd39   :  { %2060 = vadd.xlane.f32.xlu2 %v2059_v36 }
 0xda4   :  { %v2058_v61 = vpop.xlane.xlu0 %2057 }
 0xda5   :  { %v2062_v1 = vmul.f32 %v2058_v61, %v2436_v10 }
 0xda7   :  { %v2064_v54 = vsub.f32 %v2054_v51, %v2062_v1 }
 0xda9   :  { %v2066_v57 = vmul.f32 %v2064_v54, %v2064_v54 }
 0xdab   :  { %v2068_v13 = vsel %vm34_vm0, %v2066_v57, 0.0 }
 0xdac   :  { %v2061_v2 = vpop.xlane.xlu2 %2060  ;;  %2069 = vadd.xlane.f32.xlu1 %v2068_v13 }
 0xdad   :  { %v2063_v27 = vmul.f32 %v2061_v2, %v2436_v10 }
 0xdaf   :  { %v2065_v34 = vsub.f32 %v2055_v60, %v2063_v27 }
 0xdb1   :  { %v2067_v15 = vmul.f32 %v2065_v34, %v2065_v34 }
 0xdb3   :  { %v2071_v4 = vsel %vm34_vm0, %v2067_v15, 0.0 }
 0xdb4   :  { %2072 = vadd.xlane.f32.xlu0 %v2071_v4 }
 0xe1f   :  { %v2070_v7 = vpop.xlane.xlu1 %2069 }
 0xe20   :  { %v2074_v44 = vmul.f32 %v2070_v7, %v2436_v10 }
 0xe22   :  { %v2076_v58 = vadd.f32 1e-05, %v2074_v44 }
 0xe24   :  { %2334 = vrsqrt.f32 %v2076_v58  ;;  %vm2084_vm8 = vweird.f32 %v2076_v58 }
 0xe27   :  { %v2073_v63 = vpop.xlane.xlu0 %2072 }
 0xe28   :  { %v2075_v46 = vmul.f32 %v2073_v63, %v2436_v10  ;;  %v2103_v10 = vperm.slane %v3307_v3, 1 }
 0xe2a   :  { %v2335_v43 = vpop.eup %2334  ;;  %v2077_v33 = vadd.f32 1e-05, %v2075_v46 }
 0xe2b   :  { %v2079_v8 = vmul.f32 %v2335_v43, %v2076_v58  ;;  %vm2085_vm12 = vweird.f32 %v2335_v43 }
 0xe2c   :  { %2336 = vrsqrt.f32 %v2077_v33  ;;  %vm2086_vm14 = vmor %vm2084_vm8, %vm2085_vm12  ;;  %vm2094_vm1 = vweird.f32 %v2077_v33 }
 0xe2d   :  { %v2080_v35 = vmul.f32 %v2335_v43, %v2079_v8 }
 0xe2f   :  { %v2081_v49 = vmul.f32 0.5, %v2080_v35 }
 0xe31   :  { %v2082_v6 = vsub.f32 1.5, %v2081_v49 }
 0xe32   :  { %v2337_v5 = vpop.eup %2336 }
 0xe33   :  { %v2083_v17 = vmul.f32 %v2335_v43, %v2082_v6  ;;  %v2089_v45 = vmul.f32 %v2337_v5, %v2077_v33  ;;  %vm2095_vm15 = vweird.f32 %v2337_v5 }
 0xe34   :  { %vm2096_vm2 = vmor %vm2094_vm1, %vm2095_vm15 }
 0xe35   :  { %v2087_v48 = vsel %vm2086_vm14, %v2335_v43, %v2083_v17  ;;  %v2090_v40 = vmul.f32 %v2337_v5, %v2089_v45 }
 0xe36   :  { %v2098_v50 = vmul.f32 %v2087_v48, %v2064_v54 }
 0xe37   :  { %v2091_v11 = vmul.f32 0.5, %v2090_v40 }
 0xe38   :  { %v2101_v12 = vmul.f32 %v2100_v56, %v2098_v50 }
 0xe39   :  { %v2092_v53 = vsub.f32 1.5, %v2091_v11 }
 0xe3a   :  { %v2104_v32 = vadd.f32 %v2103_v10, %v2101_v12 }
 0xe3b   :  { %v2093_v41 = vmul.f32 %v2337_v5, %v2092_v53 }
 0xe3c   :  { %2106 = vst.msk [vmem:[#allocation2] sm:$0xff] %vm34_vm0, %v2104_v32 }
 0xe3d   :  { %v2097_v39 = vsel %vm2096_vm2, %v2337_v5, %v2093_v41 }
 0xe3e   :  { %v2099_v9 = vmul.f32 %v2097_v39, %v2065_v34 }
 0xe40   :  { %v2102_v23 = vmul.f32 %v2100_v56, %v2099_v9 }
 0xe42   :  { %v2105_v24 = vadd.f32 %v2103_v10, %v2102_v23 }
 0xe44   :  { %2107 = vst.msk [vmem:[#allocation2 + $0x8] sm:$0xff] %vm34_vm0, %v2105_v24 }
 0xe45   :  { %2120 = dma.vmem_to_hbm [thread:$0]  %s2113_s22, 256, %s2115_s25, [#allocation3], %s2391_s26, %s2391_s26, %s2387_s10  }
 0xe46   :  { %2367 = dma.done.wait [#allocation3], 256  }
 0xe47   :  { %2368 = vsyncadd [#allocation3], 4294967040 }
 0xe48   :  { %2125 = vsyncpa [#allocation3], 1 }

// kernel: tpu_custom_call.1
= control target key start
LH: loop header
LB: loop body
LE: loop exit
PB: predicated region body
PF: predicated region fallthrough
CT: control target
= control target key end

     0   :  { %vm34_vm0 = vcmask 261120   ;;  %s3348_s0 = inlined_call_operand.vmem [shape: f32[16,32], index: 0, kind: input, shape index: {}]   ;;  %s3349_s1 = inlined_call_operand.vmem [shape: f32[32,32], index: 1, kind: input, shape index: {}]   ;;  %s3350_s2 = inlined_call_operand.vmem [shape: f32[24,32], index: 2, kind: input, shape index: {}]   ;;  %s3351_s3 = inlined_call_operand.vmem [shape: f32[400,32], index: 3, kind: input, shape index: {}]   ;;  %s3352_s4 = inlined_call_operand.vmem [shape: f32[80,128], index: 4, kind: input, shape index: {}]   ;;  %s3353_s5 = inlined_call_operand.hbm [shape: f32[16,32], index: 5, kind: output, shape index: {}]  }
   0x1   :  { %v2506_v0 = vld [vmem:[%s3348_s0] sm:$0xff] }
   0x2   :  { %v35_v1 = vsel %vm34_vm0, %v2506_v0, 0.0 }
   0x3   :  { %10 = vsyncpa [#allocation3], 0  ;;  %36 = vadd.xlane.f32.xlu0 %v35_v1  ;;  %v2513_v2 = vld [vmem:[%s3348_s0 + $0x8] sm:$0xff]  ;;  %v2452_v4 = vmov 32.0   ;;  %v2528_v21 = vld [vmem:[%s3352_s4 + $0x40] sm:$0xff]  ;;  %vm171_vm12 = vcmask 523264  }
   0x4   :  { %v38_v3 = vsel %vm34_vm0, %v2513_v2, 0.0  ;;  %2345 = vrcp.f32 %v2452_v4  ;;  %111 = vmatpush.msra.mxu0 %v2528_v21  ;;  %2287 = vmatpush.msra.mxu2 %v2528_v21  ;;  %v2535_v22 = vld [vmem:[%s3352_s4 + $0x38] sm:$0xff]  ;;  %v2542_v23 = vld [vmem:[%s3352_s4 + $0x30] sm:$0xff]  ;;  %v2549_v24 = vld [vmem:[%s3352_s4 + $0x28] sm:$0xff]  ;;  %s2453_s24 = smov 120   ;;  %s2454_s25 = smov 32  }
   0x5   :  { %v2332_v25 = vpack.i.bf16 %v2535_v22, %v2528_v21  ;;  %v2337_v26 = vpack.i.bf16 %v2549_v24, %v2542_v23  ;;  %v2562_v38 = vld [vmem:[%s3351_s3 + $0x178] sm:$0xff]  ;;  %v168_v57 = vld [vmem:[%s3351_s3 + $0x30] sm:$0xff]  ;;  %v167_v58 = vld [vmem:[%s3351_s3 + $0x28] sm:$0xff]  ;;  %s2455_s26 = smov 112   ;;  %s2456_s27 = smov 104  }
   0x6   :  { %112 = vmatpush.msra.mxu0 %v2535_v22  ;;  %2288 = vmatpush.msra.mxu2 %v2535_v22  ;;  %v86_v42 = vperm.slane %v2562_v38, 0  ;;  %v89_v46 = vperm.slane %v2562_v38, 1  ;;  %v169_v56 = vld [vmem:[%s3351_s3 + $0x38] sm:$0xff]  ;;  %v166_v59 = vld [vmem:[%s3351_s3 + $0x20] sm:$0xff]  ;;  %v164_v61 = vld [vmem:[%s3351_s3 + $0x10] sm:$0xff]  ;;  %s2457_s28 = smov 96  }
   0x7   :  { %186 = vmatpush.msra.mxu1 %v169_v56  ;;  %v165_v60 = vld [vmem:[%s3351_s3 + $0x18] sm:$0xff]  ;;  %v2343_v62 = vld [vmem:[%s3352_s4 + $0x48] ss:$0 sm:$0xff]  ;;  %v162_v1 = vld [vmem:[%s3351_s3] sm:$0xff]  ;;  %s2458_s29 = smov 2   ;;  %s2459_s30 = smov 1  }
   0x8   :  { %113 = vmatpush.msra.mxu0 %v2542_v23  ;;  %2289 = vmatpush.msra.mxu2 %v2542_v23  ;;  %v163_v63 = vld [vmem:[%s3351_s3 + $0x8] sm:$0xff]  ;;  %s2460_s6 = smov 4   ;;  %s2461_s7 = smov 5  }
   0x9   :  { %187 = vmatpush.msra.mxu1 %v168_v57  ;;  %s2462_s8 = smov 3   ;;  %s2463_s9 = smov 7  }
   0xa   :  { %v2346_v5 = vpop.eup %2345  ;;  %114 = vmatpush.msra.mxu0 %v2549_v24  ;;  %2290 = vmatpush.msra.mxu2 %v2549_v24  ;;  %s2464_s10 = smov 6   ;;  %s2465_s11 = smov 121  }
   0xb   :  { %39 = vadd.xlane.f32.xlu0 %v38_v3  ;;  %v42_v6 = vmul.f32 32.0, %v2346_v5  ;;  %vm46_vm1 = vweird.f32 %v2346_v5  ;;  %188 = vmatpush.msra.mxu1 %v167_v58  ;;  %s2466_s12 = smov 64   ;;  %s2191_s17 = sshll.u32 %s3353_s5, 4  ;;  %s2192_s17 = int_to_ptr.hbm [resolvable:$true] %s2191_s17 }
   0xc   :  { %s2471_s18 = smov 128   ;;  %s2472_s19 = smov 8  }
   0xd   :  { %v43_v7 = vsub.f32 1.0, %v42_v6  ;;  %189 = vmatpush.msra.mxu1 %v166_v59 }
   0xf   :  { %v44_v8 = vmul.f32 %v2346_v5, %v43_v7  ;;  %190 = vmatpush.msra.mxu1 %v165_v60 }
  0x11   :  { %v45_v9 = vadd.f32 %v2346_v5, %v44_v8  ;;  %191 = vmatpush.msra.mxu1 %v164_v61 }
  0x13   :  { %v2517_v10 = vsel %vm46_vm1, %v2346_v5, %v45_v9  ;;  %192 = vmatpush.msra.mxu1 %v163_v63  ;;  %v297_v63 = vld [vmem:[%s3351_s3 + $0x138] sm:$0xff] }
  0x14   :  { %322 = vmatpush.msra.mxu3 %v297_v63 }
  0x15   :  { %193 = vmatpush.msra.mxu1 %v162_v1  ;;  %v296_v1 = vld [vmem:[%s3351_s3 + $0x130] sm:$0xff] }
  0x16   :  { %323 = vmatpush.msra.mxu3 %v296_v1 }
  0x76   :  { %v37_v11 = vpop.xlane.xlu0 %36 }
  0x77   :  { %v48_v12 = vmul.f32 %v2517_v10, %v37_v11 }
  0x79   :  { %v50_v13 = vsub.f32 %v2506_v0, %v48_v12 }
  0x7b   :  { %v52_v14 = vmul.f32 %v50_v13, %v50_v13 }
  0x7d   :  { %v54_v15 = vsel %vm34_vm0, %v52_v14, 0.0 }
  0x7e   :  { %55 = vadd.xlane.f32.xlu1 %v54_v15  ;;  %v40_v16 = vpop.xlane.xlu0 %39 }
  0x7f   :  { %v49_v17 = vmul.f32 %v2517_v10, %v40_v16 }
  0x81   :  { %v51_v18 = vsub.f32 %v2513_v2, %v49_v17 }
  0x83   :  { %v53_v19 = vmul.f32 %v51_v18, %v51_v18 }
  0x85   :  { %v57_v20 = vsel %vm34_vm0, %v53_v19, 0.0 }
  0x86   :  { %58 = vadd.xlane.f32.xlu1 %v57_v20 }
  0xf1   :  { %v56_v27 = vpop.xlane.xlu1 %55 }
  0xf2   :  { %v60_v28 = vmul.f32 %v56_v27, %v2517_v10 }
  0xf4   :  { %v62_v29 = vadd.f32 1e-05, %v60_v28 }
  0xf6   :  { %2347 = vrsqrt.f32 %v62_v29  ;;  %vm70_vm3 = vweird.f32 %v62_v29 }
  0xf9   :  { %v59_v30 = vpop.xlane.xlu1 %58 }
  0xfa   :  { %v61_v31 = vmul.f32 %v59_v30, %v2517_v10 }
  0xfc   :  { %v2348_v32 = vpop.eup %2347  ;;  %v63_v33 = vadd.f32 1e-05, %v61_v31 }
  0xfd   :  { %v65_v34 = vmul.f32 %v2348_v32, %v62_v29  ;;  %vm71_vm2 = vweird.f32 %v2348_v32 }
  0xfe   :  { %2349 = vrsqrt.f32 %v63_v33  ;;  %vm72_vm4 = vmor %vm70_vm3, %vm71_vm2  ;;  %vm80_vm6 = vweird.f32 %v63_v33 }
  0xff   :  { %v66_v35 = vmul.f32 %v2348_v32, %v65_v34 }
 0x101   :  { %v67_v36 = vmul.f32 0.5, %v66_v35 }
 0x103   :  { %v68_v37 = vsub.f32 1.5, %v67_v36 }
 0x104   :  { %v2350_v39 = vpop.eup %2349 }
 0x105   :  { %v69_v40 = vmul.f32 %v2348_v32, %v68_v37  ;;  %v75_v41 = vmul.f32 %v2350_v39, %v63_v33  ;;  %vm81_vm5 = vweird.f32 %v2350_v39 }
 0x106   :  { %vm82_vm7 = vmor %vm80_vm6, %vm81_vm5 }
 0x107   :  { %v73_v43 = vsel %vm72_vm4, %v2348_v32, %v69_v40  ;;  %v76_v44 = vmul.f32 %v2350_v39, %v75_v41 }
 0x108   :  { %v84_v45 = vmul.f32 %v73_v43, %v50_v13  ;;  %v22_v43 = vld [vmem:[%s3351_s3 + $0x180] sm:$0xff] }
 0x109   :  { %v77_v47 = vmul.f32 0.5, %v76_v44  ;;  %v170_v44 = vperm.slane %v22_v43, 2 }
 0x10a   :  { %v87_v48 = vmul.f32 %v86_v42, %v84_v45 }
 0x10b   :  { %v78_v49 = vsub.f32 1.5, %v77_v47 }
 0x10c   :  { %v90_v50 = vadd.f32 %v89_v46, %v87_v48 }
 0x10d   :  { %v79_v51 = vmul.f32 %v2350_v39, %v78_v49 }
 0x10e   :  { %2203 = vmatmul.msk.f32.vlgmr.msra.gmra.mxu0 %vm34_vm0, %v90_v50 }
 0x10f   :  { %v83_v52 = vsel %vm82_vm7, %v2350_v39, %v79_v51 }
 0x110   :  { %v85_v53 = vmul.f32 %v83_v52, %v51_v18 }
 0x112   :  { %v88_v54 = vmul.f32 %v86_v42, %v85_v53 }
 0x114   :  { %v91_v55 = vadd.f32 %v89_v46, %v88_v54 }
 0x116   :  { %2204 = vmatmul.msk.f32.vlgmr.msra.gmra.mxu2 %vm34_vm0, %v91_v55 }
 0x18b   :  { %v116_v3 = vpop.f32.mrf.mxu0 }
 0x18c   :  { %v117_v4 = vadd.f32 %v2343_v62, %v116_v3  ;;  %v295_v3 = vld [vmem:[%s3351_s3 + $0x128] sm:$0xff] }
 0x18d   :  { %324 = vmatpush.msra.mxu3 %v295_v3 }
 0x18e   :  { %v2205_v5 = vmul.f32 -1.442695, %v117_v4 }
 0x190   :  { %2351 = vpow2.f32 %v2205_v5  ;;  %v294_v5 = vld [vmem:[%s3351_s3 + $0x120] sm:$0xff] }
 0x191   :  { %325 = vmatpush.msra.mxu3 %v294_v5 }
 0x196   :  { %v2352_v6 = vpop.eup %2351 }
 0x197   :  { %v128_v7 = vadd.f32 1.0, %v2352_v6  ;;  %v290_v6 = vld [vmem:[%s3349_s1] sm:$0xff] }
 0x198   :  { %2211 = vmatmul.msk.f32.vlgmr.msra.gmra.mxu3 %vm34_vm0, %v290_v6 }
 0x199   :  { %2353 = vrcp.f32 %v128_v7  ;;  %v119_v8 = vpop.f32.mrf.mxu2  ;;  %v141_v15 = vand.u32 2147483648, %v128_v7  ;;  %v139_v18 = vand.u32 2147483647, %v128_v7  ;;  %vm135_vm9 = vweird.f32 %v128_v7 }
 0x19a   :  { %v120_v9 = vadd.f32 %v2343_v62, %v119_v8  ;;  %v256_v8 = vld [vmem:[%s3352_s4 + $0x8] sm:$0xff] }
 0x19b   :  { %v142_v27 = vor.u32 1.1754944e-38, %v141_v15  ;;  %vm140_vm11 = vcmp.eq.f32.partialorder %v139_v18, 8.507059e+37  ;;  %v292_v15 = vld [vmem:[%s3349_s1 + $0x10] sm:$0xff]  ;;  %v293_v18 = vld [vmem:[%s3349_s1 + $0x18] sm:$0xff] }
 0x19c   :  { %v2206_v11 = vmul.f32 -1.442695, %v120_v9 }
 0x19e   :  { %2355 = vpow2.f32 %v2206_v11  ;;  %v291_v11 = vld [vmem:[%s3349_s1 + $0x8] sm:$0xff] }
 0x19f   :  { %v2354_v12 = vpop.eup %2353 }
 0x1a0   :  { %v131_v13 = vmul.f32 %v2354_v12, %v128_v7  ;;  %vm136_vm8 = vweird.f32 %v2354_v12  ;;  %v257_v7 = vld [vmem:[%s3352_s4 + $0x10] sm:$0xff]  ;;  %2212 = vmatmul.msk.f32.gmra.mxu3 %vm34_vm0, %v291_v11 }
 0x1a1   :  { %vm137_vm10 = vmor %vm135_vm9, %vm136_vm8  ;;  %vm383_vm8 = vcmask 64512   ;;  %vm782_vm9 = vcmask 1040384  }
 0x1a2   :  { %v132_v14 = vsub.f32 1.0, %v131_v13 }
 0x1a4   :  { %v2356_v16 = vpop.eup %2355  ;;  %v133_v17 = vmul.f32 %v2354_v12, %v132_v14 }
 0x1a5   :  { %v129_v19 = vadd.f32 1.0, %v2356_v16 }
 0x1a6   :  { %v134_v20 = vadd.f32 %v2354_v12, %v133_v17 }
 0x1a7   :  { %2357 = vrcp.f32 %v129_v19  ;;  %v156_v34 = vand.u32 2147483648, %v129_v19  ;;  %v154_v36 = vand.u32 2147483647, %v129_v19  ;;  %vm150_vm14 = vweird.f32 %v129_v19 }
 0x1a8   :  { %v138_v28 = vsel %vm137_vm10, %v2354_v12, %v134_v20  ;;  %2213 = vmatmul.msk.f32.gmra.mxu3 %vm34_vm0, %v292_v15  ;;  %vm791_vm10 = vcmask 1041408  }
 0x1a9   :  { %v143_v29 = vsel %vm140_vm11, %v142_v27, %v138_v28  ;;  %v157_v39 = vor.u32 1.1754944e-38, %v156_v34  ;;  %vm155_vm1 = vcmp.eq.f32.partialorder %v154_v36, 8.507059e+37  ;;  %vm800_vm11 = vcmask 1042432  }
 0x1aa   :  { %v160_v30 = vmul.f32 %v143_v29, %v117_v4  ;;  %v258_v4 = vld [vmem:[%s3352_s4 + $0x18] sm:$0xff] }
 0x1ab   :  { %279 = vmatpush.msrb.mxu2 %v258_v4 }
 0x1ac   :  { %2207 = vmatmul.msk.f32.vlgmr.msra.gmra.mxu1 %vm171_vm12, %v160_v30 }
 0x1ad   :  { %v2358_v31 = vpop.eup %2357  ;;  %280 = vmatpush.msrb.mxu2 %v257_v7 }
 0x1ae   :  { %v146_v32 = vmul.f32 %v2358_v31, %v129_v19  ;;  %vm151_vm13 = vweird.f32 %v2358_v31 }
 0x1af   :  { %vm152_vm15 = vmor %vm150_vm14, %vm151_vm13  ;;  %281 = vmatpush.msrb.mxu2 %v256_v8  ;;  %vm809_vm13 = vcmask 1043456   ;;  %vm818_vm14 = vcmask 1044480  }
 0x1b0   :  { %v147_v33 = vsub.f32 1.0, %v146_v32  ;;  %2214 = vmatmul.msk.f32.gmra.mxu3 %vm34_vm0, %v293_v18  ;;  %v249_v32 = vperm.slane %v2562_v38, 2 }
 0x1b2   :  { %v148_v35 = vmul.f32 %v2358_v31, %v147_v33 }
 0x1b4   :  { %v149_v37 = vadd.f32 %v2358_v31, %v148_v35  ;;  %v252_v35 = vperm.slane %v2562_v38, 3 }
 0x1b6   :  { %v153_v40 = vsel %vm152_vm15, %v2358_v31, %v149_v37  ;;  %vm827_vm15 = vcmask 1045504  }
 0x1b7   :  { %v158_v41 = vsel %vm155_vm1, %v157_v39, %v153_v40  ;;  %vm836_vm1 = vcmask 1046528  }
 0x1b8   :  { %v161_v42 = vmul.f32 %v158_v41, %v120_v9  ;;  %v255_v9 = vld [vmem:[%s3352_s4] sm:$0xff] }
 0x1b9   :  { %282 = vmatpush.msrb.mxu2 %v255_v9 }
 0x1ba   :  { %2208 = vmatmul.msk.f32.gmra.mxu1 %vm171_vm12, %v161_v42 }
 0x229   :  { %v195_v45 = vpop.f32.mrf.mxu1 }
 0x22a   :  { %v196_v46 = vadd.f32 %v195_v45, %v170_v44 }
 0x22c   :  { %v201_v47 = vmul.f32 0.5, %v196_v46 }
 0x22e   :  { %v2601_v48 = vadd.f32 %v201_v47, %v2506_v0 }
 0x230   :  { %v205_v49 = vsel %vm34_vm0, %v2601_v48, 0.0 }
 0x231   :  { %206 = vadd.xlane.f32.xlu2 %v205_v49  ;;  %v327_v49 = vpop.f32.mrf.mxu3 }
 0x237   :  { %v198_v50 = vpop.f32.mrf.mxu1 }
 0x238   :  { %v199_v51 = vadd.f32 %v198_v50, %v170_v44 }
 0x239   :  { %v330_v50 = vpop.f32.mrf.mxu3 }
 0x23a   :  { %v202_v52 = vmul.f32 0.5, %v199_v51  ;;  %2215 = vmatpush.xpose.msk.msrb.mxu0 %vm383_vm8, %v330_v50 }
 0x23c   :  { %v2606_v53 = vadd.f32 %v202_v52, %v2513_v2 }
 0x23e   :  { %v208_v54 = vsel %vm34_vm0, %v2606_v53, 0.0  ;;  %2216 = vmatpush.xpose.msk.msrb.mxu0 %vm383_vm8, %v327_v49 }
 0x23f   :  { %209 = vadd.xlane.f32.xlu2 %v208_v54  ;;  %v2344_v54 = vld [vmem:[%s3352_s4 + $0x20] ss:$0 sm:$0xff] }
 0x241   :  { %v333_v51 = vpop.f32.mrf.mxu3 }
 0x249   :  { %v2673_v52 = vpop.f32.mrf.mxu3 }
 0x24a   :  { %2218 = vmatpush.xpose.msk.msra.mxu2 %vm383_vm8, %v2673_v52 }
 0x24e   :  { %2219 = vmatpush.xpose.msk.msra.mxu2 %vm383_vm8, %v333_v51 }
 0x2a4   :  { %v207_v55 = vpop.xlane.xlu2 %206 }
 0x2a5   :  { %v211_v56 = vmul.f32 %v207_v55, %v2517_v10 }
 0x2a7   :  { %v213_v0 = vsub.f32 %v2601_v48, %v211_v56 }
 0x2a9   :  { %v215_v57 = vmul.f32 %v213_v0, %v213_v0 }
 0x2ab   :  { %v217_v58 = vsel %vm34_vm0, %v215_v57, 0.0 }
 0x2ac   :  { %218 = vadd.xlane.f32.xlu0 %v217_v58 }
 0x2b2   :  { %v210_v59 = vpop.xlane.xlu2 %209 }
 0x2b3   :  { %v212_v60 = vmul.f32 %v210_v59, %v2517_v10 }
 0x2b5   :  { %v2615_v61 = vsub.f32 %v2606_v53, %v212_v60 }
 0x2b7   :  { %v216_v2 = vmul.f32 %v2615_v61, %v2615_v61 }
 0x2b9   :  { %v220_v62 = vsel %vm34_vm0, %v216_v2, 0.0 }
 0x2ba   :  { %221 = vadd.xlane.f32.xlu1 %v220_v62 }
 0x31f   :  { %v219_v12 = vpop.xlane.xlu0 %218 }
 0x320   :  { %v223_v13 = vmul.f32 %v219_v12, %v2517_v10 }
 0x322   :  { %v225_v14 = vadd.f32 1e-05, %v223_v13 }
 0x324   :  { %2359 = vrsqrt.f32 %v225_v14  ;;  %vm233_vm3 = vweird.f32 %v225_v14 }
 0x32a   :  { %v2360_v16 = vpop.eup %2359 }
 0x32b   :  { %v228_v17 = vmul.f32 %v2360_v16, %v225_v14  ;;  %vm234_vm2 = vweird.f32 %v2360_v16 }
 0x32c   :  { %vm235_vm4 = vmor %vm233_vm3, %vm234_vm2 }
 0x32d   :  { %v229_v19 = vmul.f32 %v2360_v16, %v228_v17  ;;  %v222_v20 = vpop.xlane.xlu1 %221 }
 0x32e   :  { %v224_v27 = vmul.f32 %v222_v20, %v2517_v10 }
 0x32f   :  { %v230_v28 = vmul.f32 0.5, %v229_v19 }
 0x330   :  { %v226_v29 = vadd.f32 1e-05, %v224_v27 }
 0x331   :  { %v231_v30 = vsub.f32 1.5, %v230_v28 }
 0x332   :  { %2361 = vrsqrt.f32 %v226_v29  ;;  %vm243_vm6 = vweird.f32 %v226_v29 }
 0x333   :  { %v232_v31 = vmul.f32 %v2360_v16, %v231_v30 }
 0x335   :  { %v236_v33 = vsel %vm235_vm4, %v2360_v16, %v232_v31 }
 0x336   :  { %v2663_v34 = vmul.f32 %v236_v33, %v213_v0 }
 0x338   :  { %v2362_v36 = vpop.eup %2361  ;;  %v250_v37 = vmul.f32 %v249_v32, %v2663_v34 }
 0x339   :  { %v238_v39 = vmul.f32 %v2362_v36, %v226_v29  ;;  %vm244_vm5 = vweird.f32 %v2362_v36 }
 0x33a   :  { %v253_v40 = vadd.f32 %v252_v35, %v250_v37  ;;  %vm245_vm7 = vmor %vm243_vm6, %vm244_vm5 }
 0x33b   :  { %v239_v41 = vmul.f32 %v2362_v36, %v238_v39 }
 0x33c   :  { %2209 = vmatmul.msk.f32.vlgmr.msrb.gmra.mxu2 %vm34_vm0, %v253_v40 }
 0x33d   :  { %v240_v42 = vmul.f32 0.5, %v239_v41 }
 0x33f   :  { %v241_v43 = vsub.f32 1.5, %v240_v42 }
 0x341   :  { %v242_v44 = vmul.f32 %v2362_v36, %v241_v43 }
 0x343   :  { %v246_v45 = vsel %vm245_vm7, %v2362_v36, %v242_v44 }
 0x344   :  { %v2669_v46 = vmul.f32 %v246_v45, %v2615_v61 }
 0x346   :  { %v251_v38 = vmul.f32 %v249_v32, %v2669_v46 }
 0x348   :  { %v254_v47 = vadd.f32 %v252_v35, %v251_v38 }
 0x34a   :  { %2210 = vmatmul.msk.f32.gmra.mxu2 %vm34_vm0, %v254_v47 }
 0x3bf   :  { %v284_v55 = vpop.f32.mrf.mxu2 }
 0x3c0   :  { %v2683_v56 = vadd.f32 %v2344_v54, %v284_v55 }
 0x3c2   :  { %341 = vrot.lane.b32.xlu2 %v2683_v56, %s2453_s24  ;;  %381 = vrot.lane.b32.xlu1 %v2683_v56, %s2454_s25 }
 0x3ca   :  { %361 = vrot.lane.b32.xlu1 %v333_v51, %s2453_s24  ;;  %359 = vrot.lane.b32.xlu2 %v330_v50, %s2453_s24 }
 0x3cd   :  { %v287_v0 = vpop.f32.mrf.mxu2 }
 0x3ce   :  { %v2688_v57 = vadd.f32 %v2344_v54, %v287_v0 }
 0x3d0   :  { %343 = vrot.lane.b32.xlu0 %v2688_v57, %s2453_s24 }
 0x3d2   :  { %345 = vrot.lane.b32.xlu1 %v2683_v56, %s2455_s26  ;;  %357 = vrot.lane.b32.xlu2 %v327_v49, %s2453_s24 }
 0x3d8   :  { %363 = vrot.lane.b32.xlu0 %v2673_v52, %s2453_s24 }
 0x3da   :  { %410 = vrot.lane.b32.xlu1 %v2688_v57, %s2454_s25 }
 0x41c   :  { %v2696_v58 = vpop.permute.xlu2 %341 }
 0x41d   :  { %438 = vrot.lane.b32.xlu0 %v2696_v58, %s2454_s25 }
 0x424   :  { %v360_v59 = vpop.permute.xlu2 %359 }
 0x425   :  { %351 = vrot.lane.b32.xlu0 %v2688_v57, %s2456_s27  ;;  %2221 = vmatpush.xpose.msk.msra.mxu0 %vm383_vm8, %v360_v59 }
 0x42c   :  { %v358_v61 = vpop.permute.xlu2 %357 }
 0x42d   :  { %367 = vrot.lane.b32.xlu0 %v330_v50, %s2455_s26  ;;  %2222 = vmatpush.xpose.msk.msra.mxu0 %vm383_vm8, %v358_v61 }
 0x434   :  { %v382_v60 = vpop.permute.xlu1 %381 }
 0x435   :  { %2217 = vmatmul.msk.f32.vlgmr.msrb.gmra.mxu0 %vm383_vm8, %v382_v60  ;;  %379 = vrot.lane.b32.xlu0 %v2673_v52, %s2456_s27 }
 0x43c   :  { %v362_v2 = vpop.permute.xlu1 %361 }
 0x442   :  { %v2706_v62 = vpop.permute.xlu0 %343 }
 0x443   :  { %466 = vrot.lane.b32.xlu2 %v2706_v62, %s2454_s25 }
 0x444   :  { %v2710_v63 = vpop.permute.xlu1 %345 }
 0x445   :  { %494 = vrot.lane.b32.xlu1 %v2710_v63, %s2454_s25 }
 0x44a   :  { %v364_v3 = vpop.permute.xlu0 %363 }
 0x44b   :  { %349 = vrot.lane.b32.xlu2 %v2683_v56, %s2456_s27  ;;  %2224 = vmatpush.xpose.msk.msrb.mxu1 %vm383_vm8, %v364_v3 }
 0x44c   :  { %v411_v1 = vpop.permute.xlu1 %410 }
 0x44d   :  { %377 = vrot.lane.b32.xlu1 %v333_v51, %s2456_s27  ;;  %2220 = vmatmul.msk.f32.vlgmr.msra.gmra.mxu2 %vm383_vm8, %v411_v1 }
 0x44f   :  { %2225 = vmatpush.xpose.msk.msrb.mxu1 %vm383_vm8, %v362_v2 }
 0x453   :  { %365 = vrot.lane.b32.xlu2 %v327_v49, %s2455_s26 }
 0x45b   :  { %375 = vrot.lane.b32.xlu2 %v330_v50, %s2456_s27 }
 0x463   :  { %373 = vrot.lane.b32.xlu2 %v327_v49, %s2456_s27 }
 0x46b   :  { %347 = vrot.lane.b32.xlu2 %v2688_v57, %s2455_s26 }
 0x473   :  { %369 = vrot.lane.b32.xlu2 %v333_v51, %s2455_s26 }
 0x47b   :  { %845 = vrot.lane.b32.xlu2 %v2683_v56, %s2457_s28 }
 0x48f   :  { %v439_v4 = vpop.permute.xlu0 %438 }
 0x490   :  { %2223 = vmatmul.msk.f32.vlgmr.msra.gmra.mxu0 %vm383_vm8, %v439_v4 }
 0x497   :  { %v2725_v5 = vpop.permute.xlu0 %351 }
 0x498   :  { %578 = vrot.lane.b32.xlu0 %v2725_v5, %s2454_s25 }
 0x49d   :  { %v467_v6 = vpop.permute.xlu2 %466 }
 0x49e   :  { %2226 = vmatmul.msk.f32.vlgmr.msrb.gmra.mxu1 %vm383_vm8, %v467_v6 }
 0x49f   :  { %v368_v7 = vpop.permute.xlu0 %367 }
 0x4a0   :  { %935 = vrot.lane.b32.xlu0 %v2706_v62, %s2457_s28  ;;  %2227 = vmatpush.xpose.msk.msrb.mxu2 %vm383_vm8, %v368_v7 }
 0x4a5   :  { %v2733_v8 = vpop.permute.xlu2 %349 }
 0x4a6   :  { %550 = vrot.lane.b32.xlu1 %v2733_v8, %s2454_s25 }
 0x4a7   :  { %v380_v11 = vpop.permute.xlu0 %379 }
 0x4a8   :  { %371 = vrot.lane.b32.xlu0 %v2673_v52, %s2455_s26 }
 0x4ad   :  { %v366_v9 = vpop.permute.xlu2 %365 }
 0x4ae   :  { %905 = vrot.lane.b32.xlu1 %v2696_v58, %s2457_s28  ;;  %2228 = vmatpush.xpose.msk.msrb.mxu2 %vm383_vm8, %v366_v9 }
 0x4b2   :  { %2236 = vmatpush.xpose.msk.msra.mxu2 %vm383_vm8, %v380_v11  ;;  %v2758_v19 = vpop.f32.mrf.mxu0 }
 0x4b5   :  { %v376_v12 = vpop.permute.xlu2 %375 }
 0x4b6   :  { %2233 = vmatpush.xpose.msk.msra.mxu1 %vm383_vm8, %v376_v12 }
 0x4b7   :  { %v495_v13 = vpop.permute.xlu1 %494 }
 0x4b8   :  { %2229 = vmatmul.msk.f32.vlgmr.msrb.gmra.mxu2 %vm383_vm8, %v495_v13 }
 0x4bd   :  { %v374_v14 = vpop.permute.xlu2 %373 }
 0x4be   :  { %2234 = vmatpush.xpose.msk.msra.mxu1 %vm383_vm8, %v374_v14 }
 0x4bf   :  { %v378_v15 = vpop.permute.xlu1 %377 }
 0x4c0   :  { %2237 = vmatpush.xpose.msk.msra.mxu2 %vm383_vm8, %v378_v15  ;;  %v2312_v15 = vpack.i.bf16 %v2706_v62, %v2696_v58 }
 0x4c5   :  { %v2747_v16 = vpop.permute.xlu2 %347 }
 0x4c6   :  { %995 = vrot.lane.b32.xlu0 %v2747_v16, %s2457_s28  ;;  %522 = vrot.lane.b32.xlu1 %v2747_v16, %s2454_s25 }
 0x4cd   :  { %v370_v17 = vpop.permute.xlu2 %369 }
 0x4ce   :  { %875 = vrot.lane.b32.xlu1 %v2688_v57, %s2457_s28 }
 0x4d0   :  { %v2784_v33 = vpop.f32.mrf.mxu2 }
 0x4d5   :  { %v846_v18 = vpop.permute.xlu2 %845 }
 0x4d6   :  { %2239 = vmatpush.xpose.msk.msrb.mxu3 %vm383_vm8, %v846_v18 }
 0x4d9   :  { %2240 = vmatmul.msk.f32.vlgmr.msrb.gmra.mxu3 %vm383_vm8, %v2683_v56 }
 0x50a   :  { %v579_v20 = vpop.permute.xlu0 %578 }
 0x50b   :  { %2238 = vmatmul.msk.f32.vlgmr.msra.gmra.mxu2 %vm383_vm8, %v579_v20  ;;  %v2863_v20 = vld [vmem:[%s3350_s2 + $0x10] sm:$0xff] }
 0x50d   :  { %v463_v27 = vpop.f32.mrf.mxu0 }
 0x50e   :  { %642 = vrot.lane.b32.xlu2 %v463_v27, %s2458_s29  ;;  %618 = vrot.lane.b32.xlu0 %v463_v27, %s2459_s30 }
 0x50f   :  { %690 = vrot.lane.b32.xlu1 %v463_v27, %s2460_s6 }
 0x512   :  { %v936_v28 = vpop.permute.xlu0 %935 }
 0x513   :  { %2245 = vmatpush.xpose.msk.msrb.mxu2 %vm383_vm8, %v936_v28 }
 0x516   :  { %714 = vrot.lane.b32.xlu2 %v463_v27, %s2461_s7  ;;  %2246 = vmatmul.msk.f32.vlgmr.msrb.gmra.mxu2 %vm383_vm8, %v2706_v62 }
 0x517   :  { %666 = vrot.lane.b32.xlu0 %v463_v27, %s2462_s8  ;;  %762 = vrot.lane.b32.xlu1 %v463_v27, %s2463_s9 }
 0x518   :  { %v551_v29 = vpop.permute.xlu1 %550 }
 0x519   :  { %2235 = vmatmul.msk.f32.vlgmr.msra.gmra.mxu1 %vm383_vm8, %v551_v29 }
 0x51a   :  { %v372_v30 = vpop.permute.xlu0 %371 }
 0x51b   :  { %2230 = vmatpush.xpose.msk.msrb.mxu0 %vm383_vm8, %v372_v30  ;;  %v491_v31 = vpop.f32.mrf.mxu1 }
 0x51e   :  { %644 = vrot.lane.b32.xlu2 %v491_v31, %s2458_s29 }
 0x51f   :  { %738 = vrot.lane.b32.xlu0 %v463_v27, %s2464_s10  ;;  %620 = vrot.lane.b32.xlu1 %v491_v31, %s2459_s30 }
 0x520   :  { %2231 = vmatpush.xpose.msk.msrb.mxu0 %vm383_vm8, %v370_v17  ;;  %v906_v32 = vpop.permute.xlu1 %905 }
 0x521   :  { %2243 = vmatpush.xpose.msk.msrb.mxu1 %vm383_vm8, %v906_v32 }
 0x524   :  { %2244 = vmatmul.msk.f32.vlgmr.msrb.gmra.mxu1 %vm383_vm8, %v2696_v58 }
 0x526   :  { %716 = vrot.lane.b32.xlu2 %v491_v31, %s2461_s7 }
 0x527   :  { %668 = vrot.lane.b32.xlu0 %v491_v31, %s2462_s8  ;;  %692 = vrot.lane.b32.xlu1 %v491_v31, %s2460_s6 }
 0x52e   :  { %764 = vrot.lane.b32.xlu2 %v491_v31, %s2463_s9 }
 0x52f   :  { %740 = vrot.lane.b32.xlu0 %v491_v31, %s2464_s10 }
 0x536   :  { %736 = vrot.lane.b32.xlu2 %v2784_v33, %s2464_s10 }
 0x537   :  { %616 = vrot.lane.b32.xlu0 %v2784_v33, %s2459_s30 }
 0x538   :  { %v523_v35 = vpop.permute.xlu1 %522  ;;  %v996_v37 = vpop.permute.xlu0 %995 }
 0x539   :  { %2232 = vmatmul.msk.f32.vlgmr.msrb.gmra.mxu0 %vm383_vm8, %v523_v35 }
 0x53b   :  { %v2866_v29 = vpop.f32.mrf.mxu2 }
 0x53f   :  { %640 = vrot.lane.b32.xlu0 %v2784_v33, %s2458_s29 }
 0x540   :  { %v876_v36 = vpop.permute.xlu1 %875 }
 0x541   :  { %2241 = vmatpush.xpose.msk.msra.mxu0 %vm383_vm8, %v876_v36 }
 0x544   :  { %2242 = vmatmul.msk.f32.vlgmr.msra.gmra.mxu0 %vm383_vm8, %v2688_v57 }
 0x545   :  { %2249 = vmatpush.xpose.msk.msrb.mxu0 %vm383_vm8, %v996_v37 }
 0x547   :  { %664 = vrot.lane.b32.xlu0 %v2784_v33, %s2462_s8 }
 0x54c   :  { %2250 = vmatmul.msk.f32.vlgmr.msrb.gmra.mxu0 %vm383_vm8, %v2747_v16 }
 0x54f   :  { %688 = vrot.lane.b32.xlu0 %v2784_v33, %s2460_s6 }
 0x568   :  { %v643_v39 = vpop.permute.xlu2 %642 }
 0x570   :  { %v715_v42 = vpop.permute.xlu2 %714 }
 0x578   :  { %v645_v49 = vpop.permute.xlu2 %644 }
 0x580   :  { %v619_v40 = vpop.permute.xlu0 %618  ;;  %v717_v60 = vpop.permute.xlu2 %716 }
 0x581   :  { %v691_v41 = vpop.permute.xlu1 %690  ;;  %v785_v43 = vsel %vm782_vm9, %v463_v27, %v619_v40  ;;  %v1095_v27 = vrot.slane %v2863_v20, 2  ;;  %v1096_v40 = vrot.slane %v2863_v20, 3 }
 0x582   :  { %v794_v38 = vsel %vm791_vm10, %v785_v43, %v643_v39 }
 0x583   :  { %v1103_v58 = vperm.slane %v1095_v27, 0 }
 0x588   :  { %v765_v9 = vpop.permute.xlu2 %764 }
 0x589   :  { %v667_v44 = vpop.permute.xlu0 %666  ;;  %v763_v45 = vpop.permute.xlu1 %762 }
 0x58a   :  { %v803_v47 = vsel %vm800_vm11, %v794_v38, %v667_v44  ;;  %v1104_v44 = vperm.slane %v1096_v40, 0 }
 0x58b   :  { %v812_v50 = vsel %vm809_vm13, %v803_v47, %v691_v41 }
 0x58c   :  { %v821_v52 = vsel %vm818_vm14, %v812_v50, %v715_v42 }
 0x58e   :  { %v2872_v37 = vpop.f32.mrf.mxu2 }
 0x591   :  { %v739_v51 = vpop.permute.xlu0 %738  ;;  %v621_v54 = vpop.permute.xlu1 %620 }
 0x592   :  { %v830_v55 = vsel %vm827_vm15, %v821_v52, %v739_v51  ;;  %v786_v59 = vsel %vm782_vm9, %v491_v31, %v621_v54 }
 0x593   :  { %v839_v0 = vsel %vm836_vm1, %v830_v55, %v763_v45  ;;  %v795_v2 = vsel %vm791_vm10, %v786_v59, %v645_v49  ;;  %v737_v55 = vpop.permute.xlu2 %736 }
 0x594   :  { %908 = vrot.lane.b32.xlu1 %v839_v0, %s2465_s11 }
 0x596   :  { %v2858_v18 = vpop.f32.mrf.mxu1 }
 0x599   :  { %v669_v61 = vpop.permute.xlu0 %668  ;;  %v693_v3 = vpop.permute.xlu1 %692 }
 0x59a   :  { %v804_v1 = vsel %vm800_vm11, %v795_v2, %v669_v61  ;;  %v962_v41 = vpop.f32.mrf.mxu2 }
 0x59b   :  { %v813_v4 = vsel %vm809_vm13, %v804_v1, %v693_v3 }
 0x59c   :  { %760 = vrot.lane.b32.xlu1 %v2784_v33, %s2463_s9  ;;  %v822_v7 = vsel %vm818_vm14, %v813_v4, %v717_v60 }
 0x5a1   :  { %v741_v6 = vpop.permute.xlu0 %740  ;;  %v932_v30 = vpop.f32.mrf.mxu1 }
 0x5a2   :  { %v831_v11 = vsel %vm827_vm15, %v822_v7, %v741_v6 }
 0x5a3   :  { %v840_v12 = vsel %vm836_vm1, %v831_v11, %v765_v9 }
 0x5a4   :  { %938 = vrot.lane.b32.xlu0 %v840_v12, %s2465_s11 }
 0x5a9   :  { %v617_v14 = vpop.permute.xlu0 %616 }
 0x5aa   :  { %v784_v38 = vsel %vm782_vm9, %v2784_v33, %v617_v14 }
 0x5ac   :  { %712 = vrot.lane.b32.xlu0 %v2784_v33, %s2461_s7 }
 0x5b1   :  { %v641_v17 = vpop.permute.xlu0 %640 }
 0x5b2   :  { %v793_v49 = vsel %vm791_vm10, %v784_v38, %v641_v17 }
 0x5b6   :  { %v2823_v13 = vpop.f32.mrf.mxu0 }
 0x5b7   :  { %696 = vrot.lane.b32.xlu2 %v2823_v13, %s2460_s6  ;;  %744 = vrot.lane.b32.xlu1 %v2823_v13, %s2464_s10 }
 0x5b8   :  { %624 = vrot.lane.b32.xlu0 %v2823_v13, %s2459_s30 }
 0x5b9   :  { %v665_v28 = vpop.permute.xlu0 %664 }
 0x5ba   :  { %v802_v50 = vsel %vm800_vm11, %v793_v49, %v665_v28 }
 0x5bf   :  { %768 = vrot.lane.b32.xlu2 %v2823_v13, %s2463_s9  ;;  %638 = vrot.lane.b32.xlu1 %v2758_v19, %s2458_s29 }
 0x5c0   :  { %648 = vrot.lane.b32.xlu0 %v2823_v13, %s2458_s29 }
 0x5c1   :  { %v689_v39 = vpop.permute.xlu0 %688 }
 0x5c2   :  { %v811_v52 = vsel %vm809_vm13, %v802_v50, %v689_v39 }
 0x5c7   :  { %662 = vrot.lane.b32.xlu2 %v2758_v19, %s2462_s8  ;;  %710 = vrot.lane.b32.xlu1 %v2758_v19, %s2461_s7 }
 0x5c8   :  { %672 = vrot.lane.b32.xlu0 %v2823_v13, %s2462_s8 }
 0x5cf   :  { %734 = vrot.lane.b32.xlu2 %v2758_v19, %s2464_s10 }
 0x5d0   :  { %720 = vrot.lane.b32.xlu0 %v2823_v13, %s2461_s7 }
 0x5d8   :  { %614 = vrot.lane.b32.xlu0 %v2758_v19, %s2459_s30 }
 0x5e0   :  { %686 = vrot.lane.b32.xlu0 %v2758_v19, %s2460_s6 }
 0x5e8   :  { %758 = vrot.lane.b32.xlu0 %v2758_v19, %s2463_s9 }
 0x5f0   :  { %1055 = vrot.lane.b32.xlu0 %v2725_v5, %s2457_s28 }
 0x5f8   :  { %2313 = vrot.lane.b32.xlu0 %v2312_v15, %s2466_s12 }
 0x606   :  { %v909_v31 = vpop.permute.xlu1 %908 }
 0x607   :  { %v933_v32 = vadd.f32 %v932_v30, %v909_v31 }
 0x609   :  { %v1087_v62 = vmul.f32 0.35355338, %v933_v32 }
 0x60b   :  { %v2868_v35 = vadd.f32 %v1103_v58, %v1087_v62 }
 0x60d   :  { %v1131_v36 = vsel %vm383_vm8, %v2868_v35, -inf }
 0x60e   :  { %1132 = vmax.xlane.f32.xlu2 %v1131_v36  ;;  %v761_v59 = vpop.permute.xlu1 %760 }
 0x611   :  { %v697_v1 = vpop.permute.xlu2 %696 }
 0x616   :  { %v939_v42 = vpop.permute.xlu0 %938 }
 0x617   :  { %v963_v43 = vadd.f32 %v962_v41, %v939_v42 }
 0x619   :  { %v1088_v45 = vmul.f32 0.35355338, %v963_v43  ;;  %v769_v15 = vpop.permute.xlu2 %768 }
 0x61b   :  { %v2877_v47 = vadd.f32 %v1104_v44, %v1088_v45 }
 0x61d   :  { %v1134_v51 = vsel %vm383_vm8, %v2877_v47, -inf }
 0x61e   :  { %1135 = vmax.xlane.f32.xlu1 %v1134_v51  ;;  %v713_v54 = vpop.permute.xlu0 %712 }
 0x61f   :  { %v820_v0 = vsel %vm818_vm14, %v811_v52, %v713_v54 }
 0x620   :  { %v829_v60 = vsel %vm827_vm15, %v820_v0, %v737_v55  ;;  %v1094_v55 = vrot.slane %v2863_v20, 1  ;;  %v902_v0 = vpop.f32.mrf.mxu0 }
 0x621   :  { %v838_v33 = vsel %vm836_vm1, %v829_v60, %v761_v59  ;;  %v663_v31 = vpop.permute.xlu2 %662 }
 0x622   :  { %878 = vrot.lane.b32.xlu0 %v838_v33, %s2465_s11  ;;  %v1102_v33 = vperm.slane %v1094_v55, 0 }
 0x629   :  { %v745_v9 = vpop.permute.xlu1 %744  ;;  %v735_v41 = vpop.permute.xlu2 %734 }
 0x62a   :  { %v625_v61 = vpop.permute.xlu0 %624  ;;  %965 = vrot.lane.b32.xlu0 %v2710_v63, %s2457_s28 }
 0x62b   :  { %v788_v4 = vsel %vm782_vm9, %v2823_v13, %v625_v61 }
 0x631   :  { %v639_v30 = vpop.permute.xlu1 %638 }
 0x632   :  { %v649_v2 = vpop.permute.xlu0 %648 }
 0x633   :  { %v797_v6 = vsel %vm791_vm10, %v788_v4, %v649_v2 }
 0x637   :  { %1025 = vrot.lane.b32.xlu1 %v2733_v8, %s2457_s28 }
 0x639   :  { %v711_v39 = vpop.permute.xlu1 %710 }
 0x63a   :  { %v673_v3 = vpop.permute.xlu0 %672 }
 0x63b   :  { %v806_v7 = vsel %vm800_vm11, %v797_v6, %v673_v3 }
 0x63c   :  { %v815_v12 = vsel %vm809_vm13, %v806_v7, %v697_v1  ;;  %v1098_v7 = vrot.slane %v2863_v20, 5 }
 0x642   :  { %v721_v11 = vpop.permute.xlu0 %720 }
 0x643   :  { %v824_v14 = vsel %vm818_vm14, %v815_v12, %v721_v11  ;;  %v2317_v11 = vpack.i.bf16 %v2747_v16, %v2688_v57  ;;  %v1022_v12 = vpop.f32.mrf.mxu0 }
 0x644   :  { %v833_v17 = vsel %vm827_vm15, %v824_v14, %v745_v9 }
 0x645   :  { %v842_v27 = vsel %vm836_vm1, %v833_v17, %v769_v15  ;;  %v1106_v17 = vperm.slane %v1098_v7, 0 }
 0x646   :  { %998 = vrot.lane.b32.xlu0 %v842_v27, %s2465_s11 }
 0x64a   :  { %v615_v28 = vpop.permute.xlu0 %614 }
 0x64b   :  { %v783_v13 = vsel %vm782_vm9, %v2758_v19, %v615_v28 }
 0x64c   :  { %v792_v32 = vsel %vm791_vm10, %v783_v13, %v639_v30 }
 0x64d   :  { %v801_v62 = vsel %vm800_vm11, %v792_v32, %v663_v31  ;;  %v872_v31 = vpop.f32.mrf.mxu3 }
 0x652   :  { %v687_v58 = vpop.permute.xlu0 %686 }
 0x653   :  { %v810_v36 = vsel %vm809_vm13, %v801_v62, %v687_v58  ;;  %v1101_v62 = vperm.slane %v2863_v20, 0 }
 0x654   :  { %v819_v40 = vsel %vm818_vm14, %v810_v36, %v711_v39 }
 0x655   :  { %v828_v43 = vsel %vm827_vm15, %v819_v40, %v735_v41 }
 0x65a   :  { %v759_v42 = vpop.permute.xlu0 %758 }
 0x65b   :  { %v837_v44 = vsel %vm836_vm1, %v828_v43, %v759_v42 }
 0x65c   :  { %848 = vrot.lane.b32.xlu2 %v837_v44, %s2465_s11 }
 0x662   :  { %v1056_v19 = vpop.permute.xlu0 %1055 }
 0x663   :  { %2253 = vmatpush.xpose.msk.msra.mxu2 %vm383_vm8, %v1056_v19 }
 0x666   :  { %2254 = vmatmul.msk.f32.vlgmr.msra.gmra.mxu2 %vm383_vm8, %v2725_v5 }
 0x66a   :  { %v2314_v45 = vpop.permute.xlu0 %2313 }
 0x66b   :  { %v2316_v38 = vunpack.i.h.bf16 %v2314_v45  ;;  %v2315_v4 = vunpack.i.l.bf16 %v2314_v45 }
 0x66d   :  { %1312 = vmatpush.msrb.mxu2 %v2316_v38 }
 0x681   :  { %v1133_v49 = vpop.xlane.xlu2 %1132 }
 0x682   :  { %v1151_v50 = vsub.f32 %v2868_v35, %v1133_v49 }
 0x684   :  { %v1161_v51 = vmul.f32 1.442695, %v1151_v50 }
 0x686   :  { %2363 = vpow2.f32 %v1161_v51 }
 0x68c   :  { %v2364_v52 = vpop.eup %2363 }
 0x68d   :  { %v1179_v54 = vsel %vm383_vm8, %v2364_v52, 0.0 }
 0x68e   :  { %1180 = vadd.xlane.f32.xlu2 %v1179_v54 }
 0x691   :  { %v1136_v35 = vpop.xlane.xlu1 %1135 }
 0x692   :  { %v1152_v9 = vsub.f32 %v2877_v47, %v1136_v35 }
 0x694   :  { %v879_v59 = vpop.permute.xlu0 %878  ;;  %v1163_v27 = vmul.f32 1.442695, %v1152_v9 }
 0x695   :  { %v903_v60 = vadd.f32 %v902_v0, %v879_v59 }
 0x696   :  { %2365 = vpow2.f32 %v1163_v27 }
 0x697   :  { %v1086_v61 = vmul.f32 0.35355338, %v903_v60 }
 0x699   :  { %v1118_v2 = vadd.f32 %v1102_v33, %v1086_v61 }
 0x69b   :  { %v1128_v1 = vsel %vm383_vm8, %v1118_v2, -inf }
 0x69c   :  { %v966_v3 = vpop.permute.xlu0 %965  ;;  %1129 = vmax.xlane.f32.xlu0 %v1128_v1  ;;  %v2366_v58 = vpop.eup %2365 }
 0x69d   :  { %2247 = vmatpush.xpose.msk.msra.mxu3 %vm383_vm8, %v966_v3  ;;  %v1182_v16 = vsel %vm383_vm8, %v2366_v58, 0.0 }
 0x6a0   :  { %2248 = vmatmul.msk.f32.vlgmr.msra.gmra.mxu3 %vm383_vm8, %v2710_v63 }
 0x6a6   :  { %646 = vrot.lane.b32.xlu2 %v2866_v29, %s2458_s29 }
 0x6a9   :  { %v1026_v6 = vpop.permute.xlu1 %1025 }
 0x6aa   :  { %2251 = vmatpush.xpose.msk.msra.mxu1 %vm383_vm8, %v1026_v6 }
 0x6ad   :  { %2252 = vmatmul.msk.f32.vlgmr.msra.gmra.mxu1 %vm383_vm8, %v2733_v8 }
 0x6ae   :  { %1286 = vmatpush.msrb.mxu1 %v2315_v4  ;;  %670 = vrot.lane.b32.xlu2 %v2866_v29, %s2462_s8 }
 0x6b0   :  { %718 = vrot.lane.b32.xlu0 %v2866_v29, %s2461_s7 }
 0x6b6   :  { %694 = vrot.lane.b32.xlu2 %v2866_v29, %s2460_s6  ;;  %v849_v13 = vpop.permute.xlu2 %848 }
 0x6b7   :  { %v873_v32 = vadd.f32 %v872_v31, %v849_v13 }
 0x6b8   :  { %2318 = vrot.lane.b32.xlu0 %v2317_v11, %s2466_s12  ;;  %v999_v14 = vpop.permute.xlu0 %998 }
 0x6b9   :  { %v1023_v15 = vadd.f32 %v1022_v12, %v999_v14  ;;  %v1085_v57 = vmul.f32 0.35355338, %v873_v32 }
 0x6bb   :  { %v1090_v28 = vmul.f32 0.35355338, %v1023_v15  ;;  %v1117_v36 = vadd.f32 %v1101_v62, %v1085_v57 }
 0x6bd   :  { %v2936_v30 = vadd.f32 %v1106_v17, %v1090_v28  ;;  %v1125_v39 = vsel %vm383_vm8, %v1117_v36, -inf }
 0x6bf   :  { %v1140_v47 = vsel %vm383_vm8, %v2936_v30, -inf }
 0x6c0   :  { %1141 = vmax.xlane.f32.xlu1 %v1140_v47 }
 0x6c8   :  { %1183 = vadd.xlane.f32.xlu1 %v1182_v16 }
 0x6d0   :  { %1126 = vmax.xlane.f32.xlu1 %v1125_v39 }
 0x6e9   :  { %622 = vrot.lane.b32.xlu1 %v2866_v29, %s2459_s30 }
 0x6f1   :  { %742 = vrot.lane.b32.xlu1 %v2866_v29, %s2464_s10 }
 0x6f9   :  { %766 = vrot.lane.b32.xlu1 %v2866_v29, %s2463_s9 }
 0x701   :  { %v1181_v40 = vpop.xlane.xlu2 %1180 }
 0x702   :  { %2367 = vrcp.f32 %v1181_v40 }
 0x708   :  { %v2368_v41 = vpop.eup %2367 }
 0x709   :  { %v1207_v42 = vmul.f32 %v2368_v41, %v2364_v52  ;;  %v647_v1 = vpop.permute.xlu2 %646 }
 0x70b   :  { %2257 = vmatmul.msk.f32.vlgmr.msrb.gmra.mxu1 %vm383_vm8, %v1207_v42 }
 0x70f   :  { %v1130_v43 = vpop.xlane.xlu0 %1129 }
 0x710   :  { %v1150_v44 = vsub.f32 %v1118_v2, %v1130_v43 }
 0x711   :  { %v671_v35 = vpop.permute.xlu2 %670 }
 0x712   :  { %v1159_v19 = vmul.f32 1.442695, %v1150_v44 }
 0x714   :  { %2369 = vpow2.f32 %v1159_v19 }
 0x719   :  { %v695_v11 = vpop.permute.xlu2 %694 }
 0x71a   :  { %v2370_v45 = vpop.eup %2369 }
 0x71b   :  { %v1176_v38 = vsel %vm383_vm8, %v2370_v45, 0.0 }
 0x71c   :  { %1177 = vadd.xlane.f32.xlu2 %v1176_v38 }
 0x722   :  { %v719_v49 = vpop.permute.xlu0 %718 }
 0x723   :  { %v992_v39 = vpop.f32.mrf.mxu3 }
 0x72a   :  { %v2319_v50 = vpop.permute.xlu0 %2318 }
 0x72b   :  { %v2321_v51 = vunpack.i.h.bf16 %v2319_v50  ;;  %v2320_v54 = vunpack.i.l.bf16 %v2319_v50 }
 0x72d   :  { %1260 = vmatpush.msra.mxu0 %v2320_v54 }
 0x72f   :  { %1364 = vmatpush.msrb.mxu0 %v2321_v51 }
 0x733   :  { %v1142_v55 = vpop.xlane.xlu1 %1141 }
 0x734   :  { %1213 = vrot.lane.b32.xlu2 %v2683_v56, %s2466_s12  ;;  %v1154_v28 = vsub.f32 %v2936_v30, %v1142_v55 }
 0x736   :  { %v1167_v32 = vmul.f32 1.442695, %v1154_v28 }
 0x73b   :  { %v1184_v52 = vpop.xlane.xlu1 %1183 }
 0x73c   :  { %2371 = vrcp.f32 %v1184_v52  ;;  %626 = vrot.lane.b32.xlu2 %v2858_v18, %s2459_s30 }
 0x742   :  { %v2372_v0 = vpop.eup %2371 }
 0x743   :  { %v1208_v59 = vmul.f32 %v2372_v0, %v2366_v58  ;;  %v1127_v60 = vpop.xlane.xlu1 %1126 }
 0x744   :  { %v1149_v33 = vsub.f32 %v1117_v36, %v1127_v60  ;;  %628 = vrot.lane.b32.xlu2 %v2872_v37, %s2459_s30  ;;  %v1097_v36 = vrot.slane %v2863_v20, 4 }
 0x745   :  { %2258 = vmatmul.msk.f32.vlgmr.msrb.gmra.mxu2 %vm383_vm8, %v1208_v59 }
 0x746   :  { %v1157_v61 = vmul.f32 1.442695, %v1149_v33  ;;  %v1105_v42 = vperm.slane %v1097_v36, 0  ;;  %v1611_v33 = vld [vmem:[%s3351_s3 + $0xb8] sm:$0xff] }
 0x748   :  { %2373 = vpow2.f32 %v1157_v61  ;;  %v3007_v61 = vpop.f32.mrf.mxu1 }
 0x74c   :  { %652 = vrot.lane.b32.xlu2 %v2872_v37, %s2458_s29 }
 0x74e   :  { %v2374_v56 = vpop.eup %2373 }
 0x74f   :  { %v1173_v2 = vsel %vm383_vm8, %v2374_v56, 0.0 }
 0x750   :  { %1174 = vadd.xlane.f32.xlu0 %v1173_v2  ;;  %v1609_v2 = vld [vmem:[%s3351_s3 + $0xa8] sm:$0xff] }
 0x754   :  { %722 = vrot.lane.b32.xlu2 %v2858_v18, %s2461_s7 }
 0x75b   :  { %v623_v3 = vpop.permute.xlu1 %622 }
 0x75c   :  { %724 = vrot.lane.b32.xlu2 %v2872_v37, %s2461_s7  ;;  %v787_v4 = vsel %vm782_vm9, %v2866_v29, %v623_v3  ;;  %v1608_v3 = vld [vmem:[%s3351_s3 + $0xa0] sm:$0xff] }
 0x75d   :  { %v796_v6 = vsel %vm791_vm10, %v787_v4, %v647_v1 }
 0x75e   :  { %v805_v9 = vsel %vm800_vm11, %v796_v6, %v671_v35  ;;  %v1082_v6 = vpop.f32.mrf.mxu2 }
 0x75f   :  { %v814_v12 = vsel %vm809_vm13, %v805_v9, %v695_v11 }
 0x760   :  { %v823_v14 = vsel %vm818_vm14, %v814_v12, %v719_v49 }
 0x763   :  { %v743_v7 = vpop.permute.xlu1 %742 }
 0x764   :  { %772 = vrot.lane.b32.xlu2 %v2872_v37, %s2463_s9  ;;  %650 = vrot.lane.b32.xlu0 %v2858_v18, %s2458_s29  ;;  %v832_v15 = vsel %vm827_vm15, %v823_v14, %v743_v7 }
 0x76b   :  { %v767_v17 = vpop.permute.xlu1 %766 }
 0x76c   :  { %698 = vrot.lane.b32.xlu0 %v2858_v18, %s2460_s6  ;;  %v841_v29 = vsel %vm836_vm1, %v832_v15, %v767_v17  ;;  %v3028_v15 = vld [vmem:[%s3351_s3 + $0x178] sm:$0xff] }
 0x76d   :  { %968 = vrot.lane.b32.xlu1 %v841_v29, %s2465_s11  ;;  %v1550_v17 = vperm.slane %v3028_v15, 4 }
 0x774   :  { %700 = vrot.lane.b32.xlu0 %v2872_v37, %s2460_s6 }
 0x775   :  { %674 = vrot.lane.b32.xlu1 %v2858_v18, %s2462_s8 }
 0x77c   :  { %770 = vrot.lane.b32.xlu0 %v2858_v18, %s2463_s9 }
 0x77d   :  { %676 = vrot.lane.b32.xlu1 %v2872_v37, %s2462_s8 }
 0x788   :  { %v1288_v7 = vpop.f32.mrf.mxu1 }
 0x78f   :  { %v1178_v27 = vpop.xlane.xlu2 %1177 }
 0x790   :  { %2375 = vrcp.f32 %v1178_v27 }
 0x791   :  { %2377 = vpow2.f32 %v1167_v32 }
 0x796   :  { %v2376_v47 = vpop.eup %2375 }
 0x797   :  { %v1206_v13 = vmul.f32 %v2376_v47, %v2370_v45  ;;  %v1214_v31 = vpop.permute.xlu2 %1213  ;;  %v2378_v58 = vpop.eup %2377  ;;  %v1422_v45 = vld [vmem:[%s3351_s3 + $0x148] sm:$0xff] }
 0x798   :  { %1234 = vmatpush.msrb.mxu3 %v1214_v31  ;;  %v1188_v57 = vsel %vm383_vm8, %v2378_v58, 0.0 }
 0x799   :  { %2256 = vmatmul.msk.f32.vlgmr.msra.gmra.mxu0 %vm383_vm8, %v1206_v13 }
 0x79a   :  { %1478 = vmatpush.msra.mxu0 %v1422_v45 }
 0x79f   :  { %v627_v49 = vpop.permute.xlu2 %626 }
 0x7a0   :  { %v789_v4 = vsel %vm782_vm9, %v2858_v18, %v627_v49 }
 0x7a7   :  { %1189 = vadd.xlane.f32.xlu1 %v1188_v57  ;;  %v629_v51 = vpop.permute.xlu2 %628  ;;  %v1551_v57 = vmul.f32 %v1550_v17, %v2663_v34  ;;  %v1552_v34 = vmul.f32 %v1550_v17, %v2669_v46  ;;  %v1556_v17 = vld [vmem:[%s3351_s3 + $0x80] sm:$0xff] }
 0x7af   :  { %v653_v52 = vpop.permute.xlu2 %652 }
 0x7b7   :  { %v723_v1 = vpop.permute.xlu2 %722 }
 0x7bf   :  { %v725_v14 = vpop.permute.xlu2 %724 }
 0x7c0   :  { %746 = vrot.lane.b32.xlu1 %v2858_v18, %s2464_s10  ;;  %v790_v18 = vsel %vm782_vm9, %v2872_v37, %v629_v51 }
 0x7c1   :  { %v799_v28 = vsel %vm791_vm10, %v790_v18, %v653_v52 }
 0x7c3   :  { %v1175_v16 = vpop.xlane.xlu0 %1174 }
 0x7c4   :  { %2379 = vrcp.f32 %v1175_v16 }
 0x7c8   :  { %748 = vrot.lane.b32.xlu1 %v2872_v37, %s2464_s10  ;;  %v1314_v47 = vpop.f32.mrf.mxu2  ;;  %v1553_v37 = vperm.slane %v3028_v15, 5 }
 0x7ca   :  { %v2380_v30 = vpop.eup %2379  ;;  %v3044_v36 = vadd.f32 %v1553_v37, %v1551_v57 }
 0x7cb   :  { %v1205_v62 = vmul.f32 %v2380_v30, %v2374_v56  ;;  %v1610_v56 = vld [vmem:[%s3351_s3 + $0xb0] sm:$0xff] }
 0x7cd   :  { %2255 = vmatmul.msk.f32.vlgmr.msrb.gmra.mxu3 %vm383_vm8, %v1205_v62 }
 0x7d6   :  { %v651_v54 = vpop.permute.xlu0 %650 }
 0x7d7   :  { %v798_v9 = vsel %vm791_vm10, %v789_v4, %v651_v54 }
 0x7de   :  { %v699_v0 = vpop.permute.xlu0 %698 }
 0x7df   :  { %v969_v40 = vpop.permute.xlu1 %968 }
 0x7e0   :  { %v993_v41 = vadd.f32 %v992_v39, %v969_v40  ;;  %v773_v39 = vpop.permute.xlu2 %772 }
 0x7e2   :  { %v1089_v43 = vmul.f32 0.35355338, %v993_v41 }
 0x7e4   :  { %v2997_v44 = vadd.f32 %v1105_v42, %v1089_v43  ;;  %v3052_v42 = vadd.f32 %v1553_v37, %v1552_v34 }
 0x7e6   :  { %v1137_v19 = vsel %vm383_vm8, %v2997_v44, -inf  ;;  %v701_v35 = vpop.permute.xlu0 %700 }
 0x7e7   :  { %1138 = vmax.xlane.f32.xlu0 %v1137_v19  ;;  %v675_v38 = vpop.permute.xlu1 %674 }
 0x7e8   :  { %v807_v11 = vsel %vm800_vm11, %v798_v9, %v675_v38 }
 0x7e9   :  { %v816_v12 = vsel %vm809_vm13, %v807_v11, %v699_v0  ;;  %v1559_v11 = vld [vmem:[%s3351_s3 + $0x98] sm:$0xff] }
 0x7ea   :  { %v825_v27 = vsel %vm818_vm14, %v816_v12, %v723_v1  ;;  %v1558_v12 = vld [vmem:[%s3351_s3 + $0x90] sm:$0xff] }
 0x7ee   :  { %v771_v13 = vpop.permute.xlu0 %770 }
 0x7ef   :  { %v677_v50 = vpop.permute.xlu1 %676 }
 0x7f0   :  { %v808_v32 = vsel %vm800_vm11, %v799_v28, %v677_v50  ;;  %v1100_v50 = vrot.slane %v2863_v20, 7 }
 0x7f1   :  { %v817_v16 = vsel %vm809_vm13, %v808_v32, %v701_v35 }
 0x7f2   :  { %v826_v62 = vsel %vm818_vm14, %v817_v16, %v725_v14  ;;  %v1108_v54 = vperm.slane %v1100_v50, 0  ;;  %v1557_v14 = vld [vmem:[%s3351_s3 + $0x88] sm:$0xff] }
 0x816   :  { %v1262_v1 = vpop.f32.mrf.mxu0 }
 0x81a   :  { %v1190_v55 = vpop.xlane.xlu1 %1189 }
 0x81b   :  { %2381 = vrcp.f32 %v1190_v55 }
 0x821   :  { %v2382_v59 = vpop.eup %2381 }
 0x822   :  { %v1210_v60 = vmul.f32 %v2382_v59, %v2378_v58 }
 0x824   :  { %2260 = vmatmul.msk.f32.vlgmr.msrb.gmra.mxu0 %vm383_vm8, %v1210_v60 }
 0x825   :  { %1625 = vmatpush.msrb.mxu0 %v1611_v33 }
 0x827   :  { %1626 = vmatpush.msrb.mxu0 %v1610_v56 }
 0x829   :  { %1627 = vmatpush.msrb.mxu0 %v1609_v2 }
 0x82b   :  { %1628 = vmatpush.msrb.mxu0 %v1608_v3 }
 0x82c   :  { %2265 = vmatmul.msk.f32.vlgmr.msra.gmra.mxu0 %vm383_vm8, %v1288_v7 }
 0x832   :  { %v747_v29 = vpop.permute.xlu1 %746 }
 0x833   :  { %v834_v31 = vsel %vm827_vm15, %v825_v27, %v747_v29  ;;  %v3091_v27 = vld [vmem:[%s3351_s3 + $0x180] sm:$0xff] }
 0x834   :  { %2266 = vmatmul.msk.f32.gmra.mxu0 %vm383_vm8, %v1314_v47  ;;  %v843_v58 = vsel %vm836_vm1, %v834_v31, %v771_v13  ;;  %v1612_v28 = vperm.slane %v3091_v27, 6 }
 0x835   :  { %1028 = vrot.lane.b32.xlu1 %v843_v58, %s2465_s11 }
 0x83a   :  { %v749_v30 = vpop.permute.xlu1 %748 }
 0x83b   :  { %v835_v40 = vsel %vm827_vm15, %v826_v62, %v749_v30 }
 0x83c   :  { %2273 = vmatmul.msk.f32.vlgmr.msrb.gmra.mxu0 %vm34_vm0, %v3044_v36  ;;  %v844_v41 = vsel %vm836_vm1, %v835_v40, %v773_v39 }
 0x83d   :  { %1058 = vrot.lane.b32.xlu2 %v844_v41, %s2465_s11 }
 0x844   :  { %2274 = vmatmul.msk.f32.gmra.mxu0 %vm34_vm0, %v3052_v42 }
 0x850   :  { %v1236_v18 = vpop.f32.mrf.mxu3 }
 0x85a   :  { %v1139_v43 = vpop.xlane.xlu0 %1138 }
 0x85b   :  { %v1153_v19 = vsub.f32 %v2997_v44, %v1139_v43  ;;  %v1099_v44 = vrot.slane %v2863_v20, 6  ;;  %v1421_v20 = vld [vmem:[%s3351_s3 + $0x140] sm:$0xff] }
 0x85d   :  { %v1165_v45 = vmul.f32 1.442695, %v1153_v19  ;;  %v1107_v33 = vperm.slane %v1099_v44, 0 }
 0x85f   :  { %2383 = vpow2.f32 %v1165_v45 }
 0x865   :  { %v2384_v38 = vpop.eup %2383 }
 0x866   :  { %v1185_v49 = vsel %vm383_vm8, %v2384_v38, 0.0 }
 0x867   :  { %1186 = vadd.xlane.f32.xlu0 %v1185_v49 }
 0x87b   :  { %1317 = vrot.lane.b32.xlu0 %v2710_v63, %s2466_s12 }
 0x897   :  { %v1059_v46 = vpop.permute.xlu2 %1058 }
 0x898   :  { %v1083_v51 = vadd.f32 %v1082_v6, %v1059_v46 }
 0x89a   :  { %v1092_v55 = vmul.f32 0.35355338, %v1083_v51 }
 0x89c   :  { %v1124_v52 = vadd.f32 %v1108_v54, %v1092_v55 }
 0x89e   :  { %v1146_v0 = vsel %vm383_vm8, %v1124_v52, -inf }
 0x89f   :  { %1147 = vmax.xlane.f32.xlu2 %v1146_v0 }
 0x8a1   :  { %v3065_v3 = vpop.f32.mrf.mxu0 }
 0x8a7   :  { %v1029_v59 = vpop.permute.xlu1 %1028 }
 0x8a8   :  { %v1053_v60 = vadd.f32 %v3007_v61, %v1029_v59 }
 0x8a9   :  { %v3067_v4 = vpop.f32.mrf.mxu0 }
 0x8aa   :  { %v1091_v56 = vmul.f32 0.35355338, %v1053_v60 }
 0x8ac   :  { %v1123_v2 = vadd.f32 %v1107_v33, %v1091_v56 }
 0x8ae   :  { %v1143_v63 = vsel %vm383_vm8, %v1123_v2, -inf }
 0x8af   :  { %1144 = vmax.xlane.f32.xlu1 %v1143_v63  ;;  %v2322_v63 = vpack.i.bf16 %v2725_v5, %v2733_v8 }
 0x8b1   :  { %v3072_v61 = vpop.f32.mrf.mxu0 }
 0x8b9   :  { %v1630_v29 = vpop.f32.mrf.mxu0 }
 0x8ba   :  { %v1631_v47 = vadd.f32 %v1630_v29, %v1612_v28 }
 0x8bc   :  { %v1638_v13 = vmul.f32 0.044715, %v1631_v47  ;;  %v1636_v50 = vmul.f32 0.5, %v1631_v47 }
 0x8be   :  { %v1640_v58 = vmul.f32 %v1638_v13, %v1631_v47 }
 0x8c0   :  { %v1642_v37 = vmul.f32 %v1640_v58, %v1631_v47 }
 0x8c1   :  { %v1633_v31 = vpop.f32.mrf.mxu0 }
 0x8c2   :  { %v1634_v32 = vadd.f32 %v1633_v31, %v1612_v28  ;;  %v1644_v16 = vadd.f32 %v1642_v37, %v1631_v47 }
 0x8c4   :  { %v1639_v57 = vmul.f32 0.044715, %v1634_v32  ;;  %v1646_v62 = vmul.f32 0.7978846, %v1644_v16  ;;  %v1637_v44 = vmul.f32 0.5, %v1634_v32 }
 0x8c6   :  { %v1641_v30 = vmul.f32 %v1639_v57, %v1634_v32 }
 0x8c8   :  { %v1643_v39 = vmul.f32 %v1641_v30, %v1634_v32  ;;  %v1423_v30 = vld [vmem:[%s3351_s3 + $0x150] sm:$0xff] }
 0x8ca   :  { %v1645_v43 = vadd.f32 %v1643_v39, %v1634_v32 }
 0x8cc   :  { %v1647_v19 = vmul.f32 0.7978846, %v1645_v43 }
 0x8da   :  { %v1187_v35 = vpop.xlane.xlu0 %1186 }
 0x8db   :  { %2385 = vrcp.f32 %v1187_v35  ;;  %v25_v35 = vld [vmem:[%s3350_s2 + $0x8] sm:$0xff] }
 0x8dc   :  { %2387 = vtanh.f32 %v1646_v62 }
 0x8e1   :  { %v2386_v6 = vpop.eup %2385 }
 0x8e2   :  { %v1209_v7 = vmul.f32 %v2386_v6, %v2384_v38  ;;  %v2388_v45 = vpop.eup %2387  ;;  %v2468_v6 = vmov 1  }
 0x8e3   :  { %v1650_v49 = vadd.f32 1.0, %v2388_v45 }
 0x8e5   :  { %v1652_v51 = vmul.f32 %v1650_v49, %v1636_v50 }
 0x8ed   :  { %v1318_v9 = vpop.permute.xlu0 %1317 }
 0x8ee   :  { %1338 = vmatpush.msra.mxu3 %v1318_v9 }
 0x8ef   :  { %2259 = vmatmul.msk.f32.vlgmr.msra.gmra.mxu3 %vm383_vm8, %v1209_v7 }
 0x8f0   :  { %1446 = vmatpush.msrb.mxu3 %v1421_v20 }
 0x8f2   :  { %1579 = vmatpush.msra.mxu3 %v1559_v11  ;;  %v2469_v11 = vmov 2  }
 0x8f3   :  { %2342 = vset.pattern.permute.xlu0 %v2469_v11 }
 0x8f4   :  { %1580 = vmatpush.msra.mxu3 %v1558_v12 }
 0x8f6   :  { %1581 = vmatpush.msra.mxu3 %v1557_v14 }
 0x8f7   :  { %2263 = vmatmul.msk.f32.vlgmr.msrb.gmra.mxu3 %vm383_vm8, %v1236_v18 }
 0x8f8   :  { %1582 = vmatpush.msra.mxu3 %v1556_v17 }
 0x8ff   :  { %2264 = vmatmul.msk.f32.gmra.mxu3 %vm383_vm8, %v1262_v1  ;;  %v2467_v1 = vmov 0  }
 0x900   :  { %2327 = vset.pattern.permute.xlu2 %v2467_v1  ;;  %2328 = vset.pattern.permute.xlu1 %v2467_v1  ;;  %v1769_v1 = vld [vmem:[%s3351_s3 + $0xc0] sm:$0xff] }
 0x907   :  { %2271 = vmatmul.msk.f32.vlgmr.msra.gmra.mxu3 %vm34_vm0, %v3044_v36 }
 0x90f   :  { %2272 = vmatmul.msk.f32.gmra.mxu3 %vm34_vm0, %v3052_v42 }
 0x912   :  { %v1148_v40 = vpop.xlane.xlu2 %1147 }
 0x913   :  { %v1156_v41 = vsub.f32 %v1124_v52, %v1148_v40  ;;  %v1654_v52 = vsel %vm34_vm0, %v1652_v51, 0.0 }
 0x915   :  { %v1171_v34 = vmul.f32 1.442695, %v1156_v41 }
 0x917   :  { %2389 = vpow2.f32 %v1171_v34 }
 0x918   :  { %2391 = vtanh.f32 %v1647_v19 }
 0x91d   :  { %v2390_v38 = vpop.eup %2389 }
 0x91e   :  { %v1194_v36 = vsel %vm383_vm8, %v2390_v38, 0.0  ;;  %v2392_v42 = vpop.eup %2391 }
 0x91f   :  { %1195 = vadd.xlane.f32.xlu2 %v1194_v36  ;;  %v1651_v0 = vadd.f32 1.0, %v2392_v42  ;;  %v1560_v36 = vperm.slane %v3091_v27, 5 }
 0x921   :  { %v1653_v59 = vmul.f32 %v1651_v0, %v1637_v44  ;;  %v1771_v44 = vld [vmem:[%s3351_s3 + $0xd0] sm:$0xff] }
 0x922   :  { %v1145_v46 = vpop.xlane.xlu1 %1144 }
 0x923   :  { %v1155_v54 = vsub.f32 %v1123_v2, %v1145_v46  ;;  %v1657_v56 = vsel %vm34_vm0, %v1653_v59, 0.0  ;;  %v24_v2 = vld [vmem:[%s3350_s2] sm:$0xff] }
 0x925   :  { %v1169_v55 = vmul.f32 1.442695, %v1155_v54 }
 0x927   :  { %2393 = vpow2.f32 %v1169_v55  ;;  %1655 = vadd.xlane.f32.xlu2 %v1654_v52  ;;  %v1772_v55 = vld [vmem:[%s3351_s3 + $0xd8] sm:$0xff] }
 0x92d   :  { %v2394_v60 = vpop.eup %2393 }
 0x92e   :  { %v1191_v33 = vsel %vm383_vm8, %v2394_v60, 0.0 }
 0x92f   :  { %1192 = vadd.xlane.f32.xlu1 %v1191_v33  ;;  %1658 = vadd.xlane.f32.xlu2 %v1657_v56  ;;  %v1770_v33 = vld [vmem:[%s3351_s3 + $0xc8] sm:$0xff] }
 0x947   :  { %1706 = vperm.xlu2 %2327, %v24_v2  }
 0x948   :  { %2323 = vrot.lane.b32.xlu1 %v2322_v63, %s2466_s12 }
 0x94f   :  { %2331 = vset.pattern.permute.xlu2 %v2468_v6 }
 0x950   :  { %1711 = vperm.xlu1 %2328, %v25_v35  }
 0x958   :  { %2329 = vset.pattern.permute.xlu1 %v2468_v6 }
 0x959   :  { %1726 = vperm.xlu1 %2329, %v24_v2  }
 0x961   :  { %2330 = vset.pattern.permute.xlu1 %v2469_v11 }
 0x962   :  { %1750 = vperm.xlu1 %2330, %v24_v2  }
 0x96a   :  { %1754 = vperm.xlu1 %2330, %v25_v35  }
 0x972   :  { %v1340_v62 = vpop.f32.mrf.mxu3 }
 0x97a   :  { %v3132_v39 = vpop.f32.mrf.mxu3 }
 0x982   :  { %v3134_v40 = vpop.f32.mrf.mxu3 }
 0x98a   :  { %v1584_v45 = vpop.f32.mrf.mxu3 }
 0x98b   :  { %v3144_v50 = vadd.f32 %v1584_v45, %v1560_v36 }
 0x98d   :  { %v1592_v52 = vmul.f32 0.044715, %v3144_v50 }
 0x98f   :  { %v1594_v56 = vmul.f32 %v1592_v52, %v3144_v50 }
 0x991   :  { %v1596_v11 = vmul.f32 %v1594_v56, %v3144_v50 }
 0x992   :  { %v1196_v7 = vpop.xlane.xlu2 %1195 }
 0x993   :  { %2395 = vrcp.f32 %v1196_v7 }
 0x999   :  { %v2396_v13 = vpop.eup %2395 }
 0x99a   :  { %v1656_v5 = vpop.xlane.xlu2 %1655  ;;  %v1212_v37 = vmul.f32 %v2396_v13, %v2390_v38  ;;  %v1424_v38 = vld [vmem:[%s3351_s3 + $0x158] sm:$0xff] }
 0x99b   :  { %v1660_v8 = vmul.f32 %v1656_v5, %v2517_v10  ;;  %v3167_v5 = vld [vmem:[%s3351_s3 + $0x188] sm:$0xff] }
 0x99d   :  { %v3113_v9 = vsub.f32 %v1652_v51, %v1660_v8  ;;  %v1698_v8 = vperm.slane %v3091_v27, 7 }
 0x99f   :  { %v1664_v20 = vmul.f32 %v3113_v9, %v3113_v9 }
 0x9a1   :  { %v1666_v12 = vsel %vm34_vm0, %v1664_v20, 0.0 }
 0x9a2   :  { %1667 = vadd.xlane.f32.xlu0 %v1666_v12  ;;  %v1659_v14 = vpop.xlane.xlu2 %1658  ;;  %v1193_v47 = vpop.xlane.xlu1 %1192 }
 0x9a3   :  { %v1661_v17 = vmul.f32 %v1659_v14, %v2517_v10  ;;  %2397 = vrcp.f32 %v1193_v47 }
 0x9a5   :  { %v3119_v18 = vsub.f32 %v1653_v59, %v1661_v17  ;;  %v1587_v59 = vpop.f32.mrf.mxu3 }
 0x9a6   :  { %v3159_v63 = vadd.f32 %v1587_v59, %v1560_v36  ;;  %v1716_v36 = vld [vmem:[%s3351_s3 + $0x160] sm:$0x7] }
 0x9a7   :  { %v1665_v29 = vmul.f32 %v3119_v18, %v3119_v18 }
 0x9a8   :  { %v1593_v12 = vmul.f32 0.044715, %v3159_v63 }
 0x9a9   :  { %v1669_v28 = vsel %vm34_vm0, %v1665_v29, 0.0  ;;  %v2398_v31 = vpop.eup %2397 }
 0x9aa   :  { %1670 = vadd.xlane.f32.xlu2 %v1669_v28  ;;  %v1211_v16 = vmul.f32 %v2398_v31, %v2394_v60  ;;  %v3136_v41 = vpop.permute.xlu2 %1706  ;;  %v1701_v28 = vperm.slane %v3167_v5, 0  ;;  %v1598_v31 = vadd.f32 %v1596_v11, %v3144_v50 }
 0x9ba   :  { %v2324_v32 = vpop.permute.xlu1 %2323 }
 0x9bb   :  { %v2326_v58 = vunpack.i.h.bf16 %v2324_v32  ;;  %v2325_v57 = vunpack.i.l.bf16 %v2324_v32  ;;  %v1595_v32 = vmul.f32 %v1593_v12, %v3159_v63 }
 0x9bd   :  { %1390 = vmatpush.msra.mxu1 %v2325_v57  ;;  %1416 = vmatpush.msra.mxu2 %v2326_v58 }
 0x9be   :  { %2261 = vmatmul.msk.f32.vlgmr.msra.gmra.mxu1 %vm383_vm8, %v1211_v16  ;;  %2262 = vmatmul.msk.f32.vlgmr.msra.gmra.mxu2 %vm383_vm8, %v1212_v37 }
 0x9bf   :  { %1509 = vmatpush.msrb.mxu1 %v1423_v30  ;;  %1540 = vmatpush.msrb.mxu2 %v1424_v38  ;;  %v1600_v30 = vmul.f32 0.7978846, %v1598_v31 }
 0x9c1   :  { %1792 = vmatpush.msra.mxu1 %v1772_v55 }
 0x9c2   :  { %1730 = vperm.xlu2 %2331, %v25_v35   ;;  %v3146_v42 = vpop.permute.xlu1 %1711 }
 0x9c3   :  { %1793 = vmatpush.msra.mxu1 %v1771_v44 }
 0x9c5   :  { %1794 = vmatpush.msra.mxu1 %v1770_v33 }
 0x9c6   :  { %2267 = vmatmul.msk.f32.vlgmr.msrb.gmra.mxu1 %vm383_vm8, %v1340_v62 }
 0x9c7   :  { %1795 = vmatpush.msra.mxu1 %v1769_v1 }
 0x9cb   :  { %v3170_v20 = vpop.permute.xlu1 %1726 }
 0x9ce   :  { %2268 = vmatmul.msk.f32.gmra.mxu1 %vm383_vm8, %v3065_v3 }
 0xa15   :  { %v1668_v34 = vpop.xlane.xlu0 %1667 }
 0xa16   :  { %v1672_v43 = vmul.f32 %v1668_v34, %v2517_v10 }
 0xa18   :  { %v1674_v19 = vadd.f32 1e-05, %v1672_v43 }
 0xa1a   :  { %2399 = vrsqrt.f32 %v1674_v19  ;;  %vm1682_vm3 = vweird.f32 %v1674_v19 }
 0xa1d   :  { %v1671_v3 = vpop.xlane.xlu2 %1670 }
 0xa1e   :  { %v1673_v49 = vmul.f32 %v1671_v3, %v2517_v10 }
 0xa20   :  { %v2400_v46 = vpop.eup %2399  ;;  %v1675_v51 = vadd.f32 1e-05, %v1673_v49 }
 0xa21   :  { %v1677_v54 = vmul.f32 %v2400_v46, %v1674_v19  ;;  %vm1683_vm2 = vweird.f32 %v2400_v46  ;;  %v3181_v19 = vpop.permute.xlu1 %1750 }
 0xa22   :  { %2401 = vrsqrt.f32 %v1675_v51  ;;  %vm1684_vm4 = vmor %vm1682_vm3, %vm1683_vm2  ;;  %vm1692_vm6 = vweird.f32 %v1675_v51 }
 0xa23   :  { %v1678_v0 = vmul.f32 %v2400_v46, %v1677_v54  ;;  %2403 = vtanh.f32 %v1600_v30  ;;  %v1738_v54 = vperm.slane %v1716_v36, 1 }
 0xa25   :  { %v1679_v60 = vmul.f32 0.5, %v1678_v0  ;;  %v3191_v33 = vpop.permute.xlu2 %1730 }
 0xa27   :  { %v1680_v2 = vsub.f32 1.5, %v1679_v60 }
 0xa28   :  { %v2402_v35 = vpop.eup %2401 }
 0xa29   :  { %v1681_v6 = vmul.f32 %v2400_v46, %v1680_v2  ;;  %v1687_v7 = vmul.f32 %v2402_v35, %v1675_v51  ;;  %vm1693_vm5 = vweird.f32 %v2402_v35  ;;  %v2404_v56 = vpop.eup %2403  ;;  %v1759_v2 = vperm.slane %v1716_v36, 2 }
 0xa2a   :  { %vm1694_vm7 = vmor %vm1692_vm6, %vm1693_vm5 }
 0xa2b   :  { %v1685_v14 = vsel %vm1684_vm4, %v2400_v46, %v1681_v6  ;;  %v1688_v17 = vmul.f32 %v2402_v35, %v1687_v7  ;;  %v1735_v46 = vperm.slane %v1716_v36, 0  ;;  %v3194_v6 = vpop.permute.xlu1 %1754 }
 0xa2c   :  { %v1696_v29 = vmul.f32 %v1685_v14, %v3113_v9  ;;  %v1597_v9 = vmul.f32 %v1595_v32, %v3159_v63  ;;  %v1590_v32 = vmul.f32 0.5, %v3144_v50  ;;  %v1882_v50 = vld [vmem:[%s3351_s3 + $0xf8] sm:$0xff] }
 0xa2d   :  { %v1689_v47 = vmul.f32 0.5, %v1688_v17  ;;  %v1604_v17 = vadd.f32 1.0, %v2404_v56  ;;  %1936 = vmatpush.msrb.mxu3 %v1882_v50 }
 0xa2e   :  { %v1699_v13 = vmul.f32 %v1698_v8, %v1696_v29  ;;  %v1599_v3 = vadd.f32 %v1597_v9, %v3159_v63  ;;  %v1764_v29 = vperm.slane %v3167_v5, 1 }
 0xa2f   :  { %v1690_v58 = vsub.f32 1.5, %v1689_v47 }
 0xa30   :  { %v1702_v57 = vadd.f32 %v1701_v28, %v1699_v13  ;;  %v1601_v52 = vmul.f32 0.7978846, %v1599_v3 }
 0xa31   :  { %v1691_v37 = vmul.f32 %v2402_v35, %v1690_v58 }
 0xa32   :  { %v1714_v16 = vmul.f32 %v3136_v41, %v1702_v57  ;;  %2405 = vtanh.f32 %v1601_v52  ;;  %v1887_v52 = vld [vmem:[%s3351_s3 + $0x110] sm:$0xff] }
 0xa33   :  { %v1695_v62 = vsel %vm1694_vm7, %v2402_v35, %v1691_v37 }
 0xa34   :  { %v1697_v34 = vmul.f32 %v1695_v62, %v3119_v18  ;;  %v1719_v43 = vrot.slane %v1714_v16, 7  ;;  %v1743_v60 = vrot.slane %v1714_v16, 1  ;;  %v1739_v1 = vmul.f32 %v1738_v54, %v1714_v16 }
 0xa35   :  { %v1606_v16 = vmul.f32 %v1604_v17, %v1590_v32 }
 0xa36   :  { %v1700_v45 = vmul.f32 %v1698_v8, %v1697_v34  ;;  %v1724_v38 = vsel %vm782_vm9, 0.0, %v1719_v43 }
 0xa37   :  { %v1733_v51 = vmul.f32 %v3170_v20, %v1724_v38  ;;  %v1591_v38 = vmul.f32 0.5, %v3159_v63  ;;  %v1880_v63 = vld [vmem:[%s3351_s3 + $0xe8] sm:$0xff] }
 0xa38   :  { %v1703_v49 = vadd.f32 %v1701_v28, %v1700_v45  ;;  %v2406_v9 = vpop.eup %2405 }
 0xa39   :  { %v1736_v59 = vmul.f32 %v1735_v46, %v1733_v51  ;;  %v1605_v45 = vadd.f32 1.0, %v2406_v9  ;;  %v1454_v51 = vperm.slane %v3091_v27, 4 }
 0xa3a   :  { %v1715_v18 = vmul.f32 %v3146_v42, %v1703_v49 }
 0xa3b   :  { %v1392_v55 = vpop.f32.mrf.mxu1  ;;  %v1741_v14 = vadd.f32 %v1739_v1, %v1736_v59  ;;  %v1607_v3 = vmul.f32 %v1605_v45, %v1591_v38  ;;  %v1885_v59 = vld [vmem:[%s3351_s3 + $0x100] sm:$0xff] }
 0xa3c   :  { %v1720_v0 = vrot.slane %v1715_v18, 7  ;;  %v1744_v44 = vrot.slane %v1715_v18, 1  ;;  %2269 = vmatmul.msk.f32.vlgmr.msrb.gmra.mxu2 %vm383_vm8, %v1392_v55  ;;  %v1740_v28 = vmul.f32 %v1738_v54, %v1715_v18  ;;  %v1888_v18 = vld [vmem:[%s3351_s3 + $0x118] sm:$0xff]  ;;  %v1879_v55 = vld [vmem:[%s3351_s3 + $0xe0] sm:$0xff] }
 0xa3d   :  { %1907 = vmatpush.msra.mxu2 %v1888_v18  ;;  %v1839_v18 = vperm.slane %v3167_v5, 3 }
 0xa3e   :  { %v1745_v35 = vsel %vm836_vm1, %v1743_v60, %v1744_v44  ;;  %v1748_v7 = vsel %vm836_vm1, %v1744_v44, 0.0  ;;  %v1721_v8 = vsel %vm782_vm9, %v1719_v43, %v1720_v0  ;;  %v1455_v0 = vadd.f32 %v1454_v51, %v3132_v39  ;;  %v1886_v44 = vld [vmem:[%s3351_s3 + $0x108] sm:$0xff] }
 0xa3f   :  { %v1757_v11 = vmul.f32 %v3181_v19, %v1745_v35  ;;  %v1734_v12 = vmul.f32 %v3191_v33, %v1721_v8  ;;  %v1758_v13 = vmul.f32 %v3194_v6, %v1748_v7  ;;  %1908 = vmatpush.msra.mxu2 %v1887_v52  ;;  %v1456_v35 = vadd.f32 %v1454_v51, %v3134_v40 }
 0xa40   :  { %v1486_v60 = vadd.f32 %v3067_v4, %v1455_v0  ;;  %v1773_v8 = vperm.slane %v3167_v5, 2  ;;  %v1807_v4 = vld [vmem:[%s3351_s3 + $0x168] sm:$0x7] }
 0xa41   :  { %v1760_v47 = vmul.f32 %v1759_v2, %v1757_v11  ;;  %v1737_v31 = vmul.f32 %v1735_v46, %v1734_v12  ;;  %v1418_v37 = vpop.f32.mrf.mxu2  ;;  %v1761_v62 = vmul.f32 %v1759_v2, %v1758_v13  ;;  %v1881_v46 = vld [vmem:[%s3351_s3 + $0xf0] sm:$0xff]  ;;  %1909 = vmatpush.msra.mxu2 %v1886_v44  ;;  %v1487_v11 = vadd.f32 %v3072_v61, %v1456_v35 }
 0xa42   :  { %1937 = vmatpush.msrb.mxu3 %v1881_v46 }
 0xa43   :  { %v1762_v58 = vadd.f32 %v1760_v47, %v1741_v14  ;;  %v1742_v57 = vadd.f32 %v1740_v28, %v1737_v31  ;;  %v1511_v54 = vpop.f32.mrf.mxu1  ;;  %1910 = vmatpush.msra.mxu2 %v1885_v59  ;;  %v1818_v31 = vperm.slane %v1807_v4, 0 }
 0xa44   :  { %2270 = vmatmul.msk.f32.gmra.mxu2 %vm383_vm8, %v1418_v37  ;;  %1938 = vmatpush.msrb.mxu3 %v1880_v63  ;;  %v1517_v56 = vadd.f32 %v1511_v54, %v1486_v60 }
 0xa45   :  { %v1765_v30 = vadd.f32 %v1764_v29, %v1762_v58  ;;  %v1763_v43 = vadd.f32 %v1761_v62, %v1742_v57  ;;  %v1821_v58 = vperm.slane %v1807_v4, 1 }
 0xa46   :  { %1939 = vmatpush.msrb.mxu3 %v1879_v55 }
 0xa47   :  { %v1767_v34 = vmul.f32 %v1765_v30, %v1606_v16  ;;  %v1766_v36 = vadd.f32 %v1764_v29, %v1763_v43  ;;  %v1842_v16 = vld [vmem:[%s3351_s3 + $0x170] sm:$0x7] }
 0xa48   :  { %v1853_v45 = vperm.slane %v1842_v16, 0  ;;  %v1856_v63 = vperm.slane %v1842_v16, 1 }
 0xa49   :  { %2275 = vmatmul.msk.f32.vlgmr.msra.gmra.mxu1 %vm34_vm0, %v1767_v34  ;;  %v1768_v49 = vmul.f32 %v1766_v36, %v1607_v3  ;;  %v1834_v34 = vperm.slane %v1807_v4, 2 }
 0xa4b   :  { %v1514_v2 = vpop.f32.mrf.mxu1 }
 0xa4c   :  { %v1518_v14 = vadd.f32 %v1514_v2, %v1487_v11 }
 0xa51   :  { %2276 = vmatmul.msk.f32.gmra.mxu1 %vm34_vm0, %v1768_v49 }
 0xabf   :  { %v1542_v1 = vpop.f32.mrf.mxu2 }
 0xac0   :  { %v1548_v39 = vadd.f32 %v1542_v1, %v1517_v56 }
 0xac2   :  { %v1803_v7 = vmul.f32 %v3136_v41, %v1548_v39 }
 0xac4   :  { %v1810_v12 = vrot.slane %v1803_v7, 7  ;;  %v1826_v37 = vrot.slane %v1803_v7, 1  ;;  %v1822_v38 = vmul.f32 %v1821_v58, %v1803_v7 }
 0xac6   :  { %v1815_v17 = vsel %vm782_vm9, 0.0, %v1810_v12  ;;  %v1797_v29 = vpop.f32.mrf.mxu1 }
 0xac7   :  { %v1798_v28 = vadd.f32 %v1797_v29, %v1773_v8  ;;  %v1545_v47 = vpop.f32.mrf.mxu2  ;;  %v1816_v40 = vmul.f32 %v1815_v17, %v3170_v20 }
 0xac8   :  { %v1549_v13 = vadd.f32 %v1545_v47, %v1518_v14 }
 0xac9   :  { %v1805_v32 = vmul.f32 %v1798_v28, %v3136_v41  ;;  %v1819_v9 = vmul.f32 %v1818_v31, %v1816_v40 }
 0xaca   :  { %v1804_v61 = vmul.f32 %v3146_v42, %v1549_v13 }
 0xacb   :  { %v1845_v57 = vrot.slane %v1805_v32, 7  ;;  %v1824_v52 = vadd.f32 %v1822_v38, %v1819_v9  ;;  %v1861_v60 = vrot.slane %v1805_v32, 1  ;;  %v1857_v39 = vmul.f32 %v1856_v63, %v1805_v32 }
 0xacc   :  { %v1811_v30 = vrot.slane %v1804_v61, 7  ;;  %v1827_v62 = vrot.slane %v1804_v61, 1  ;;  %v1823_v56 = vmul.f32 %v1821_v58, %v1804_v61  ;;  %v1874_v58 = vperm.slane %v3167_v5, 4 }
 0xacd   :  { %v1850_v43 = vsel %vm782_vm9, 0.0, %v1845_v57 }
 0xace   :  { %v1828_v36 = vsel %vm836_vm1, %v1826_v37, %v1827_v62  ;;  %v1831_v41 = vsel %vm836_vm1, %v1827_v62, 0.0  ;;  %v1800_v3 = vpop.f32.mrf.mxu1  ;;  %v1812_v49 = vsel %vm782_vm9, %v1810_v12, %v1811_v30  ;;  %v1851_v50 = vmul.f32 %v1850_v43, %v3170_v20 }
 0xacf   :  { %v1832_v46 = vmul.f32 %v1828_v36, %v3181_v19  ;;  %v1801_v51 = vadd.f32 %v1800_v3, %v1773_v8  ;;  %v1817_v54 = vmul.f32 %v1812_v49, %v3191_v33  ;;  %v1833_v55 = vmul.f32 %v1831_v41, %v3194_v6 }
 0xad0   :  { %v1854_v2 = vmul.f32 %v1853_v45, %v1851_v50  ;;  %v1869_v8 = vperm.slane %v1842_v16, 2 }
 0xad1   :  { %v1806_v0 = vmul.f32 %v1801_v51, %v3146_v42  ;;  %v1835_v44 = vmul.f32 %v1834_v34, %v1832_v46  ;;  %v1820_v59 = vmul.f32 %v1818_v31, %v1817_v54  ;;  %v1836_v12 = vmul.f32 %v1834_v34, %v1833_v55 }
 0xad2   :  { %v1859_v13 = vadd.f32 %v1857_v39, %v1854_v2  ;;  %v2425_v2 = vld [vmem:[%s3352_s4 + $0x48] ss:$0 sm:$0xff] }
 0xad3   :  { %v1846_v1 = vrot.slane %v1806_v0, 7  ;;  %v1862_v20 = vrot.slane %v1806_v0, 1  ;;  %v1837_v35 = vadd.f32 %v1835_v44, %v1824_v52  ;;  %v1825_v11 = vadd.f32 %v1823_v56, %v1820_v59 }
 0xad4   :  { %v1858_v40 = vmul.f32 %v1856_v63, %v1806_v0 }
 0xad5   :  { %v1863_v14 = vsel %vm836_vm1, %v1861_v60, %v1862_v20  ;;  %v1866_v17 = vsel %vm836_vm1, %v1862_v20, 0.0  ;;  %v1840_v29 = vadd.f32 %v1839_v18, %v1837_v35  ;;  %v1847_v4 = vsel %vm782_vm9, %v1845_v57, %v1846_v1 }
 0xad6   :  { %v1867_v42 = vmul.f32 %v1863_v14, %v3181_v19  ;;  %v1838_v28 = vadd.f32 %v1836_v12, %v1825_v11  ;;  %v1852_v47 = vmul.f32 %v1847_v4, %v3191_v33  ;;  %v1868_v62 = vmul.f32 %v1866_v17, %v3194_v6 }
 0xad7   :  { %v1877_v31 = vadd.f32 %v1840_v29, %v1803_v7  ;;  %v1947_v6 = vperm.slane %v3167_v5, 5 }
 0xad8   :  { %v1870_v37 = vmul.f32 %v1869_v8, %v1867_v42  ;;  %v1841_v16 = vadd.f32 %v1839_v18, %v1838_v28  ;;  %v1855_v30 = vmul.f32 %v1853_v45, %v1852_v47  ;;  %v1871_v19 = vmul.f32 %v1869_v8, %v1868_v62 }
 0xad9   :  { %2279 = vmatmul.msk.f32.vlgmr.msrb.gmra.mxu3 %vm34_vm0, %v1877_v31  ;;  %v1996_v47 = vperm.slane %v3028_v15, 6 }
 0xada   :  { %v1872_v9 = vadd.f32 %v1870_v37, %v1859_v13  ;;  %v1878_v34 = vadd.f32 %v1841_v16, %v1804_v61  ;;  %v1860_v57 = vadd.f32 %v1858_v40, %v1855_v30  ;;  %v1999_v16 = vperm.slane %v3028_v15, 7  ;;  %v2098_v15 = vld [vmem:[%s3351_s3 + $0x78] sm:$0xff] }
 0xadb   :  { %2114 = vmatpush.msrb.mxu1 %v2098_v15 }
 0xadc   :  { %v1875_v43 = vadd.f32 %v1874_v58, %v1872_v9  ;;  %v1873_v36 = vadd.f32 %v1871_v19, %v1860_v57 }
 0xade   :  { %v1883_v38 = vadd.f32 %v1875_v43, %v1805_v32  ;;  %v1876_v33 = vadd.f32 %v1874_v58, %v1873_v36  ;;  %v2097_v36 = vld [vmem:[%s3351_s3 + $0x70] sm:$0xff] }
 0xadf   :  { %2115 = vmatpush.msrb.mxu1 %v2097_v36 }
 0xae0   :  { %2277 = vmatmul.msk.f32.vlgmr.msra.gmra.mxu2 %vm34_vm0, %v1883_v38  ;;  %v1884_v7 = vadd.f32 %v1876_v33, %v1806_v0  ;;  %v2096_v33 = vld [vmem:[%s3351_s3 + $0x68] sm:$0xff] }
 0xae1   :  { %2280 = vmatmul.msk.f32.gmra.mxu3 %vm34_vm0, %v1878_v34  ;;  %2116 = vmatpush.msrb.mxu1 %v2096_v33 }
 0xae8   :  { %2278 = vmatmul.msk.f32.gmra.mxu2 %vm34_vm0, %v1884_v7  ;;  %v2095_v7 = vld [vmem:[%s3351_s3 + $0x60] sm:$0xff] }
 0xae9   :  { %2117 = vmatpush.msrb.mxu1 %v2095_v7 }
 0xb5c   :  { %v1941_v45 = vpop.f32.mrf.mxu3 }
 0xb63   :  { %v1912_v41 = vpop.f32.mrf.mxu2 }
 0xb64   :  { %v1942_v3 = vadd.f32 %v1941_v45, %v1912_v41  ;;  %v1944_v50 = vpop.f32.mrf.mxu3  ;;  %v2094_v45 = vld [vmem:[%s3351_s3 + $0x58] sm:$0xff] }
 0xb65   :  { %2118 = vmatpush.msrb.mxu1 %v2094_v45 }
 0xb66   :  { %v1948_v49 = vadd.f32 %v1947_v6, %v1942_v3  ;;  %v2092_v3 = vld [vmem:[%s3351_s3 + $0x48] sm:$0xff] }
 0xb68   :  { %v3271_v61 = vadd.f32 %v1948_v49, %v2601_v48 }
 0xb6a   :  { %v1952_v32 = vsel %vm34_vm0, %v3271_v61, 0.0 }
 0xb6b   :  { %1953 = vadd.xlane.f32.xlu0 %v1952_v32  ;;  %v1915_v46 = vpop.f32.mrf.mxu2  ;;  %v2091_v32 = vld [vmem:[%s3351_s3 + $0x40] sm:$0xff] }
 0xb6c   :  { %v1945_v51 = vadd.f32 %v1944_v50, %v1915_v46 }
 0xb6e   :  { %v1949_v54 = vadd.f32 %v1947_v6, %v1945_v51  ;;  %v2093_v6 = vld [vmem:[%s3351_s3 + $0x50] sm:$0xff]  ;;  %s2470_s3 = smov [#allocation2]  }
 0xb6f   :  { %2119 = vmatpush.msrb.mxu1 %v2093_v6  ;;  %s2189_s15 = sshll.u32 %s2470_s3, 4  ;;  %s2190_s15 = int_to_ptr.vmem [resolvable:$true] %s2189_s15 }
 0xb70   :  { %v3276_v63 = vadd.f32 %v1949_v54, %v2606_v53 }
 0xb71   :  { %2120 = vmatpush.msrb.mxu1 %v2092_v3 }
 0xb72   :  { %v1955_v5 = vsel %vm34_vm0, %v3276_v63, 0.0 }
 0xb73   :  { %1956 = vadd.xlane.f32.xlu2 %v1955_v5  ;;  %2121 = vmatpush.msrb.mxu1 %v2091_v32 }
 0xb7f   :  { %2333 = vrot.lane.b32.xlu0 %v2332_v25, %s2466_s12 }
 0xbde   :  { %v1954_v48 = vpop.xlane.xlu0 %1953 }
 0xbdf   :  { %v1958_v18 = vmul.f32 %v1954_v48, %v2517_v10 }
 0xbe1   :  { %v1960_v55 = vsub.f32 %v3271_v61, %v1958_v18 }
 0xbe3   :  { %v1962_v52 = vmul.f32 %v1960_v55, %v1960_v55 }
 0xbe5   :  { %v1964_v0 = vsel %vm34_vm0, %v1962_v52, 0.0 }
 0xbe6   :  { %1965 = vadd.xlane.f32.xlu1 %v1964_v0  ;;  %v1957_v53 = vpop.xlane.xlu2 %1956 }
 0xbe7   :  { %v1959_v44 = vmul.f32 %v1957_v53, %v2517_v10 }
 0xbe9   :  { %v1961_v59 = vsub.f32 %v3276_v63, %v1959_v44 }
 0xbeb   :  { %v1963_v60 = vmul.f32 %v1961_v59, %v1961_v59 }
 0xbed   :  { %v1967_v56 = vsel %vm34_vm0, %v1963_v60, 0.0 }
 0xbee   :  { %1968 = vadd.xlane.f32.xlu0 %v1967_v56 }
 0xbf1   :  { %v2334_v21 = vpop.permute.xlu0 %2333 }
 0xbf2   :  { %v2336_v22 = vunpack.i.h.bf16 %v2334_v21  ;;  %v2335_v25 = vunpack.i.l.bf16 %v2334_v21 }
 0xbf4   :  { %2040 = vmatpush.msra.mxu0 %v2335_v25 }
 0xbf6   :  { %2041 = vmatpush.msra.mxu0 %v2336_v22 }
 0xc02   :  { %2338 = vrot.lane.b32.xlu0 %v2337_v26, %s2466_s12 }
 0xc0a   :  { %2019 = vrot.lane.b32.xlu0 %v2425_v2, %s2466_s12 }
 0xc59   :  { %v1966_v1 = vpop.xlane.xlu1 %1965 }
 0xc5a   :  { %v1970_v20 = vmul.f32 %v1966_v1, %v2517_v10 }
 0xc5c   :  { %v1972_v35 = vadd.f32 1e-05, %v1970_v20 }
 0xc5e   :  { %2407 = vrsqrt.f32 %v1972_v35  ;;  %vm1980_vm9 = vweird.f32 %v1972_v35 }
 0xc61   :  { %v1969_v39 = vpop.xlane.xlu0 %1968 }
 0xc62   :  { %v1971_v8 = vmul.f32 %v1969_v39, %v2517_v10 }
 0xc64   :  { %v2408_v11 = vpop.eup %2407  ;;  %v1973_v12 = vadd.f32 1e-05, %v1971_v8 }
 0xc65   :  { %v1975_v14 = vmul.f32 %v2408_v11, %v1972_v35  ;;  %vm1981_vm8 = vweird.f32 %v2408_v11 }
 0xc66   :  { %2409 = vrsqrt.f32 %v1973_v12  ;;  %vm1982_vm10 = vmor %vm1980_vm9, %vm1981_vm8  ;;  %vm1990_vm13 = vweird.f32 %v1973_v12 }
 0xc67   :  { %v1976_v23 = vmul.f32 %v2408_v11, %v1975_v14 }
 0xc69   :  { %v1977_v24 = vmul.f32 0.5, %v1976_v23 }
 0xc6b   :  { %v1978_v26 = vsub.f32 1.5, %v1977_v24 }
 0xc6c   :  { %v2410_v17 = vpop.eup %2409 }
 0xc6d   :  { %v1979_v29 = vmul.f32 %v2408_v11, %v1978_v26  ;;  %v1985_v4 = vmul.f32 %v2410_v17, %v1973_v12  ;;  %vm1991_vm11 = vweird.f32 %v2410_v17 }
 0xc6e   :  { %vm1992_vm14 = vmor %vm1990_vm13, %vm1991_vm11 }
 0xc6f   :  { %v1983_v42 = vsel %vm1982_vm10, %v2408_v11, %v1979_v29  ;;  %v1986_v28 = vmul.f32 %v2410_v17, %v1985_v4  ;;  %v2099_v29 = vperm.slane %v3091_v27, 3 }
 0xc70   :  { %v1994_v13 = vmul.f32 %v1983_v42, %v1960_v55 }
 0xc71   :  { %v1987_v40 = vmul.f32 0.5, %v1986_v28 }
 0xc72   :  { %v1997_v58 = vmul.f32 %v1996_v47, %v1994_v13 }
 0xc73   :  { %v1988_v31 = vsub.f32 1.5, %v1987_v40 }
 0xc74   :  { %v2339_v37 = vpop.permute.xlu0 %2338  ;;  %v2000_v57 = vadd.f32 %v1999_v16, %v1997_v58 }
 0xc75   :  { %v1989_v30 = vmul.f32 %v2410_v17, %v1988_v31  ;;  %v2340_v62 = vunpack.i.l.bf16 %v2339_v37  ;;  %v2341_v34 = vunpack.i.h.bf16 %v2339_v37 }
 0xc77   :  { %v1993_v9 = vsel %vm1992_vm14, %v2410_v17, %v1989_v30  ;;  %2042 = vmatpush.msra.mxu0 %v2340_v62 }
 0xc78   :  { %v1995_v43 = vmul.f32 %v1993_v9, %v1961_v59 }
 0xc79   :  { %2043 = vmatpush.msra.mxu0 %v2341_v34 }
 0xc7a   :  { %2281 = vmatmul.msk.f32.vlgmr.msra.gmra.mxu0 %vm34_vm0, %v2000_v57  ;;  %v1998_v19 = vmul.f32 %v1996_v47, %v1995_v43 }
 0xc7c   :  { %v2001_v38 = vadd.f32 %v1999_v16, %v1998_v19  ;;  %v2020_v41 = vpop.permute.xlu0 %2019 }
 0xc82   :  { %2282 = vmatmul.msk.f32.gmra.mxu0 %vm34_vm0, %v2001_v38 }
 0xcf7   :  { %v2045_v49 = vpop.f32.mrf.mxu0 }
 0xcf8   :  { %v2046_v50 = vadd.f32 %v2045_v49, %v2020_v41 }
 0xcfa   :  { %v2283_v46 = vmul.f32 -1.442695, %v2046_v50 }
 0xcfc   :  { %2411 = vpow2.f32 %v2283_v46 }
 0xcff   :  { %v2048_v51 = vpop.f32.mrf.mxu0 }
 0xd00   :  { %v2049_v54 = vadd.f32 %v2048_v51, %v2020_v41 }
 0xd02   :  { %v2412_v5 = vpop.eup %2411  ;;  %v2284_v48 = vmul.f32 -1.442695, %v2049_v54 }
 0xd03   :  { %v2057_v18 = vadd.f32 1.0, %v2412_v5  ;;  %v2177_v5 = vperm.slane %v3091_v27, 0 }
 0xd04   :  { %2413 = vpow2.f32 %v2284_v48 }
 0xd05   :  { %2415 = vrcp.f32 %v2057_v18  ;;  %v2070_v59 = vand.u32 2147483648, %v2057_v18  ;;  %v2068_v56 = vand.u32 2147483647, %v2057_v18  ;;  %vm2064_vm1 = vweird.f32 %v2057_v18 }
 0xd07   :  { %v2071_v25 = vor.u32 1.1754944e-38, %v2070_v59  ;;  %vm2069_vm3 = vcmp.eq.f32.partialorder %v2068_v56, 8.507059e+37 }
 0xd0a   :  { %v2414_v55 = vpop.eup %2413 }
 0xd0b   :  { %v2416_v52 = vpop.eup %2415  ;;  %v2058_v0 = vadd.f32 1.0, %v2414_v55 }
 0xd0c   :  { %v2060_v53 = vmul.f32 %v2416_v52, %v2057_v18  ;;  %vm2065_vm15 = vweird.f32 %v2416_v52 }
 0xd0d   :  { %2417 = vrcp.f32 %v2058_v0  ;;  %vm2066_vm2 = vmor %vm2064_vm1, %vm2065_vm15  ;;  %v2085_v8 = vand.u32 2147483648, %v2058_v0  ;;  %v2083_v12 = vand.u32 2147483647, %v2058_v0  ;;  %vm2079_vm5 = vweird.f32 %v2058_v0 }
 0xd0e   :  { %v2061_v44 = vsub.f32 1.0, %v2060_v53 }
 0xd0f   :  { %v2086_v23 = vor.u32 1.1754944e-38, %v2085_v8  ;;  %vm2084_vm7 = vcmp.eq.f32.partialorder %v2083_v12, 8.507059e+37 }
 0xd10   :  { %v2062_v60 = vmul.f32 %v2416_v52, %v2061_v44 }
 0xd12   :  { %v2063_v21 = vadd.f32 %v2416_v52, %v2062_v60 }
 0xd13   :  { %v2418_v22 = vpop.eup %2417 }
 0xd14   :  { %v2067_v2 = vsel %vm2066_vm2, %v2416_v52, %v2063_v21  ;;  %v2075_v1 = vmul.f32 %v2418_v22, %v2058_v0  ;;  %vm2080_vm4 = vweird.f32 %v2418_v22 }
 0xd15   :  { %v2072_v20 = vsel %vm2069_vm3, %v2071_v25, %v2067_v2  ;;  %vm2081_vm6 = vmor %vm2079_vm5, %vm2080_vm4 }
 0xd16   :  { %v2089_v35 = vmul.f32 %v2072_v20, %v2046_v50  ;;  %v2076_v39 = vsub.f32 1.0, %v2075_v1 }
 0xd18   :  { %v2077_v11 = vmul.f32 %v2418_v22, %v2076_v39  ;;  %2285 = vmatmul.msk.f32.vlgmr.msrb.gmra.mxu1 %vm171_vm12, %v2089_v35 }
 0xd1a   :  { %v2078_v14 = vadd.f32 %v2418_v22, %v2077_v11 }
 0xd1c   :  { %v2082_v24 = vsel %vm2081_vm6, %v2418_v22, %v2078_v14 }
 0xd1d   :  { %v2087_v26 = vsel %vm2084_vm7, %v2086_v23, %v2082_v24 }
 0xd1e   :  { %v2090_v17 = vmul.f32 %v2087_v26, %v2049_v54 }
 0xd20   :  { %2286 = vmatmul.msk.f32.gmra.mxu1 %vm171_vm12, %v2090_v17 }
 0xd95   :  { %v2123_v4 = vpop.f32.mrf.mxu1 }
 0xd96   :  { %v2124_v42 = vadd.f32 %v2123_v4, %v2099_v29 }
 0xd98   :  { %v2129_v28 = vmul.f32 0.5, %v2124_v42 }
 0xd9a   :  { %v2131_v47 = vadd.f32 %v2129_v28, %v3271_v61 }
 0xd9c   :  { %v2133_v13 = vsel %vm34_vm0, %v2131_v47, 0.0 }
 0xd9d   :  { %v2126_v40 = vpop.f32.mrf.mxu1  ;;  %2134 = vadd.xlane.f32.xlu2 %v2133_v13 }
 0xd9e   :  { %v2127_v31 = vadd.f32 %v2126_v40, %v2099_v29 }
 0xda0   :  { %v2130_v58 = vmul.f32 0.5, %v2127_v31 }
 0xda2   :  { %v2132_v37 = vadd.f32 %v2130_v58, %v3276_v63 }
 0xda4   :  { %v2136_v16 = vsel %vm34_vm0, %v2132_v37, 0.0 }
 0xda5   :  { %2137 = vadd.xlane.f32.xlu1 %v2136_v16 }
 0xe10   :  { %v2135_v30 = vpop.xlane.xlu2 %2134 }
 0xe11   :  { %v2139_v62 = vmul.f32 %v2135_v30, %v2517_v10 }
 0xe13   :  { %v2141_v9 = vsub.f32 %v2131_v47, %v2139_v62 }
 0xe15   :  { %v2143_v34 = vmul.f32 %v2141_v9, %v2141_v9 }
 0xe17   :  { %v2145_v57 = vsel %vm34_vm0, %v2143_v34, 0.0 }
 0xe18   :  { %v2138_v43 = vpop.xlane.xlu1 %2137  ;;  %2146 = vadd.xlane.f32.xlu0 %v2145_v57 }
 0xe19   :  { %v2140_v61 = vmul.f32 %v2138_v43, %v2517_v10 }
 0xe1b   :  { %v2142_v19 = vsub.f32 %v2132_v37, %v2140_v61 }
 0xe1d   :  { %v2144_v38 = vmul.f32 %v2142_v19, %v2142_v19 }
 0xe1f   :  { %v2148_v15 = vsel %vm34_vm0, %v2144_v38, 0.0 }
 0xe20   :  { %2149 = vadd.xlane.f32.xlu2 %v2148_v15 }
 0xe8b   :  { %v2147_v63 = vpop.xlane.xlu0 %2146 }
 0xe8c   :  { %v2151_v36 = vmul.f32 %v2147_v63, %v2517_v10 }
 0xe8e   :  { %v2153_v33 = vadd.f32 1e-05, %v2151_v36 }
 0xe90   :  { %2419 = vrsqrt.f32 %v2153_v33  ;;  %vm2161_vm8 = vweird.f32 %v2153_v33 }
 0xe93   :  { %v2150_v7 = vpop.xlane.xlu2 %2149 }
 0xe94   :  { %v2152_v45 = vmul.f32 %v2150_v7, %v2517_v10  ;;  %v2180_v10 = vperm.slane %v3091_v27, 1 }
 0xe96   :  { %v2420_v6 = vpop.eup %2419  ;;  %v2154_v41 = vadd.f32 1e-05, %v2152_v45 }
 0xe97   :  { %v2156_v3 = vmul.f32 %v2420_v6, %v2153_v33  ;;  %vm2162_vm12 = vweird.f32 %v2420_v6 }
 0xe98   :  { %2421 = vrsqrt.f32 %v2154_v41  ;;  %vm2163_vm9 = vmor %vm2161_vm8, %vm2162_vm12  ;;  %vm2171_vm11 = vweird.f32 %v2154_v41 }
 0xe99   :  { %v2157_v49 = vmul.f32 %v2420_v6, %v2156_v3 }
 0xe9b   :  { %v2158_v32 = vmul.f32 0.5, %v2157_v49 }
 0xe9d   :  { %v2159_v50 = vsub.f32 1.5, %v2158_v32 }
 0xe9e   :  { %v2422_v46 = vpop.eup %2421 }
 0xe9f   :  { %v2160_v51 = vmul.f32 %v2420_v6, %v2159_v50  ;;  %v2166_v54 = vmul.f32 %v2422_v46, %v2154_v41  ;;  %vm2172_vm10 = vweird.f32 %v2422_v46 }
 0xea0   :  { %vm2173_vm13 = vmor %vm2171_vm11, %vm2172_vm10 }
 0xea1   :  { %v2164_v48 = vsel %vm2163_vm9, %v2420_v6, %v2160_v51  ;;  %v2167_v18 = vmul.f32 %v2422_v46, %v2166_v54 }
 0xea2   :  { %v2175_v55 = vmul.f32 %v2164_v48, %v2141_v9 }
 0xea3   :  { %v2168_v52 = vmul.f32 0.5, %v2167_v18 }
 0xea4   :  { %v2178_v0 = vmul.f32 %v2177_v5, %v2175_v55 }
 0xea5   :  { %v2169_v53 = vsub.f32 1.5, %v2168_v52 }
 0xea6   :  { %v2181_v44 = vadd.f32 %v2180_v10, %v2178_v0 }
 0xea7   :  { %v2170_v59 = vmul.f32 %v2422_v46, %v2169_v53 }
 0xea8   :  { %2183 = vst.msk [vmem:[#allocation2] sm:$0xff] %vm34_vm0, %v2181_v44 }
 0xea9   :  { %v2174_v60 = vsel %vm2173_vm13, %v2422_v46, %v2170_v59 }
 0xeaa   :  { %v2176_v56 = vmul.f32 %v2174_v60, %v2142_v19 }
 0xeac   :  { %v2179_v21 = vmul.f32 %v2177_v5, %v2176_v56 }
 0xeae   :  { %v2182_v27 = vadd.f32 %v2180_v10, %v2179_v21 }
 0xeb0   :  { %2184 = vst.msk [vmem:[#allocation2 + $0x8] sm:$0xff] %vm34_vm0, %v2182_v27 }
 0xeb1   :  { %2197 = dma.vmem_to_hbm [thread:$0]  %s2190_s15, 256, %s2192_s17, [#allocation3], %s2471_s18, %s2471_s18, %s2472_s19  }
 0xeb2   :  { %2450 = dma.done.wait [#allocation3], 256  }
 0xeb3   :  { %2451 = vsyncadd [#allocation3], 4294967040 }
 0xeb4   :  { %2202 = vsyncpa [#allocation3], 1 }

</bundles_post_ra>
